<compile_context>
chip_gen: v7x
topology: tpu7x:2x2x1
jax: 0.10.0
libtpu: 0.0.40
codegen_flags: <defaults>
</compile_context>

<pallas_src>
import functools

import jax
import jax.numpy as jnp
from jax import lax
from jax.experimental import pallas as pl
from jax.experimental.pallas import tpu as pltpu

B = 2            # batch
T = 736          # time samples (forced by the hard-coded x.view(-1, 736))
K1 = 51          # first conv kernel width
K3 = 15          # separable conv kernel width
T2 = T // 4      # 184 after AvgPool(1, 4)
T3 = T2 // 8     # 23  after AvgPool(1, 8)
PAD3 = 7         # separable conv time padding
NPH = 4          # AvgPool(1,4) phases
NQ = 14          # 4*14 = 56 >= 54 tap offsets needed by the phase-expanded conv
WB = 256         # lane-aligned per-batch column width inside the kernel
NCOL = B * WB    # 512
XQW = 640        # phase-decomposed input row length (>= NCOL + NQ, lane-tile mult)
PBW = 640        # padded pooled-buffer width (>= NCOL + K3, lane-tile mult)

HIGH = jax.lax.Precision.HIGHEST   # reference only


def _elu(v):
    return jnp.where(v > 0, v, jnp.exp(jnp.minimum(v, 0.0)) - 1.0)


def _activation(v, kind):
    if kind == "ELU":
        return _elu(v)
    if kind == "RELU":
        return jnp.maximum(v, 0.0)
    if kind == "L_RELU":
        return jnp.where(v > 0, v, 0.01 * v)
    raise ValueError(kind)


# --------------------------------- kernel ------------------------------------

def eegnet_kernel(xq_ref, wf4_ref, w3_ref, wlp_ref, bias_ref, bcls_ref, out_ref,
                  xcol_ref, pooled_ref, slab_ref, *, activation_type):
    # ---- stage 1: conv1 + BN1 + depthwise conv + BN2, folded.  The im2col slab
    #      rows are (q, p, e) = (tap//4, tap%4+phase, electrode): 14 lane-aligned
    #      full-width 8-row stores build the whole (112, 512) slab.
    for q in range(NQ):
        xcol_ref[8 * q:8 * q + 8, :] = xq_ref[:, q:q + NCOL]
    p2 = jnp.dot(wf4_ref[...], xcol_ref[...].astype(jnp.bfloat16),
                 preferred_element_type=jnp.float32)          # (128, 512) f32
    a2 = _activation(p2 + bias_ref[:, 0:1], activation_type)  # row d*32+c

    # ---- AvgPool(1,4) in f32: the 4 phases live in 32-row blocks -> 3 adds.
    #      (the 1/4 scale is folded into the separable-conv weights)
    pooled = a2[0:32] + a2[32:64] + a2[64:96] + a2[96:128]    # (32, 512)

    # zero-padded pooled buffer: the +/-7 separable-conv pad columns must be 0.
    pooled_ref[...] = jnp.zeros_like(pooled_ref)
    for b in range(B):
        pooled_ref[:, b * WB + PAD3: b * WB + PAD3 + T2] = \
            pooled[:, b * WB: b * WB + T2].astype(pooled_ref.dtype)

    # ---- separableConv + BN3: 15 lane-aligned (32, 512) stores, one K=480 matmul.
    for j in range(K3):
        slab_ref[32 * j:32 * (j + 1), :] = pooled_ref[:, j:j + NCOL]
    pre3 = jnp.dot(w3_ref[...], slab_ref[...],
                   preferred_element_type=jnp.float32)        # (32, 512) f32
    a3 = _elu(pre3 + bias_ref[0:32, 1:2])                     # separable branch is always ELU

    # ---- AvgPool(1,8) + view(-1,736) + Linear folded into wlp (zero-padded to
    #      the 512-lane layout): sublane reduces + aligned 256-lane reduces.
    g0 = jnp.sum(wlp_ref[0:32, :] * a3, axis=0, keepdims=True)    # (1, 512)
    g1 = jnp.sum(wlp_ref[32:64, :] * a3, axis=0, keepdims=True)   # (1, 512)
    g = jnp.concatenate([g0, g1], axis=0)                         # (2=class, 512)
    logits_t = jnp.concatenate(
        [jnp.sum(g[:, b * WB:(b + 1) * WB], axis=1, keepdims=True)
         for b in range(B)], axis=1)                              # (2=class, B)
    out_ref[...] = logits_t + bcls_ref[...]                       # + per-class bias


# ----------------------------- glue / parameters -----------------------------

def _bn_init(key, c):
    k1, k2, k3, k4 = jax.random.split(key, 4)
    gamma = 1.0 + 0.1 * jax.random.normal(k1, (c,), jnp.float32)
    beta = 0.1 * jax.random.normal(k2, (c,), jnp.float32)
    mean = 0.1 * jax.random.normal(k3, (c,), jnp.float32)
    var = 1.0 + 0.1 * jax.random.uniform(k4, (c,), jnp.float32)
    return gamma, beta, mean, var


def init_params(key):
    ks = jax.random.split(key, 8)
    return {
        "w1": 0.1 * jax.random.normal(ks[0], (16, 1, 1, 51), jnp.float32),
        "bn1": _bn_init(ks[1], 16),
        "w2": 0.2 * jax.random.normal(ks[2], (32, 1, 2, 1), jnp.float32),
        "bn2": _bn_init(ks[3], 32),
        "w3": 0.1 * jax.random.normal(ks[4], (32, 32, 1, 15), jnp.float32),
        "bn3": _bn_init(ks[5], 32),
        "wl": 0.05 * jax.random.normal(ks[6], (2, 736), jnp.float32),
        "bl": 0.05 * jax.random.normal(ks[7], (2,), jnp.float32),
    }


def _bn_scale_shift(bnp, eps=1e-5):
    gamma, beta, mean, var = bnp
    s = gamma / jnp.sqrt(var + eps)
    return s, beta - mean * s


def eegnet_forward(x, params, activation_type="ELU"):
    assert x.shape == (B, 1, 2, T)
    f32 = jnp.float32

    # --- phase-decomposed, zero-padded input (~20 KB of layout plumbing; the
    #     51x im2col blow-up is now done in-kernel with aligned stores):
    #     xq[p*2 + e, b*WB + j] = xpad[b, e, 4*j + p]
    xe = jnp.pad(x[:, 0, :, :], ((0, 0), (0, 0), (25, 25)))            # (B, 2, 786)
    xe = jnp.pad(xe, ((0, 0), (0, 0), (0, NPH * 197 - (T + 50))))      # (B, 2, 788)
    xph = xe.reshape(B, 2, 197, NPH)                                   # [b, e, j, p]
    xph = jnp.transpose(xph, (3, 1, 0, 2))                             # [p, e, b, j]
    xph = jnp.pad(xph, ((0, 0), (0, 0), (0, 0), (0, WB - 197)))        # (4, 2, B, 256)
    xq = xph.reshape(2 * NPH, B * WB)
    xq = jnp.pad(xq, ((0, 0), (0, XQW - B * WB))).astype(f32)          # (8, 640)

    # --- fold conv1 + BN1 + depthwise + BN2 -> wf (32, 102), b2eff (32,)
    w1 = params["w1"].reshape(16, K1)
    s1, t1 = _bn_scale_shift(params["bn1"])
    w2s = params["w2"].reshape(32, 2)                                  # (out, electrode)
    s2, t2 = _bn_scale_shift(params["bn2"])
    grp = jnp.arange(32) // 2                                          # depthwise group
    base = s1[grp][:, None] * w1[grp]                                  # (32, 51)
    wf = jnp.concatenate([(s2 * w2s[:, 0])[:, None] * base,
                          (s2 * w2s[:, 1])[:, None] * base], axis=1)   # (32, 102)
    b2eff = s2 * (w2s[:, 0] + w2s[:, 1]) * t1[grp] + t2                # (32,)

    # --- phase-expanded stage-1 weights so pooling phases land on sublane blocks:
    #     wf4[d*32 + c, q*8 + p*2 + e] = wf[c, e*51 + (4q + p - d)]  (0 outside 0..50)
    wf2 = wf.reshape(32, 2, K1)                                        # [c, e, k]
    dd = jnp.arange(NPH)
    qq = jnp.arange(NQ)
    pp = jnp.arange(NPH)
    kidx = (4 * qq[None, :, None] + pp[None, None, :]) - dd[:, None, None]   # (4,14,4)
    valid = ((kidx >= 0) & (kidx < K1)).astype(f32)
    gath = wf2[:, :, jnp.clip(kidx, 0, K1 - 1)]                        # (32,2,4,14,4) [c,e,d,q,p]
    gath = gath * valid[None, None]
    wf4 = jnp.transpose(gath, (2, 0, 3, 4, 1)).reshape(NPH * 32, NQ * 8)   # (128, 112)

    # --- fold BN3 + the 1/4 AvgPool scale into the separable-conv weights
    s3, t3 = _bn_scale_shift(params["bn3"])
    w3 = params["w3"][:, :, 0, :]                                      # (O, C, K)
    w3cat = (0.25 * s3)[:, None] * jnp.transpose(w3, (0, 2, 1)).reshape(32, K3 * 32)

    # --- fold AvgPool(1,8) + view(-1,736) + Linear into per-column classifier
    #     weights, zero-padded to the aligned per-batch width WB, tiled over batch
    wl3 = params["wl"].reshape(2, 32, T3)
    wlp = jnp.repeat(wl3, 8, axis=2) / 8.0                             # (2, 32, 184)
    wlp = jnp.pad(wlp, ((0, 0), (0, 0), (0, WB - T2)))                 # (2, 32, 256)
    wlpt = jnp.tile(wlp, (1, 1, B)).reshape(2 * 32, NCOL).astype(f32)  # (64, 512)

    # bias[:, 0]   : stage-1 folded bias, row d*32+c gets b2eff[c]
    # bias[:32, 1] : stage-3 (separable + BN3) per-channel shift
    bias = jnp.zeros((NPH * 32, 2), f32)
    bias = bias.at[:, 0].set(jnp.tile(b2eff, NPH))
    bias = bias.at[0:32, 1].set(t3)
    bcls = params["bl"].reshape(2, 1).astype(f32)                      # per-class Linear bias

    kernel = functools.partial(eegnet_kernel, activation_type=activation_type)
    vmem = pl.BlockSpec(memory_space=pltpu.MemorySpace.VMEM)
    out_t = pl.pallas_call(
        kernel,
        out_shape=jax.ShapeDtypeStruct((2, B), jnp.float32),           # (class, batch)
        in_specs=[vmem] * 6,
        out_specs=vmem,
        scratch_shapes=[
            pltpu.VMEM((NQ * 8, NCOL), jnp.float32),     # stage-1 im2col slab (112, 512)
            pltpu.VMEM((32, PBW), jnp.bfloat16),         # zero-padded pooled buffer
            pltpu.VMEM((K3 * 32, NCOL), jnp.bfloat16),   # separable im2col slab (480, 512)
        ],
    )(xq, wf4.astype(jnp.bfloat16), w3cat.astype(jnp.bfloat16), wlpt, bias, bcls)
    return out_t.T                                                     # (B, 2)


# ------------------------- pure-JAX reference (check) -------------------------

def eegnet_reference(x, params, activation_type="ELU"):
    def bn(v, bnp):
        gamma, beta, mean, var = bnp
        inv = gamma / jnp.sqrt(var + 1e-5)
        return (v - mean[None, :, None, None]) * inv[None, :, None, None] \
            + beta[None, :, None, None]

    dn = ("NCHW", "OIHW", "NCHW")
    y = lax.conv_general_dilated(x, params["w1"], (1, 1), ((0, 0), (25, 25)),
                                 dimension_numbers=dn, precision=HIGH)
    y = bn(y, params["bn1"])
    y = lax.conv_general_dilated(y, params["w2"], (1, 1), ((0, 0), (0, 0)),
                                 dimension_numbers=dn, feature_group_count=16,
                                 precision=HIGH)
    y = bn(y, params["bn2"])
    y = _activation(y, activation_type)
    y = y.reshape(B, 32, 1, T // 4, 4).mean(axis=-1)
    y = lax.conv_general_dilated(y, params["w3"], (1, 1), ((0, 0), (7, 7)),
                                 dimension_numbers=dn, precision=HIGH)
    y = bn(y, params["bn3"])
    y = _elu(y)
    y = y.reshape(B, 32, 1, T2 // 8, 8).mean(axis=-1)
    y = y.reshape(B, 736)
    return jnp.dot(y, params["wl"].T, precision=HIGH) + params["bl"][None, :]


if __name__ == "__main__":
    key = jax.random.PRNGKey(0)
    kp, kx = jax.random.split(key)
    params = init_params(kp)
    x = jax.random.normal(kx, (B, 1, 2, T), jnp.float32)

    out = jax.jit(eegnet_forward)(x, params)
    out = jax.block_until_ready(out)

    ref = eegnet_reference(x, params)
    assert out.shape == (B, 2)
    assert bool(jnp.all(jnp.isfinite(out)))
    # bf16 matmul operands with f32 accumulation -> slightly looser tolerance
    assert bool(jnp.allclose(out, ref, rtol=2e-2, atol=2e-2)), (out, ref)
    print("KERNEL_OK")
</pallas_src>

<mosaic_0001>
module attributes {stable_mosaic.version = 11 : i64} {
  func.func @eegnet_kernel(%arg0: memref<8x640xf32, #tpu.memory_space<vmem>>, %arg1: memref<128x112xbf16, #tpu.memory_space<vmem>>, %arg2: memref<32x480xbf16, #tpu.memory_space<vmem>>, %arg3: memref<64x512xf32, #tpu.memory_space<vmem>>, %arg4: memref<128x2xf32, #tpu.memory_space<vmem>>, %arg5: memref<2x1xf32, #tpu.memory_space<vmem>>, %arg6: memref<2x2xf32, #tpu.memory_space<vmem>>, %arg7: memref<112x512xf32, #tpu.memory_space<vmem>>, %arg8: memref<32x640xbf16, #tpu.memory_space<vmem>>, %arg9: memref<480x512xbf16, #tpu.memory_space<vmem>>) attributes {dimension_semantics = [], scalar_prefetch = 0 : i64, scratch_operands = 3 : i64, tpu.core_type = #tpu.core_type<tc>} {
    %c0 = arith.constant 0 : index
    %c0_0 = arith.constant 0 : index
    %0 = vector.load %arg0[%c0, %c0_0] : memref<8x640xf32, #tpu.memory_space<vmem>>, vector<8x512xf32>
    %c0_1 = arith.constant 0 : index
    %c0_2 = arith.constant 0 : index
    %1 = vector.load %arg7[%c0_1, %c0_2] : memref<112x512xf32, #tpu.memory_space<vmem>>, vector<8x512xf32>
    tpu.vector_store %arg7[%c0_1, %c0_2], %0 {strides = array<i32>} : memref<112x512xf32, #tpu.memory_space<vmem>>, vector<8x512xf32>,
    %c0_3 = arith.constant 0 : index
    %c1 = arith.constant 1 : index
    %2 = vector.load %arg0[%c0_3, %c1] : memref<8x640xf32, #tpu.memory_space<vmem>>, vector<8x512xf32>
    %c8 = arith.constant 8 : index
    %c0_4 = arith.constant 0 : index
    %3 = vector.load %arg7[%c8, %c0_4] : memref<112x512xf32, #tpu.memory_space<vmem>>, vector<8x512xf32>
    tpu.vector_store %arg7[%c8, %c0_4], %2 {strides = array<i32>} : memref<112x512xf32, #tpu.memory_space<vmem>>, vector<8x512xf32>,
    %c0_5 = arith.constant 0 : index
    %c2 = arith.constant 2 : index
    %4 = vector.load %arg0[%c0_5, %c2] : memref<8x640xf32, #tpu.memory_space<vmem>>, vector<8x512xf32>
    %c16 = arith.constant 16 : index
    %c0_6 = arith.constant 0 : index
    %5 = vector.load %arg7[%c16, %c0_6] : memref<112x512xf32, #tpu.memory_space<vmem>>, vector<8x512xf32>
    tpu.vector_store %arg7[%c16, %c0_6], %4 {strides = array<i32>} : memref<112x512xf32, #tpu.memory_space<vmem>>, vector<8x512xf32>,
    %c0_7 = arith.constant 0 : index
    %c3 = arith.constant 3 : index
    %6 = vector.load %arg0[%c0_7, %c3] : memref<8x640xf32, #tpu.memory_space<vmem>>, vector<8x512xf32>
    %c24 = arith.constant 24 : index
    %c0_8 = arith.constant 0 : index
    %7 = vector.load %arg7[%c24, %c0_8] : memref<112x512xf32, #tpu.memory_space<vmem>>, vector<8x512xf32>
    tpu.vector_store %arg7[%c24, %c0_8], %6 {strides = array<i32>} : memref<112x512xf32, #tpu.memory_space<vmem>>, vector<8x512xf32>,
    %c0_9 = arith.constant 0 : index
    %c4 = arith.constant 4 : index
    %8 = vector.load %arg0[%c0_9, %c4] : memref<8x640xf32, #tpu.memory_space<vmem>>, vector<8x512xf32>
    %c32 = arith.constant 32 : index
    %c0_10 = arith.constant 0 : index
    %9 = vector.load %arg7[%c32, %c0_10] : memref<112x512xf32, #tpu.memory_space<vmem>>, vector<8x512xf32>
    tpu.vector_store %arg7[%c32, %c0_10], %8 {strides = array<i32>} : memref<112x512xf32, #tpu.memory_space<vmem>>, vector<8x512xf32>,
    %c0_11 = arith.constant 0 : index
    %c5 = arith.constant 5 : index
    %10 = vector.load %arg0[%c0_11, %c5] : memref<8x640xf32, #tpu.memory_space<vmem>>, vector<8x512xf32>
    %c40 = arith.constant 40 : index
    %c0_12 = arith.constant 0 : index
    %11 = vector.load %arg7[%c40, %c0_12] : memref<112x512xf32, #tpu.memory_space<vmem>>, vector<8x512xf32>
    tpu.vector_store %arg7[%c40, %c0_12], %10 {strides = array<i32>} : memref<112x512xf32, #tpu.memory_space<vmem>>, vector<8x512xf32>,
    %c0_13 = arith.constant 0 : index
    %c6 = arith.constant 6 : index
    %12 = vector.load %arg0[%c0_13, %c6] : memref<8x640xf32, #tpu.memory_space<vmem>>, vector<8x512xf32>
    %c48 = arith.constant 48 : index
    %c0_14 = arith.constant 0 : index
    %13 = vector.load %arg7[%c48, %c0_14] : memref<112x512xf32, #tpu.memory_space<vmem>>, vector<8x512xf32>
    tpu.vector_store %arg7[%c48, %c0_14], %12 {strides = array<i32>} : memref<112x512xf32, #tpu.memory_space<vmem>>, vector<8x512xf32>,
    %c0_15 = arith.constant 0 : index
    %c7 = arith.constant 7 : index
    %14 = vector.load %arg0[%c0_15, %c7] : memref<8x640xf32, #tpu.memory_space<vmem>>, vector<8x512xf32>
    %c56 = arith.constant 56 : index
    %c0_16 = arith.constant 0 : index
    %15 = vector.load %arg7[%c56, %c0_16] : memref<112x512xf32, #tpu.memory_space<vmem>>, vector<8x512xf32>
    tpu.vector_store %arg7[%c56, %c0_16], %14 {strides = array<i32>} : memref<112x512xf32, #tpu.memory_space<vmem>>, vector<8x512xf32>,
    %c0_17 = arith.constant 0 : index
    %c8_18 = arith.constant 8 : index
    %16 = vector.load %arg0[%c0_17, %c8_18] : memref<8x640xf32, #tpu.memory_space<vmem>>, vector<8x512xf32>
    %c64 = arith.constant 64 : index
    %c0_19 = arith.constant 0 : index
    %17 = vector.load %arg7[%c64, %c0_19] : memref<112x512xf32, #tpu.memory_space<vmem>>, vector<8x512xf32>
    tpu.vector_store %arg7[%c64, %c0_19], %16 {strides = array<i32>} : memref<112x512xf32, #tpu.memory_space<vmem>>, vector<8x512xf32>,
    %c0_20 = arith.constant 0 : index
    %c9 = arith.constant 9 : index
    %18 = vector.load %arg0[%c0_20, %c9] : memref<8x640xf32, #tpu.memory_space<vmem>>, vector<8x512xf32>
    %c72 = arith.constant 72 : index
    %c0_21 = arith.constant 0 : index
    %19 = vector.load %arg7[%c72, %c0_21] : memref<112x512xf32, #tpu.memory_space<vmem>>, vector<8x512xf32>
    tpu.vector_store %arg7[%c72, %c0_21], %18 {strides = array<i32>} : memref<112x512xf32, #tpu.memory_space<vmem>>, vector<8x512xf32>,
    %c0_22 = arith.constant 0 : index
    %c10 = arith.constant 10 : index
    %20 = vector.load %arg0[%c0_22, %c10] : memref<8x640xf32, #tpu.memory_space<vmem>>, vector<8x512xf32>
    %c80 = arith.constant 80 : index
    %c0_23 = arith.constant 0 : index
    %21 = vector.load %arg7[%c80, %c0_23] : memref<112x512xf32, #tpu.memory_space<vmem>>, vector<8x512xf32>
    tpu.vector_store %arg7[%c80, %c0_23], %20 {strides = array<i32>} : memref<112x512xf32, #tpu.memory_space<vmem>>, vector<8x512xf32>,
    %c0_24 = arith.constant 0 : index
    %c11 = arith.constant 11 : index
    %22 = vector.load %arg0[%c0_24, %c11] : memref<8x640xf32, #tpu.memory_space<vmem>>, vector<8x512xf32>
    %c88 = arith.constant 88 : index
    %c0_25 = arith.constant 0 : index
    %23 = vector.load %arg7[%c88, %c0_25] : memref<112x512xf32, #tpu.memory_space<vmem>>, vector<8x512xf32>
    tpu.vector_store %arg7[%c88, %c0_25], %22 {strides = array<i32>} : memref<112x512xf32, #tpu.memory_space<vmem>>, vector<8x512xf32>,
    %c0_26 = arith.constant 0 : index
    %c12 = arith.constant 12 : index
    %24 = vector.load %arg0[%c0_26, %c12] : memref<8x640xf32, #tpu.memory_space<vmem>>, vector<8x512xf32>
    %c96 = arith.constant 96 : index
    %c0_27 = arith.constant 0 : index
    %25 = vector.load %arg7[%c96, %c0_27] : memref<112x512xf32, #tpu.memory_space<vmem>>, vector<8x512xf32>
    tpu.vector_store %arg7[%c96, %c0_27], %24 {strides = array<i32>} : memref<112x512xf32, #tpu.memory_space<vmem>>, vector<8x512xf32>,
    %c0_28 = arith.constant 0 : index
    %c13 = arith.constant 13 : index
    %26 = vector.load %arg0[%c0_28, %c13] : memref<8x640xf32, #tpu.memory_space<vmem>>, vector<8x512xf32>
    %c104 = arith.constant 104 : index
    %c0_29 = arith.constant 0 : index
    %27 = vector.load %arg7[%c104, %c0_29] : memref<112x512xf32, #tpu.memory_space<vmem>>, vector<8x512xf32>
    tpu.vector_store %arg7[%c104, %c0_29], %26 {strides = array<i32>} : memref<112x512xf32, #tpu.memory_space<vmem>>, vector<8x512xf32>,
    %c0_30 = arith.constant 0 : index
    %c0_31 = arith.constant 0 : index
    %28 = vector.load %arg1[%c0_30, %c0_31] : memref<128x112xbf16, #tpu.memory_space<vmem>>, vector<128x112xbf16>
    %c0_32 = arith.constant 0 : index
    %c0_33 = arith.constant 0 : index
    %29 = vector.load %arg7[%c0_32, %c0_33] : memref<112x512xf32, #tpu.memory_space<vmem>>, vector<112x512xf32>
    %30 = arith.truncf %29 : vector<112x512xf32> to vector<112x512xbf16>
    %cst = arith.constant dense<0.000000e+00> : vector<128x512xf32>
    %31 = tpu.matmul %28, %30, %cst {dimension_numbers = #tpu.dot_dimension_numbers<[1], [0], [0], [1], [0, 0, 1, 1], [], []>} : vector<128x112xbf16>, vector<112x512xbf16>, vector<128x512xf32> -> vector<128x512xf32>
    %c0_34 = arith.constant 0 : index
    %c0_35 = arith.constant 0 : index
    %32 = vector.load %arg4[%c0_34, %c0_35] : memref<128x2xf32, #tpu.memory_space<vmem>>, vector<128x1xf32>
    %33 = vector.broadcast %32 : vector<128x1xf32> to vector<128x512xf32>
    %34 = arith.addf %31, %33 : vector<128x512xf32>
    %cst_36 = arith.constant 0.000000e+00 : f32
    %35 = vector.broadcast %cst_36 : f32 to vector<128x512xf32>
    %36 = arith.cmpf ogt, %34, %35 : vector<128x512xf32>
    %cst_37 = arith.constant 0.000000e+00 : f32
    %37 = vector.broadcast %cst_37 : f32 to vector<128x512xf32>
    %38 = arith.minimumf %34, %37 : vector<128x512xf32>
    %39 = math.exp %38 : vector<128x512xf32>
    %cst_38 = arith.constant 1.000000e+00 : f32
    %40 = vector.broadcast %cst_38 : f32 to vector<128x512xf32>
    %41 = arith.subf %39, %40 : vector<128x512xf32>
    %42 = arith.select %36, %34, %41 : vector<128x512xi1>, vector<128x512xf32>
    %43 = vector.extract_strided_slice %42 {offsets = [0, 0], sizes = [32, 512], strides = [1, 1]} : vector<128x512xf32> to vector<32x512xf32>
    %44 = vector.extract_strided_slice %42 {offsets = [32, 0], sizes = [32, 512], strides = [1, 1]} : vector<128x512xf32> to vector<32x512xf32>
    %45 = arith.addf %43, %44 : vector<32x512xf32>
    %46 = vector.extract_strided_slice %42 {offsets = [64, 0], sizes = [32, 512], strides = [1, 1]} : vector<128x512xf32> to vector<32x512xf32>
    %47 = arith.addf %45, %46 : vector<32x512xf32>
    %48 = vector.extract_strided_slice %42 {offsets = [96, 0], sizes = [32, 512], strides = [1, 1]} : vector<128x512xf32> to vector<32x512xf32>
    %49 = arith.addf %47, %48 : vector<32x512xf32>
    %cst_39 = arith.constant 0.000000e+00 : bf16
    %50 = vector.broadcast %cst_39 : bf16 to vector<32x640xbf16>
    %c0_40 = arith.constant 0 : index
    %c0_41 = arith.constant 0 : index
    %51 = vector.load %arg8[%c0_40, %c0_41] : memref<32x640xbf16, #tpu.memory_space<vmem>>, vector<32x640xbf16>
    tpu.vector_store %arg8[%c0_40, %c0_41], %50 {strides = array<i32>} : memref<32x640xbf16, #tpu.memory_space<vmem>>, vector<32x640xbf16>,
    %52 = vector.extract_strided_slice %49 {offsets = [0, 0], sizes = [32, 184], strides = [1, 1]} : vector<32x512xf32> to vector<32x184xf32>
    %53 = arith.truncf %52 : vector<32x184xf32> to vector<32x184xbf16>
    %c0_42 = arith.constant 0 : index
    %c7_43 = arith.constant 7 : index
    %54 = vector.load %arg8[%c0_42, %c7_43] : memref<32x640xbf16, #tpu.memory_space<vmem>>, vector<32x184xbf16>
    tpu.vector_store %arg8[%c0_42, %c7_43], %53 {strides = array<i32>} : memref<32x640xbf16, #tpu.memory_space<vmem>>, vector<32x184xbf16>,
    %55 = vector.extract_strided_slice %49 {offsets = [0, 256], sizes = [32, 184], strides = [1, 1]} : vector<32x512xf32> to vector<32x184xf32>
    %56 = arith.truncf %55 : vector<32x184xf32> to vector<32x184xbf16>
    %c0_44 = arith.constant 0 : index
    %c263 = arith.constant 263 : index
    %57 = vector.load %arg8[%c0_44, %c263] : memref<32x640xbf16, #tpu.memory_space<vmem>>, vector<32x184xbf16>
    tpu.vector_store %arg8[%c0_44, %c263], %56 {strides = array<i32>} : memref<32x640xbf16, #tpu.memory_space<vmem>>, vector<32x184xbf16>,
    %c0_45 = arith.constant 0 : index
    %c0_46 = arith.constant 0 : index
    %58 = vector.load %arg8[%c0_45, %c0_46] : memref<32x640xbf16, #tpu.memory_space<vmem>>, vector<32x512xbf16>
    %c0_47 = arith.constant 0 : index
    %c0_48 = arith.constant 0 : index
    %59 = vector.load %arg9[%c0_47, %c0_48] : memref<480x512xbf16, #tpu.memory_space<vmem>>, vector<32x512xbf16>
    tpu.vector_store %arg9[%c0_47, %c0_48], %58 {strides = array<i32>} : memref<480x512xbf16, #tpu.memory_space<vmem>>, vector<32x512xbf16>,
    %c0_49 = arith.constant 0 : index
    %c1_50 = arith.constant 1 : index
    %60 = vector.load %arg8[%c0_49, %c1_50] : memref<32x640xbf16, #tpu.memory_space<vmem>>, vector<32x512xbf16>
    %c32_51 = arith.constant 32 : index
    %c0_52 = arith.constant 0 : index
    %61 = vector.load %arg9[%c32_51, %c0_52] : memref<480x512xbf16, #tpu.memory_space<vmem>>, vector<32x512xbf16>
    tpu.vector_store %arg9[%c32_51, %c0_52], %60 {strides = array<i32>} : memref<480x512xbf16, #tpu.memory_space<vmem>>, vector<32x512xbf16>,
    %c0_53 = arith.constant 0 : index
    %c2_54 = arith.constant 2 : index
    %62 = vector.load %arg8[%c0_53, %c2_54] : memref<32x640xbf16, #tpu.memory_space<vmem>>, vector<32x512xbf16>
    %c64_55 = arith.constant 64 : index
    %c0_56 = arith.constant 0 : index
    %63 = vector.load %arg9[%c64_55, %c0_56] : memref<480x512xbf16, #tpu.memory_space<vmem>>, vector<32x512xbf16>
    tpu.vector_store %arg9[%c64_55, %c0_56], %62 {strides = array<i32>} : memref<480x512xbf16, #tpu.memory_space<vmem>>, vector<32x512xbf16>,
    %c0_57 = arith.constant 0 : index
    %c3_58 = arith.constant 3 : index
    %64 = vector.load %arg8[%c0_57, %c3_58] : memref<32x640xbf16, #tpu.memory_space<vmem>>, vector<32x512xbf16>
    %c96_59 = arith.constant 96 : index
    %c0_60 = arith.constant 0 : index
    %65 = vector.load %arg9[%c96_59, %c0_60] : memref<480x512xbf16, #tpu.memory_space<vmem>>, vector<32x512xbf16>
    tpu.vector_store %arg9[%c96_59, %c0_60], %64 {strides = array<i32>} : memref<480x512xbf16, #tpu.memory_space<vmem>>, vector<32x512xbf16>,
    %c0_61 = arith.constant 0 : index
    %c4_62 = arith.constant 4 : index
    %66 = vector.load %arg8[%c0_61, %c4_62] : memref<32x640xbf16, #tpu.memory_space<vmem>>, vector<32x512xbf16>
    %c128 = arith.constant 128 : index
    %c0_63 = arith.constant 0 : index
    %67 = vector.load %arg9[%c128, %c0_63] : memref<480x512xbf16, #tpu.memory_space<vmem>>, vector<32x512xbf16>
    tpu.vector_store %arg9[%c128, %c0_63], %66 {strides = array<i32>} : memref<480x512xbf16, #tpu.memory_space<vmem>>, vector<32x512xbf16>,
    %c0_64 = arith.constant 0 : index
    %c5_65 = arith.constant 5 : index
    %68 = vector.load %arg8[%c0_64, %c5_65] : memref<32x640xbf16, #tpu.memory_space<vmem>>, vector<32x512xbf16>
    %c160 = arith.constant 160 : index
    %c0_66 = arith.constant 0 : index
    %69 = vector.load %arg9[%c160, %c0_66] : memref<480x512xbf16, #tpu.memory_space<vmem>>, vector<32x512xbf16>
    tpu.vector_store %arg9[%c160, %c0_66], %68 {strides = array<i32>} : memref<480x512xbf16, #tpu.memory_space<vmem>>, vector<32x512xbf16>,
    %c0_67 = arith.constant 0 : index
    %c6_68 = arith.constant 6 : index
    %70 = vector.load %arg8[%c0_67, %c6_68] : memref<32x640xbf16, #tpu.memory_space<vmem>>, vector<32x512xbf16>
    %c192 = arith.constant 192 : index
    %c0_69 = arith.constant 0 : index
    %71 = vector.load %arg9[%c192, %c0_69] : memref<480x512xbf16, #tpu.memory_space<vmem>>, vector<32x512xbf16>
    tpu.vector_store %arg9[%c192, %c0_69], %70 {strides = array<i32>} : memref<480x512xbf16, #tpu.memory_space<vmem>>, vector<32x512xbf16>,
    %c0_70 = arith.constant 0 : index
    %c7_71 = arith.constant 7 : index
    %72 = vector.load %arg8[%c0_70, %c7_71] : memref<32x640xbf16, #tpu.memory_space<vmem>>, vector<32x512xbf16>
    %c224 = arith.constant 224 : index
    %c0_72 = arith.constant 0 : index
    %73 = vector.load %arg9[%c224, %c0_72] : memref<480x512xbf16, #tpu.memory_space<vmem>>, vector<32x512xbf16>
    tpu.vector_store %arg9[%c224, %c0_72], %72 {strides = array<i32>} : memref<480x512xbf16, #tpu.memory_space<vmem>>, vector<32x512xbf16>,
    %c0_73 = arith.constant 0 : index
    %c8_74 = arith.constant 8 : index
    %74 = vector.load %arg8[%c0_73, %c8_74] : memref<32x640xbf16, #tpu.memory_space<vmem>>, vector<32x512xbf16>
    %c256 = arith.constant 256 : index
    %c0_75 = arith.constant 0 : index
    %75 = vector.load %arg9[%c256, %c0_75] : memref<480x512xbf16, #tpu.memory_space<vmem>>, vector<32x512xbf16>
    tpu.vector_store %arg9[%c256, %c0_75], %74 {strides = array<i32>} : memref<480x512xbf16, #tpu.memory_space<vmem>>, vector<32x512xbf16>,
    %c0_76 = arith.constant 0 : index
    %c9_77 = arith.constant 9 : index
    %76 = vector.load %arg8[%c0_76, %c9_77] : memref<32x640xbf16, #tpu.memory_space<vmem>>, vector<32x512xbf16>
    %c288 = arith.constant 288 : index
    %c0_78 = arith.constant 0 : index
    %77 = vector.load %arg9[%c288, %c0_78] : memref<480x512xbf16, #tpu.memory_space<vmem>>, vector<32x512xbf16>
    tpu.vector_store %arg9[%c288, %c0_78], %76 {strides = array<i32>} : memref<480x512xbf16, #tpu.memory_space<vmem>>, vector<32x512xbf16>,
    %c0_79 = arith.constant 0 : index
    %c10_80 = arith.constant 10 : index
    %78 = vector.load %arg8[%c0_79, %c10_80] : memref<32x640xbf16, #tpu.memory_space<vmem>>, vector<32x512xbf16>
    %c320 = arith.constant 320 : index
    %c0_81 = arith.constant 0 : index
    %79 = vector.load %arg9[%c320, %c0_81] : memref<480x512xbf16, #tpu.memory_space<vmem>>, vector<32x512xbf16>
    tpu.vector_store %arg9[%c320, %c0_81], %78 {strides = array<i32>} : memref<480x512xbf16, #tpu.memory_space<vmem>>, vector<32x512xbf16>,
    %c0_82 = arith.constant 0 : index
    %c11_83 = arith.constant 11 : index
    %80 = vector.load %arg8[%c0_82, %c11_83] : memref<32x640xbf16, #tpu.memory_space<vmem>>, vector<32x512xbf16>
    %c352 = arith.constant 352 : index
    %c0_84 = arith.constant 0 : index
    %81 = vector.load %arg9[%c352, %c0_84] : memref<480x512xbf16, #tpu.memory_space<vmem>>, vector<32x512xbf16>
    tpu.vector_store %arg9[%c352, %c0_84], %80 {strides = array<i32>} : memref<480x512xbf16, #tpu.memory_space<vmem>>, vector<32x512xbf16>,
    %c0_85 = arith.constant 0 : index
    %c12_86 = arith.constant 12 : index
    %82 = vector.load %arg8[%c0_85, %c12_86] : memref<32x640xbf16, #tpu.memory_space<vmem>>, vector<32x512xbf16>
    %c384 = arith.constant 384 : index
    %c0_87 = arith.constant 0 : index
    %83 = vector.load %arg9[%c384, %c0_87] : memref<480x512xbf16, #tpu.memory_space<vmem>>, vector<32x512xbf16>
    tpu.vector_store %arg9[%c384, %c0_87], %82 {strides = array<i32>} : memref<480x512xbf16, #tpu.memory_space<vmem>>, vector<32x512xbf16>,
    %c0_88 = arith.constant 0 : index
    %c13_89 = arith.constant 13 : index
    %84 = vector.load %arg8[%c0_88, %c13_89] : memref<32x640xbf16, #tpu.memory_space<vmem>>, vector<32x512xbf16>
    %c416 = arith.constant 416 : index
    %c0_90 = arith.constant 0 : index
    %85 = vector.load %arg9[%c416, %c0_90] : memref<480x512xbf16, #tpu.memory_space<vmem>>, vector<32x512xbf16>
    tpu.vector_store %arg9[%c416, %c0_90], %84 {strides = array<i32>} : memref<480x512xbf16, #tpu.memory_space<vmem>>, vector<32x512xbf16>,
    %c0_91 = arith.constant 0 : index
    %c14 = arith.constant 14 : index
    %86 = vector.load %arg8[%c0_91, %c14] : memref<32x640xbf16, #tpu.memory_space<vmem>>, vector<32x512xbf16>
    %c448 = arith.constant 448 : index
    %c0_92 = arith.constant 0 : index
    %87 = vector.load %arg9[%c448, %c0_92] : memref<480x512xbf16, #tpu.memory_space<vmem>>, vector<32x512xbf16>
    tpu.vector_store %arg9[%c448, %c0_92], %86 {strides = array<i32>} : memref<480x512xbf16, #tpu.memory_space<vmem>>, vector<32x512xbf16>,
    %c0_93 = arith.constant 0 : index
    %c0_94 = arith.constant 0 : index
    %88 = vector.load %arg2[%c0_93, %c0_94] : memref<32x480xbf16, #tpu.memory_space<vmem>>, vector<32x480xbf16>
    %c0_95 = arith.constant 0 : index
    %c0_96 = arith.constant 0 : index
    %89 = vector.load %arg9[%c0_95, %c0_96] : memref<480x512xbf16, #tpu.memory_space<vmem>>, vector<480x512xbf16>
    %cst_97 = arith.constant dense<0.000000e+00> : vector<32x512xf32>
    %90 = tpu.matmul %88, %89, %cst_97 {dimension_numbers = #tpu.dot_dimension_numbers<[1], [0], [0], [1], [0, 0, 1, 1], [], []>} : vector<32x480xbf16>, vector<480x512xbf16>, vector<32x512xf32> -> vector<32x512xf32>
    %c0_98 = arith.constant 0 : index
    %c1_99 = arith.constant 1 : index
    %91 = vector.load %arg4[%c0_98, %c1_99] : memref<128x2xf32, #tpu.memory_space<vmem>>, vector<32x1xf32>
    %92 = vector.broadcast %91 : vector<32x1xf32> to vector<32x512xf32>
    %93 = arith.addf %90, %92 : vector<32x512xf32>
    %cst_100 = arith.constant 0.000000e+00 : f32
    %94 = vector.broadcast %cst_100 : f32 to vector<32x512xf32>
    %95 = arith.cmpf ogt, %93, %94 : vector<32x512xf32>
    %cst_101 = arith.constant 0.000000e+00 : f32
    %96 = vector.broadcast %cst_101 : f32 to vector<32x512xf32>
    %97 = arith.minimumf %93, %96 : vector<32x512xf32>
    %98 = math.exp %97 : vector<32x512xf32>
    %cst_102 = arith.constant 1.000000e+00 : f32
    %99 = vector.broadcast %cst_102 : f32 to vector<32x512xf32>
    %100 = arith.subf %98, %99 : vector<32x512xf32>
    %101 = arith.select %95, %93, %100 : vector<32x512xi1>, vector<32x512xf32>
    %c0_103 = arith.constant 0 : index
    %c0_104 = arith.constant 0 : index
    %102 = vector.load %arg3[%c0_103, %c0_104] : memref<64x512xf32, #tpu.memory_space<vmem>>, vector<32x512xf32>
    %103 = arith.mulf %102, %101 : vector<32x512xf32>
    %cst_105 = arith.constant dense<0.000000e+00> : vector<512xf32>
    %104 = vector.multi_reduction <add>, %103, %cst_105 [0] : vector<32x512xf32> to vector<512xf32>
    %105 = vector.shape_cast %104 : vector<512xf32> to vector<1x512xf32>
    %c32_106 = arith.constant 32 : index
    %c0_107 = arith.constant 0 : index
    %106 = vector.load %arg3[%c32_106, %c0_107] : memref<64x512xf32, #tpu.memory_space<vmem>>, vector<32x512xf32>
    %107 = arith.mulf %106, %101 : vector<32x512xf32>
    %cst_108 = arith.constant dense<0.000000e+00> : vector<512xf32>
    %108 = vector.multi_reduction <add>, %107, %cst_108 [0] : vector<32x512xf32> to vector<512xf32>
    %109 = vector.shape_cast %108 : vector<512xf32> to vector<1x512xf32>
    %110 = tpu.concatenate %105, %109 in 0 : vector<1x512xf32>, vector<1x512xf32> -> vector<2x512xf32>
    %111 = vector.extract_strided_slice %110 {offsets = [0, 0], sizes = [2, 256], strides = [1, 1]} : vector<2x512xf32> to vector<2x256xf32>
    %cst_109 = arith.constant dense<0.000000e+00> : vector<2xf32>
    %112 = vector.multi_reduction <add>, %111, %cst_109 [1] : vector<2x256xf32> to vector<2xf32>
    %113 = vector.shape_cast %112 : vector<2xf32> to vector<2x1xf32>
    %114 = vector.extract_strided_slice %110 {offsets = [0, 256], sizes = [2, 256], strides = [1, 1]} : vector<2x512xf32> to vector<2x256xf32>
    %cst_110 = arith.constant dense<0.000000e+00> : vector<2xf32>
    %115 = vector.multi_reduction <add>, %114, %cst_110 [1] : vector<2x256xf32> to vector<2xf32>
    %116 = vector.shape_cast %115 : vector<2xf32> to vector<2x1xf32>
    %117 = tpu.concatenate %113, %116 in 1 : vector<2x1xf32>, vector<2x1xf32> -> vector<2x2xf32>
    %c0_111 = arith.constant 0 : index
    %c0_112 = arith.constant 0 : index
    %118 = vector.load %arg5[%c0_111, %c0_112] : memref<2x1xf32, #tpu.memory_space<vmem>>, vector<2x1xf32>
    %119 = vector.broadcast %118 : vector<2x1xf32> to vector<2x2xf32>
    %120 = arith.addf %117, %119 : vector<2x2xf32>
    %c0_113 = arith.constant 0 : index
    %c0_114 = arith.constant 0 : index
    %121 = vector.load %arg6[%c0_113, %c0_114] : memref<2x2xf32, #tpu.memory_space<vmem>>, vector<2x2xf32>
    tpu.vector_store %arg6[%c0_113, %c0_114], %120 {strides = array<i32>} : memref<2x2xf32, #tpu.memory_space<vmem>>, vector<2x2xf32>,
    return
  }
}

</mosaic_0001>

<bundles_post_ra>
// kernel: tile.18
= control target key start
LH: loop header
LB: loop body
LE: loop exit
PB: predicated region body
PF: predicated region fallthrough
CT: control target
= control target key end

     0   :  { %s22_s0 = inlined_call_operand.vmem [shape: f32[32], index: 0, kind: input, shape index: {}]   ;;  %s23_s1 = inlined_call_operand.vmem [shape: f32[4,32], index: 1, kind: output, shape index: {}]  }
   0x1   :  { %v4_v0 = vld [vmem:[%s22_s0] ss:$0 sm:$0xff] }
   0x2   :  { %5 = vst [vmem:[%s23_s1] sm:$0xf] %v4_v0 }

// kernel: eegnet_forward.1
= control target key start
LH: loop header
LB: loop body
LE: loop exit
PB: predicated region body
PF: predicated region fallthrough
CT: control target
= control target key end

     0   :  { %s3589_s27 = smov 127   ;;  %s3590_s8 = smov 126   ;;  %v5652_v7 = vmov 0   ;;  %vm52_vm0 = vcmask 1039360   ;;  %vm85_vm1 = vcmask 1031168   ;;  %vm118_vm2 = vcmask 1022976   ;;  %s5638_s0 = inlined_call_operand.vmem [shape: f32[8,640], index: 0, kind: input, shape index: {}]   ;;  %s5639_s1 = inlined_call_operand.vmem [shape: bf16[128,112], index: 1, kind: input, shape index: {}]   ;;  %s5640_s4 = inlined_call_operand.vmem [shape: f32[128,2], index: 4, kind: input, shape index: {}]   ;;  %s5641_s2 = inlined_call_operand.vmem [shape: bf16[32,480], index: 2, kind: input, shape index: {}]   ;;  %s5642_s3 = inlined_call_operand.vmem [shape: f32[64,512], index: 3, kind: input, shape index: {}]   ;;  %s5643_s5 = inlined_call_operand.vmem [shape: f32[2,1], index: 5, kind: input, shape index: {}]   ;;  %s5644_s6 = inlined_call_operand.vmem [shape: f32[2,2], index: 6, kind: output, shape index: {}]  }
   0x1   :  { %v3644_v0 = vld [vmem:[%s5638_s0] sm:$0xff]  ;;  %v3649_v1 = vld [vmem:[%s5638_s0 + $0x8] sm:$0xff]  ;;  %v3654_v2 = vld [vmem:[%s5638_s0 + $0x10] sm:$0xff]  ;;  %s3591_s9 = smov 125   ;;  %s3593_s10 = smov 123   ;;  %867 = vmatprep.mubr.bf16.mxu1 %v5652_v7  ;;  %1380 = vst [vmem:[#allocation3] sm:$0xff] %v5652_v7  ;;  %754 = vmatprep.mubr.bf16.mxu0 %v5652_v7 }
   0x2   :  { %42 = vrot.lane.b32.xlu1 %v3644_v0, %s3589_s27  ;;  %v3208_v3 = vpack.i.bf16 %v3654_v2, %v3649_v1  ;;  %v3663_v4 = vld [vmem:[%s5638_s0 + $0x18] sm:$0xff]  ;;  %v36_v5 = vld [vmem:[%s5638_s0 + $0x20] sm:$0xff]  ;;  %s3592_s0 = smov 124   ;;  %s3594_s11 = smov 122   ;;  %1381 = vst [vmem:[#allocation3 + $0x8] sm:$0xff] %v5652_v7  ;;  %1382 = vst [vmem:[#allocation3 + $0x10] sm:$0xff] %v5652_v7  ;;  %3339 = vset.pattern.permute.xlu0 %v5652_v7 }
   0x3   :  { %v3213_v6 = vpack.i.bf16 %v36_v5, %v3663_v4  ;;  %s3595_s12 = smov 121   ;;  %s3596_s13 = smov 120   ;;  %1383 = vst [vmem:[#allocation3 + $0x18] sm:$0xff] %v5652_v7  ;;  %1384 = vst [vmem:[#allocation3 + $0x20] sm:$0xff] %v5652_v7  ;;  %3338 = vset.pattern.permute.xlu1 %v5652_v7  ;;  %v561_v37 = vld [vmem:[%s5640_s4] sm:$0xff]  ;;  %v562_v38 = vld [vmem:[%s5640_s4 + $0x8] sm:$0xff] }
   0x4   :  { %3209 = vrot.lane.b32.xlu0 %v3208_v3, %s3589_s27  ;;  %s3597_s14 = smov 119   ;;  %s3598_s15 = smov 118   ;;  %1385 = vst [vmem:[#allocation3 + $0x28] sm:$0xff] %v5652_v7  ;;  %1386 = vst [vmem:[#allocation3 + $0x30] sm:$0xff] %v5652_v7  ;;  %v565_v44 = vld [vmem:[%s5640_s4 + $0x20] sm:$0xff]  ;;  %vm151_vm3 = vcmask 1014784  }
   0x5   :  { %s3599_s16 = smov 117   ;;  %s3600_s17 = smov 116   ;;  %1387 = vst [vmem:[#allocation3 + $0x38] sm:$0xff] %v5652_v7  ;;  %1388 = vst [vmem:[#allocation3 + $0x40] sm:$0xff] %v5652_v7  ;;  %v569_v45 = vld [vmem:[%s5640_s4 + $0x40] sm:$0xff]  ;;  %vm184_vm4 = vcmask 1006592  }
   0x6   :  { %3219 = vrot.lane.b32.xlu1 %v3208_v3, %s3590_s8  ;;  %s3601_s18 = smov 115   ;;  %v566_v57 = vld [vmem:[%s5640_s4 + $0x28] sm:$0xff]  ;;  %v563_v58 = vld [vmem:[%s5640_s4 + $0x10] sm:$0xff]  ;;  %vm5651_vm5 = vcmask 998400   ;;  %vm5650_vm6 = vcmask 990208   ;;  %vm5649_vm7 = vcmask 982016  }
   0x7   :  { %v567_v5 = vld [vmem:[%s5640_s4 + $0x30] sm:$0xff]  ;;  %vm5648_vm8 = vcmask 973824   ;;  %vm5647_vm9 = vcmask 965632   ;;  %vm382_vm10 = vcmask 957440   ;;  %vm5646_vm11 = vcmask 949248  }
   0x8   :  { %3214 = vrot.lane.b32.xlu0 %v3213_v6, %s3589_s27  ;;  %vm5645_vm12 = vcmask 941056   ;;  %vm697_vm13 = vcmask 916480  }
   0xa   :  { %3229 = vrot.lane.b32.xlu1 %v3208_v3, %s3591_s9 }
   0xc   :  { %3224 = vrot.lane.b32.xlu0 %v3213_v6, %s3590_s8 }
   0xe   :  { %75 = vrot.lane.b32.xlu1 %v3644_v0, %s3590_s8 }
  0x10   :  { %3234 = vrot.lane.b32.xlu0 %v3213_v6, %s3591_s9 }
  0x12   :  { %3239 = vrot.lane.b32.xlu1 %v3208_v3, %s3592_s0 }
  0x14   :  { %108 = vrot.lane.b32.xlu0 %v3644_v0, %s3591_s9 }
  0x16   :  { %3249 = vrot.lane.b32.xlu1 %v3208_v3, %s3593_s10 }
  0x18   :  { %3244 = vrot.lane.b32.xlu0 %v3213_v6, %s3592_s0 }
  0x1a   :  { %141 = vrot.lane.b32.xlu1 %v3644_v0, %s3592_s0 }
  0x1c   :  { %3254 = vrot.lane.b32.xlu0 %v3213_v6, %s3593_s10 }
  0x1e   :  { %3259 = vrot.lane.b32.xlu1 %v3208_v3, %s3594_s11 }
  0x20   :  { %174 = vrot.lane.b32.xlu0 %v3644_v0, %s3593_s10 }
  0x22   :  { %3269 = vrot.lane.b32.xlu1 %v3208_v3, %s3595_s12 }
  0x24   :  { %3264 = vrot.lane.b32.xlu0 %v3213_v6, %s3594_s11 }
  0x26   :  { %207 = vrot.lane.b32.xlu1 %v3644_v0, %s3594_s11 }
  0x28   :  { %3274 = vrot.lane.b32.xlu0 %v3213_v6, %s3595_s12 }
  0x2a   :  { %3279 = vrot.lane.b32.xlu1 %v3208_v3, %s3596_s13 }
  0x2c   :  { %240 = vrot.lane.b32.xlu0 %v3644_v0, %s3595_s12 }
  0x2e   :  { %3289 = vrot.lane.b32.xlu1 %v3208_v3, %s3597_s14 }
  0x30   :  { %3284 = vrot.lane.b32.xlu0 %v3213_v6, %s3596_s13 }
  0x32   :  { %273 = vrot.lane.b32.xlu1 %v3644_v0, %s3596_s13 }
  0x34   :  { %3294 = vrot.lane.b32.xlu0 %v3213_v6, %s3597_s14 }
  0x36   :  { %3299 = vrot.lane.b32.xlu1 %v3208_v3, %s3598_s15 }
  0x38   :  { %306 = vrot.lane.b32.xlu0 %v3644_v0, %s3597_s14 }
  0x3a   :  { %3309 = vrot.lane.b32.xlu1 %v3208_v3, %s3599_s16 }
  0x3c   :  { %3304 = vrot.lane.b32.xlu0 %v3213_v6, %s3598_s15 }
  0x3e   :  { %339 = vrot.lane.b32.xlu1 %v3644_v0, %s3598_s15 }
  0x40   :  { %3314 = vrot.lane.b32.xlu0 %v3213_v6, %s3599_s16 }
  0x42   :  { %3319 = vrot.lane.b32.xlu1 %v3208_v3, %s3600_s17 }
  0x44   :  { %372 = vrot.lane.b32.xlu0 %v3644_v0, %s3599_s16 }
  0x46   :  { %3329 = vrot.lane.b32.xlu1 %v3208_v3, %s3601_s18 }
  0x48   :  { %3324 = vrot.lane.b32.xlu0 %v3213_v6, %s3600_s17 }
  0x4a   :  { %405 = vrot.lane.b32.xlu1 %v3644_v0, %s3600_s17 }
  0x4c   :  { %3334 = vrot.lane.b32.xlu0 %v3213_v6, %s3601_s18 }
  0x4e   :  { %579 = vperm.xlu1 %3338, %v561_v37   ;;  %v574_v37 = vld [vmem:[%s5640_s4 + $0x68] sm:$0xff] }
  0x50   :  { %438 = vrot.lane.b32.xlu0 %v3644_v0, %s3601_s18 }
  0x52   :  { %599 = vperm.xlu1 %3338, %v565_v44  }
  0x54   :  { %584 = vperm.xlu0 %3339, %v562_v38   ;;  %v575_v38 = vld [vmem:[%s5640_s4 + $0x70] sm:$0xff] }
  0x56   :  { %604 = vperm.xlu1 %3338, %v566_v57   ;;  %v576_v57 = vld [vmem:[%s5640_s4 + $0x78] sm:$0xff] }
  0x58   :  { %619 = vperm.xlu0 %3339, %v569_v45   ;;  %v572_v45 = vld [vmem:[%s5640_s4 + $0x58] sm:$0xff] }
  0x5c   :  { %589 = vperm.xlu0 %3339, %v563_v58  }
  0x60   :  { %609 = vperm.xlu0 %3339, %v567_v5  }
  0x74   :  { %v43_v8 = vpop.permute.xlu1 %42 }
  0x76   :  { %v3210_v9 = vpop.permute.xlu0 %3209 }
  0x77   :  { %v3212_v10 = vunpack.i.h.bf16 %v3210_v9  ;;  %v3211_v11 = vunpack.i.l.bf16 %v3210_v9 }
  0x78   :  { %v3220_v12 = vpop.permute.xlu1 %3219 }
  0x79   :  { %v3222_v13 = vunpack.i.h.bf16 %v3220_v12  ;;  %v3221_v14 = vunpack.i.l.bf16 %v3220_v12  ;;  %v54_v15 = vsel %vm52_vm0, %v3211_v11, %v3212_v10  ;;  %v53_v16 = vsel %vm52_vm0, %v43_v8, %v3211_v11 }
  0x7a   :  { %v3215_v17 = vpop.permute.xlu0 %3214  ;;  %v534_v18 = vpack.c.bf16 %v54_v15, %v3649_v1  ;;  %v533_v19 = vpack.c.bf16 %v53_v16, %v3644_v0 }
  0x7b   :  { %v3217_v20 = vunpack.i.h.bf16 %v3215_v17  ;;  %v3216_v21 = vunpack.i.l.bf16 %v3215_v17  ;;  %v87_v23 = vsel %vm85_vm1, %v3221_v14, %v3222_v13 }
  0x7c   :  { %v3230_v22 = vpop.permute.xlu1 %3229  ;;  %722 = vmatprep.subr.bf16.mxu0 %v534_v18 }
  0x7d   :  { %v3232_v24 = vunpack.i.h.bf16 %v3230_v22  ;;  %v3231_v25 = vunpack.i.l.bf16 %v3230_v22  ;;  %723 = vmatpush1.bf16.msra.mxu0 %v533_v19  ;;  %v56_v26 = vsel %vm52_vm0, %v3216_v21, %v3217_v20  ;;  %v55_v27 = vsel %vm52_vm0, %v3212_v10, %v3216_v21 }
  0x7e   :  { %v3225_v28 = vpop.permute.xlu0 %3224  ;;  %v536_v29 = vpack.c.bf16 %v56_v26, %v3663_v4  ;;  %v535_v30 = vpack.c.bf16 %v55_v27, %v3654_v2  ;;  %v570_v4 = vld [vmem:[%s5640_s4 + $0x48] sm:$0xff]  ;;  %v568_v26 = vld [vmem:[%s5640_s4 + $0x38] sm:$0xff]  ;;  %v571_v27 = vld [vmem:[%s5640_s4 + $0x50] sm:$0xff] }
  0x7f   :  { %v120_v31 = vsel %vm118_vm2, %v3231_v25, %v3232_v24  ;;  %v3227_v32 = vunpack.i.h.bf16 %v3225_v28  ;;  %v3226_v33 = vunpack.i.l.bf16 %v3225_v28  ;;  %624 = vperm.xlu1 %3338, %v570_v4  }
  0x80   :  { %v76_v34 = vpop.permute.xlu1 %75  ;;  %835 = vmatprep.subr.bf16.mxu1 %v536_v29  ;;  %v538_v35 = vpack.c.bf16 %v120_v31, %v87_v23 }
  0x81   :  { %836 = vmatpush1.bf16.msra.mxu1 %v535_v30  ;;  %v89_v42 = vsel %vm85_vm1, %v3226_v33, %v3227_v32  ;;  %v88_v43 = vsel %vm85_vm1, %v3222_v13, %v3226_v33  ;;  %v86_v53 = vsel %vm85_vm1, %v76_v34, %v3221_v14  ;;  %v564_v13 = vld [vmem:[%s5640_s4 + $0x18] sm:$0xff]  ;;  %v573_v14 = vld [vmem:[%s5640_s4 + $0x60] sm:$0xff] }
  0x82   :  { %v3235_v36 = vpop.permute.xlu0 %3234  ;;  %724 = vmatprep.subr.bf16.mxu0 %v538_v35  ;;  %639 = vperm.xlu0 %3339, %v573_v14  }
  0x83   :  { %v3237_v39 = vunpack.i.h.bf16 %v3235_v36  ;;  %v3236_v40 = vunpack.i.l.bf16 %v3235_v36  ;;  %594 = vperm.xlu1 %3338, %v564_v13  }
  0x84   :  { %v3240_v41 = vpop.permute.xlu1 %3239 }
  0x85   :  { %v3242_v46 = vunpack.i.h.bf16 %v3240_v41  ;;  %v3241_v47 = vunpack.i.l.bf16 %v3240_v41  ;;  %v122_v48 = vsel %vm118_vm2, %v3236_v40, %v3237_v39  ;;  %v121_v49 = vsel %vm118_vm2, %v3232_v24, %v3236_v40 }
  0x86   :  { %v109_v50 = vpop.permute.xlu0 %108  ;;  %v540_v51 = vpack.c.bf16 %v122_v48, %v89_v42  ;;  %v539_v52 = vpack.c.bf16 %v121_v49, %v88_v43  ;;  %629 = vperm.xlu0 %3339, %v571_v27  }
  0x87   :  { %v119_v54 = vsel %vm118_vm2, %v109_v50, %v3231_v25  ;;  %v153_v61 = vsel %vm151_vm3, %v3241_v47, %v3242_v46  ;;  %614 = vperm.xlu1 %3338, %v568_v26  }
  0x88   :  { %v537_v55 = vpack.c.bf16 %v119_v54, %v86_v53  ;;  %v3250_v56 = vpop.permute.xlu1 %3249  ;;  %837 = vmatprep.subr.bf16.mxu1 %v540_v51 }
  0x89   :  { %v3252_v59 = vunpack.i.h.bf16 %v3250_v56  ;;  %v3251_v60 = vunpack.i.l.bf16 %v3250_v56  ;;  %838 = vmatpush1.bf16.msra.mxu1 %v539_v52 }
  0x8a   :  { %v3245_v62 = vpop.permute.xlu0 %3244  ;;  %725 = vmatpush1.bf16.msra.mxu0 %v537_v55  ;;  %649 = vperm.xlu0 %3339, %v575_v38  }
  0x8b   :  { %v186_v63 = vsel %vm184_vm4, %v3251_v60, %v3252_v59  ;;  %v3247_v0 = vunpack.i.h.bf16 %v3245_v62  ;;  %v3246_v1 = vunpack.i.l.bf16 %v3245_v62  ;;  %644 = vperm.xlu1 %3338, %v574_v37  }
  0x8c   :  { %v142_v2 = vpop.permute.xlu1 %141  ;;  %v542_v3 = vpack.c.bf16 %v186_v63, %v153_v61 }
  0x8d   :  { %v155_v11 = vsel %vm151_vm3, %v3246_v1, %v3247_v0  ;;  %v154_v12 = vsel %vm151_vm3, %v3242_v46, %v3246_v1  ;;  %v152_v22 = vsel %vm151_vm3, %v142_v2, %v3241_v47 }
  0x8e   :  { %v3255_v6 = vpop.permute.xlu0 %3254  ;;  %726 = vmatprep.subr.bf16.mxu0 %v542_v3  ;;  %3346 = vrot.lane.b32.xlu0 %v5652_v7, %s3590_s8 }
  0x8f   :  { %v3257_v8 = vunpack.i.h.bf16 %v3255_v6  ;;  %v3256_v9 = vunpack.i.l.bf16 %v3255_v6  ;;  %634 = vperm.xlu1 %3338, %v572_v45  }
  0x90   :  { %v3260_v10 = vpop.permute.xlu1 %3259 }
  0x91   :  { %v3262_v15 = vunpack.i.h.bf16 %v3260_v10  ;;  %v3261_v16 = vunpack.i.l.bf16 %v3260_v10  ;;  %v188_v17 = vsel %vm184_vm4, %v3256_v9, %v3257_v8  ;;  %v187_v18 = vsel %vm184_vm4, %v3252_v59, %v3256_v9 }
  0x92   :  { %v175_v19 = vpop.permute.xlu0 %174  ;;  %v544_v20 = vpack.c.bf16 %v188_v17, %v155_v11  ;;  %v543_v21 = vpack.c.bf16 %v187_v18, %v154_v12  ;;  %3356 = vrot.lane.b32.xlu0 %v5652_v7, %s3592_s0 }
  0x93   :  { %v185_v23 = vsel %vm184_vm4, %v175_v19, %v3251_v60  ;;  %v219_v30 = vsel %vm5651_vm5, %v3261_v16, %v3262_v15  ;;  %654 = vperm.xlu1 %3338, %v576_v57  }
  0x94   :  { %v541_v24 = vpack.c.bf16 %v185_v23, %v152_v22  ;;  %v3270_v25 = vpop.permute.xlu1 %3269  ;;  %839 = vmatprep.subr.bf16.mxu1 %v544_v20 }
  0x95   :  { %v3272_v28 = vunpack.i.h.bf16 %v3270_v25  ;;  %v3271_v29 = vunpack.i.l.bf16 %v3270_v25  ;;  %840 = vmatpush1.bf16.msra.mxu1 %v543_v21 }
  0x96   :  { %v3265_v31 = vpop.permute.xlu0 %3264  ;;  %727 = vmatpush1.bf16.msra.mxu0 %v541_v24  ;;  %3366 = vrot.lane.b32.xlu0 %v5652_v7, %s3594_s11 }
  0x97   :  { %v252_v32 = vsel %vm5650_vm6, %v3271_v29, %v3272_v28  ;;  %v3267_v33 = vunpack.i.h.bf16 %v3265_v31  ;;  %v3266_v34 = vunpack.i.l.bf16 %v3265_v31  ;;  %3341 = vrot.lane.b32.xlu1 %v5652_v7, %s3589_s27 }
  0x98   :  { %v208_v35 = vpop.permute.xlu1 %207  ;;  %v546_v36 = vpack.c.bf16 %v252_v32, %v219_v30 }
  0x99   :  { %v221_v43 = vsel %vm5651_vm5, %v3266_v34, %v3267_v33  ;;  %v220_v44 = vsel %vm5651_vm5, %v3262_v15, %v3266_v34  ;;  %v218_v53 = vsel %vm5651_vm5, %v208_v35, %v3261_v16 }
  0x9a   :  { %v3275_v39 = vpop.permute.xlu0 %3274  ;;  %728 = vmatprep.subr.bf16.mxu0 %v546_v36  ;;  %3376 = vrot.lane.b32.xlu0 %v5652_v7, %s3596_s13 }
  0x9b   :  { %v3277_v40 = vunpack.i.h.bf16 %v3275_v39  ;;  %v3276_v41 = vunpack.i.l.bf16 %v3275_v39  ;;  %3351 = vrot.lane.b32.xlu1 %v5652_v7, %s3591_s9 }
  0x9c   :  { %v3280_v42 = vpop.permute.xlu1 %3279 }
  0x9d   :  { %v3282_v46 = vunpack.i.h.bf16 %v3280_v42  ;;  %v3281_v47 = vunpack.i.l.bf16 %v3280_v42  ;;  %v254_v48 = vsel %vm5650_vm6, %v3276_v41, %v3277_v40  ;;  %v253_v49 = vsel %vm5650_vm6, %v3272_v28, %v3276_v41 }
  0x9e   :  { %v241_v50 = vpop.permute.xlu0 %240  ;;  %v548_v51 = vpack.c.bf16 %v254_v48, %v221_v43  ;;  %v547_v52 = vpack.c.bf16 %v253_v49, %v220_v44  ;;  %3386 = vrot.lane.b32.xlu0 %v5652_v7, %s3598_s15 }
  0x9f   :  { %v251_v54 = vsel %vm5650_vm6, %v241_v50, %v3271_v29  ;;  %v285_v60 = vsel %vm5649_vm7, %v3281_v47, %v3282_v46  ;;  %3361 = vrot.lane.b32.xlu1 %v5652_v7, %s3593_s10 }
  0xa0   :  { %v545_v55 = vpack.c.bf16 %v251_v54, %v218_v53  ;;  %v3290_v56 = vpop.permute.xlu1 %3289  ;;  %841 = vmatprep.subr.bf16.mxu1 %v548_v51 }
  0xa1   :  { %v3292_v58 = vunpack.i.h.bf16 %v3290_v56  ;;  %v3291_v59 = vunpack.i.l.bf16 %v3290_v56  ;;  %842 = vmatpush1.bf16.msra.mxu1 %v547_v52 }
  0xa2   :  { %v3285_v61 = vpop.permute.xlu0 %3284  ;;  %729 = vmatpush1.bf16.msra.mxu0 %v545_v55 }
  0xa3   :  { %v318_v62 = vsel %vm5648_vm8, %v3291_v59, %v3292_v58  ;;  %v3287_v63 = vunpack.i.h.bf16 %v3285_v61  ;;  %v3286_v0 = vunpack.i.l.bf16 %v3285_v61  ;;  %3371 = vrot.lane.b32.xlu1 %v5652_v7, %s3595_s12 }
  0xa4   :  { %v274_v1 = vpop.permute.xlu1 %273  ;;  %v550_v2 = vpack.c.bf16 %v318_v62, %v285_v60 }
  0xa5   :  { %v287_v8 = vsel %vm5649_vm7, %v3286_v0, %v3287_v63  ;;  %v286_v9 = vsel %vm5649_vm7, %v3282_v46, %v3286_v0  ;;  %v284_v17 = vsel %vm5649_vm7, %v274_v1, %v3281_v47 }
  0xa6   :  { %v3295_v3 = vpop.permute.xlu0 %3294  ;;  %730 = vmatprep.subr.bf16.mxu0 %v550_v2 }
  0xa7   :  { %v3297_v4 = vunpack.i.h.bf16 %v3295_v3  ;;  %v3296_v5 = vunpack.i.l.bf16 %v3295_v3  ;;  %3381 = vrot.lane.b32.xlu1 %v5652_v7, %s3597_s14 }
  0xa8   :  { %v3300_v6 = vpop.permute.xlu1 %3299 }
  0xa9   :  { %v3302_v10 = vunpack.i.h.bf16 %v3300_v6  ;;  %v3301_v11 = vunpack.i.l.bf16 %v3300_v6  ;;  %v320_v12 = vsel %vm5648_vm8, %v3296_v5, %v3297_v4  ;;  %v319_v13 = vsel %vm5648_vm8, %v3292_v58, %v3296_v5  ;;  %v3408_v5 = vld [vmem:[%s5639_s1] sm:$0xff]   ;;  %v3409_v6 = vld [vmem:[%s5639_s1 + $0x8] sm:$0xff]  }
  0xaa   :  { %v307_v14 = vpop.permute.xlu0 %306  ;;  %v552_v15 = vpack.c.bf16 %v320_v12, %v287_v8  ;;  %v551_v16 = vpack.c.bf16 %v319_v13, %v286_v9  ;;  %v3410_v8 = vld [vmem:[%s5639_s1 + $0x10] sm:$0xff]   ;;  %v3411_v9 = vld [vmem:[%s5639_s1 + $0x18] sm:$0xff]  }
  0xab   :  { %v317_v18 = vsel %vm5648_vm8, %v307_v14, %v3291_v59  ;;  %v351_v23 = vsel %vm5647_vm9, %v3301_v11, %v3302_v10  ;;  %v3414_v12 = vld [vmem:[%s5639_s1 + $0x30] sm:$0xff]   ;;  %v3415_v13 = vld [vmem:[%s5639_s1 + $0x38] sm:$0xff]  }
  0xac   :  { %v549_v19 = vpack.c.bf16 %v317_v18, %v284_v17  ;;  %v3310_v20 = vpop.permute.xlu1 %3309  ;;  %843 = vmatprep.subr.bf16.mxu1 %v552_v15 }
  0xad   :  { %v3312_v21 = vunpack.i.h.bf16 %v3310_v20  ;;  %v3311_v22 = vunpack.i.l.bf16 %v3310_v20  ;;  %844 = vmatpush1.bf16.msra.mxu1 %v551_v16 }
  0xae   :  { %v3305_v24 = vpop.permute.xlu0 %3304  ;;  %731 = vmatpush1.bf16.msra.mxu0 %v549_v19 }
  0xaf   :  { %v384_v25 = vsel %vm382_vm10, %v3311_v22, %v3312_v21  ;;  %v3307_v26 = vunpack.i.h.bf16 %v3305_v24  ;;  %v3306_v27 = vunpack.i.l.bf16 %v3305_v24 }
  0xb0   :  { %v340_v28 = vpop.permute.xlu1 %339  ;;  %v554_v29 = vpack.c.bf16 %v384_v25, %v351_v23 }
  0xb1   :  { %v353_v34 = vsel %vm5647_vm9, %v3306_v27, %v3307_v26  ;;  %v352_v35 = vsel %vm5647_vm9, %v3302_v10, %v3306_v27  ;;  %v350_v43 = vsel %vm5647_vm9, %v340_v28, %v3301_v11  ;;  %v3412_v10 = vld [vmem:[%s5639_s1 + $0x20] sm:$0xff]   ;;  %v3413_v11 = vld [vmem:[%s5639_s1 + $0x28] sm:$0xff]   ;;  %s3603_s1 = smov 7  }
  0xb2   :  { %v3315_v30 = vpop.permute.xlu0 %3314  ;;  %732 = vmatprep.subr.bf16.mxu0 %v554_v29 }
  0xb3   :  { %v3317_v31 = vunpack.i.h.bf16 %v3315_v30  ;;  %v3316_v32 = vunpack.i.l.bf16 %v3315_v30 }
  0xb4   :  { %v3320_v33 = vpop.permute.xlu1 %3319 }
  0xb5   :  { %v3322_v36 = vunpack.i.h.bf16 %v3320_v33  ;;  %v3321_v37 = vunpack.i.l.bf16 %v3320_v33  ;;  %v386_v38 = vsel %vm382_vm10, %v3316_v32, %v3317_v31  ;;  %v385_v39 = vsel %vm382_vm10, %v3312_v21, %v3316_v32 }
  0xb6   :  { %v373_v40 = vpop.permute.xlu0 %372  ;;  %v556_v41 = vpack.c.bf16 %v386_v38, %v353_v34  ;;  %v555_v42 = vpack.c.bf16 %v385_v39, %v352_v35 }
  0xb7   :  { %v383_v44 = vsel %vm382_vm10, %v373_v40, %v3311_v22  ;;  %v417_v49 = vsel %vm5646_vm11, %v3321_v37, %v3322_v36 }
  0xb8   :  { %v553_v45 = vpack.c.bf16 %v383_v44, %v350_v43  ;;  %v3330_v46 = vpop.permute.xlu1 %3329  ;;  %845 = vmatprep.subr.bf16.mxu1 %v556_v41 }
  0xb9   :  { %v3332_v47 = vunpack.i.h.bf16 %v3330_v46  ;;  %v3331_v48 = vunpack.i.l.bf16 %v3330_v46  ;;  %846 = vmatpush1.bf16.msra.mxu1 %v555_v42 }
  0xba   :  { %v3325_v50 = vpop.permute.xlu0 %3324  ;;  %733 = vmatpush1.bf16.msra.mxu0 %v553_v45 }
  0xbb   :  { %v450_v51 = vsel %vm5645_vm12, %v3331_v48, %v3332_v47  ;;  %v3327_v53 = vunpack.i.h.bf16 %v3325_v50  ;;  %v3326_v54 = vunpack.i.l.bf16 %v3325_v50 }
  0xbc   :  { %v558_v52 = vpack.c.bf16 %v450_v51, %v417_v49  ;;  %v406_v58 = vpop.permute.xlu1 %405 }
  0xbd   :  { %v419_v59 = vsel %vm5646_vm11, %v3326_v54, %v3327_v53  ;;  %v418_v61 = vsel %vm5646_vm11, %v3322_v36, %v3326_v54  ;;  %v416_v2 = vsel %vm5646_vm11, %v406_v58, %v3321_v37 }
  0xbe   :  { %v3335_v55 = vpop.permute.xlu0 %3334  ;;  %734 = vmatprep.subr.bf16.mxu0 %v558_v52 }
  0xbf   :  { %v3337_v56 = vunpack.i.h.bf16 %v3335_v55  ;;  %v3336_v57 = vunpack.i.l.bf16 %v3335_v55 }
  0xc1   :  { %v452_v60 = vsel %vm5645_vm12, %v3336_v57, %v3337_v56  ;;  %v451_v62 = vsel %vm5645_vm12, %v3332_v47, %v3336_v57 }
  0xc2   :  { %v439_v63 = vpop.permute.xlu0 %438  ;;  %v560_v0 = vpack.c.bf16 %v452_v60, %v419_v59  ;;  %v559_v1 = vpack.c.bf16 %v451_v62, %v418_v61 }
  0xc3   :  { %v449_v3 = vsel %vm5645_vm12, %v439_v63, %v3331_v48 }
  0xc4   :  { %v557_v4 = vpack.c.bf16 %v449_v3, %v416_v2  ;;  %847 = vmatprep.subr.bf16.mxu1 %v560_v0 }
  0xc5   :  { %848 = vmatpush1.bf16.msra.mxu1 %v559_v1 }
  0xc6   :  { %735 = vmatpush1.bf16.msra.mxu0 %v557_v4 }
  0xc8   :  { %3059 = vmatmul.mubr.msk.bf16.vlgmr.msra.gmra.mrb[0].mxu1 %vm697_vm13, %v3408_v5 }
  0xc9   :  { %3051 = vmatmul.mubr.msk.bf16.vlgmr.msra.gmra.mrb[0].mxu0 %vm697_vm13, %v3408_v5  ;;  %877 = vmatprep.mubr.bf16.mxu1 %v5652_v7 }
  0xca   :  { %764 = vmatprep.mubr.bf16.mxu0 %v5652_v7 }
  0xcd   :  { %v580_v14 = vpop.permute.xlu1 %579 }
  0xd0   :  { %3060 = vmatmul.mubr.msk.bf16.gmra.mrb[4].mxu1 %vm697_vm13, %v3409_v6 }
  0xd1   :  { %3052 = vmatmul.mubr.msk.bf16.gmra.mrb[4].mxu0 %vm697_vm13, %v3409_v6  ;;  %887 = vmatprep.mubr.bf16.mxu1 %v5652_v7  ;;  %v3910_v15 = vpop.permute.xlu1 %599 }
  0xd2   :  { %774 = vmatprep.mubr.bf16.mxu0 %v5652_v7 }
  0xd3   :  { %v585_v16 = vpop.permute.xlu0 %584 }
  0xd5   :  { %v3912_v17 = vpop.permute.xlu1 %604 }
  0xd7   :  { %v3914_v19 = vpop.permute.xlu0 %619 }
  0xd8   :  { %3061 = vmatmul.mubr.msk.bf16.gmra.mrb[8].mxu1 %vm697_vm13, %v3410_v8 }
  0xd9   :  { %3053 = vmatmul.mubr.msk.bf16.gmra.mrb[8].mxu0 %vm697_vm13, %v3410_v8  ;;  %897 = vmatprep.mubr.bf16.mxu1 %v5652_v7 }
  0xda   :  { %784 = vmatprep.mubr.bf16.mxu0 %v5652_v7 }
  0xdb   :  { %v590_v45 = vpop.permute.xlu0 %589 }
  0xe0   :  { %3062 = vmatmul.mubr.msk.bf16.gmra.mrb[12].mxu1 %vm697_vm13, %v3411_v9 }
  0xe1   :  { %3054 = vmatmul.mubr.msk.bf16.gmra.mrb[12].mxu0 %vm697_vm13, %v3411_v9  ;;  %907 = vmatprep.mubr.bf16.mxu1 %v5652_v7 }
  0xe2   :  { %794 = vmatprep.mubr.bf16.mxu0 %v5652_v7 }
  0xe8   :  { %3063 = vmatmul.mubr.msk.bf16.gmra.mrb[16].mxu1 %vm697_vm13, %v3412_v10 }
  0xe9   :  { %3055 = vmatmul.mubr.msk.bf16.gmra.mrb[16].mxu0 %vm697_vm13, %v3412_v10  ;;  %917 = vmatprep.mubr.bf16.mxu1 %v5652_v7 }
  0xea   :  { %804 = vmatprep.mubr.bf16.mxu0 %v5652_v7 }
  0xf0   :  { %3064 = vmatmul.mubr.msk.bf16.gmra.mrb[20].mxu1 %vm697_vm13, %v3413_v11 }
  0xf1   :  { %3056 = vmatmul.mubr.msk.bf16.gmra.mrb[20].mxu0 %vm697_vm13, %v3413_v11  ;;  %927 = vmatprep.mubr.bf16.mxu1 %v5652_v7 }
  0xf2   :  { %814 = vmatprep.mubr.bf16.mxu0 %v5652_v7 }
  0xf8   :  { %3065 = vmatmul.mubr.msk.bf16.gmra.mrb[24].mxu1 %vm697_vm13, %v3414_v12 }
  0xf9   :  { %3057 = vmatmul.mubr.msk.bf16.gmra.mrb[24].mxu0 %vm697_vm13, %v3414_v12  ;;  %937 = vmatprep.mubr.bf16.mxu1 %v5652_v7 }
  0xfa   :  { %824 = vmatprep.mubr.bf16.mxu0 %v5652_v7 }
  0xfe   :  { %v3933_v41 = vpop.permute.xlu1 %624 }
 0x100   :  { %3066 = vmatmul.mubr.msk.bf16.gmra.mrb[28].mxu1 %vm697_vm13, %v3415_v13 }
 0x101   :  { %3058 = vmatmul.mubr.msk.bf16.gmra.mrb[28].mxu0 %vm697_vm13, %v3415_v13 }
 0x102   :  { %v595_v0 = vpop.permute.xlu1 %594 }
 0x19b   :  { %v869_v18 = vpop.f32.mrb[0].mxu1 }
 0x19c   :  { %v3916_v20 = vadd.f32 %v869_v18, %v580_v14  ;;  %v756_v21 = vpop.f32.mrb[0].mxu0  ;;  %v871_v22 = vpop.f32.mrb[1].mxu1 }
 0x19d   :  { %v3918_v23 = vadd.f32 %v756_v21, %v580_v14  ;;  %v3920_v24 = vadd.f32 %v871_v22, %v580_v14  ;;  %v758_v25 = vpop.f32.mrb[1].mxu0  ;;  %v873_v26 = vpop.f32.mrb[2].mxu1 }
 0x19e   :  { %v1014_v27 = vmin.f32 %v3916_v20, 0.0  ;;  %v3923_v28 = vadd.f32 %v758_v25, %v580_v14  ;;  %v3925_v29 = vadd.f32 %v873_v26, %v585_v16  ;;  %v760_v30 = vpop.f32.mrb[2].mxu0  ;;  %v875_v31 = vpop.f32.mrb[3].mxu1  ;;  %vm950_vm14 = vcmp.gt.f32.partialorder %v3916_v20, 0.0 }
 0x19f   :  { %v1012_v32 = vmin.f32 %v3918_v23, 0.0  ;;  %v1015_v33 = vmin.f32 %v3920_v24, 0.0  ;;  %v762_v34 = vpop.f32.mrb[3].mxu0  ;;  %v3931_v40 = vadd.f32 %v760_v30, %v585_v16  ;;  %v3935_v43 = vadd.f32 %v875_v31, %v585_v16 }
 0x1a0   :  { %v1080_v35 = vmul.f32 1.442695, %v1014_v27  ;;  %v1013_v36 = vmin.f32 %v3923_v28, 0.0  ;;  %v1018_v39 = vmin.f32 %v3925_v29, 0.0  ;;  %v3937_v44 = vadd.f32 %v762_v34, %v585_v16 }
 0x1a1   :  { %v1076_v37 = vmul.f32 1.442695, %v1012_v32  ;;  %v1082_v38 = vmul.f32 1.442695, %v1015_v33  ;;  %v1016_v47 = vmin.f32 %v3931_v40, 0.0  ;;  %v1019_v49 = vmin.f32 %v3935_v43, 0.0 }
 0x1a2   :  { %v1078_v42 = vmul.f32 1.442695, %v1013_v36  ;;  %3428 = vpow2.f32 %v1080_v35  ;;  %v1088_v46 = vmul.f32 1.442695, %v1018_v39  ;;  %v1017_v53 = vmin.f32 %v3937_v44, 0.0 }
 0x1a3   :  { %v879_v48 = vpop.f32.mrb[4].mxu1  ;;  %3430 = vpow2.f32 %v1076_v37  ;;  %v1084_v52 = vmul.f32 1.442695, %v1016_v47  ;;  %v1090_v57 = vmul.f32 1.442695, %v1019_v49  ;;  %vm948_vm15 = vcmp.gt.f32.partialorder %v3918_v23, 0.0 }
 0x1a4   :  { %v766_v50 = vpop.f32.mrb[4].mxu0  ;;  %v881_v51 = vpop.f32.mrb[5].mxu1  ;;  %3432 = vpow2.f32 %v1082_v38  ;;  %v3942_v54 = vadd.f32 %v879_v48, %v590_v45  ;;  %v1086_v62 = vmul.f32 1.442695, %v1017_v53  ;;  %vm951_vm13 = vcmp.gt.f32.partialorder %v3920_v24, 0.0 }
 0x1a5   :  { %v768_v55 = vpop.f32.mrb[5].mxu0  ;;  %v883_v56 = vpop.f32.mrb[6].mxu1  ;;  %3434 = vpow2.f32 %v1078_v42  ;;  %v3944_v58 = vadd.f32 %v766_v50, %v590_v45  ;;  %v3946_v59 = vadd.f32 %v881_v51, %v590_v45  ;;  %vm949_vm12 = vcmp.gt.f32.partialorder %v3923_v28, 0.0 }
 0x1a6   :  { %v770_v60 = vpop.f32.mrb[6].mxu0  ;;  %v885_v61 = vpop.f32.mrb[7].mxu1  ;;  %3436 = vpow2.f32 %v1088_v46  ;;  %v1022_v63 = vmin.f32 %v3942_v54, 0.0  ;;  %v3951_v5 = vadd.f32 %v768_v55, %v590_v45  ;;  %v3953_v8 = vadd.f32 %v883_v56, %v595_v0 }
 0x1a7   :  { %v772_v1 = vpop.f32.mrb[7].mxu0  ;;  %3438 = vpow2.f32 %v1084_v52  ;;  %v1020_v2 = vmin.f32 %v3944_v58, 0.0  ;;  %v1023_v4 = vmin.f32 %v3946_v59, 0.0  ;;  %v3955_v9 = vadd.f32 %v770_v60, %v595_v0 }
 0x1a8   :  { %3440 = vpow2.f32 %v1090_v57  ;;  %v1096_v3 = vmul.f32 1.442695, %v1022_v63  ;;  %v3957_v10 = vadd.f32 %v885_v61, %v595_v0  ;;  %v1021_v12 = vmin.f32 %v3951_v5, 0.0 }
 0x1a9   :  { %v1092_v6 = vmul.f32 1.442695, %v1020_v2  ;;  %3442 = vpow2.f32 %v1086_v62  ;;  %v1098_v11 = vmul.f32 1.442695, %v1023_v4  ;;  %v1026_v14 = vmin.f32 %v3953_v8, 0.0 }
 0x1aa   :  { %3444 = vpow2.f32 %v1096_v3  ;;  %v1094_v22 = vmul.f32 1.442695, %v1021_v12  ;;  %v1024_v25 = vmin.f32 %v3955_v9, 0.0  ;;  %v1027_v32 = vmin.f32 %v3957_v10, 0.0 }
 0x1ab   :  { %v889_v13 = vpop.f32.mrb[8].mxu1  ;;  %3446 = vpow2.f32 %v1092_v6  ;;  %v1104_v31 = vmul.f32 1.442695, %v1026_v14  ;;  %v3975_v45 = vadd.f32 %v772_v1, %v595_v0  ;;  %vm954_vm11 = vcmp.gt.f32.partialorder %v3925_v29, 0.0 }
 0x1ac   :  { %v776_v16 = vpop.f32.mrb[8].mxu0  ;;  %v891_v18 = vpop.f32.mrb[9].mxu1  ;;  %3448 = vpow2.f32 %v1098_v11  ;;  %v1100_v35 = vmul.f32 1.442695, %v1024_v25  ;;  %v1106_v39 = vmul.f32 1.442695, %v1027_v32  ;;  %v3980_v47 = vadd.f32 %v889_v13, %v3910_v15 }
 0x1ad   :  { %v3429_v21 = vpop.eup %3428  ;;  %v778_v26 = vpop.f32.mrb[9].mxu0  ;;  %3450 = vpow2.f32 %v1094_v22  ;;  %vm952_vm9 = vcmp.gt.f32.partialorder %v3931_v40, 0.0  ;;  %vm955_vm8 = vcmp.gt.f32.partialorder %v3935_v43, 0.0  ;;  %vm953_vm7 = vcmp.gt.f32.partialorder %v3937_v44, 0.0 }
 0x1ae   :  { %v3962_v27 = vpop.f32.mrb[10].mxu1  ;;  %v3431_v30 = vpop.eup %3430  ;;  %3452 = vpow2.f32 %v1104_v31  ;;  %v3069_v49 = vadd.f32 -1.0, %v3429_v21  ;;  %v1025_v53 = vmin.f32 %v3975_v45, 0.0  ;;  %v1030_v55 = vmin.f32 %v3980_v47, 0.0 }
 0x1af   :  { %v3965_v33 = vpop.f32.mrb[10].mxu0  ;;  %v3433_v34 = vpop.eup %3432  ;;  %3454 = vpow2.f32 %v1100_v35  ;;  %v3067_v50 = vadd.f32 -1.0, %v3431_v30  ;;  %vm958_vm6 = vcmp.gt.f32.partialorder %v3942_v54, 0.0  ;;  %v3994_v62 = vadd.f32 %v776_v16, %v3910_v15 }
 0x1b0   :  { %v3967_v36 = vpop.f32.mrb[11].mxu1  ;;  %v3969_v37 = vpop.f32.mrb[11].mxu0  ;;  %3456 = vpow2.f32 %v1106_v39  ;;  %v3070_v52 = vadd.f32 -1.0, %v3433_v34  ;;  %v3997_v63 = vadd.f32 %v891_v18, %v3910_v15  ;;  %v1112_v6 = vmul.f32 1.442695, %v1030_v55 }
 0x1b1   :  { %v3435_v38 = vpop.eup %3434  ;;  %v4004_v11 = vadd.f32 %v778_v26, %v3910_v15  ;;  %v4013_v14 = vsel %vm950_vm14, %v3916_v20, %v3069_v49  ;;  %v4018_v16 = vsel %vm948_vm15, %v3918_v23, %v3067_v50  ;;  %v1028_v21 = vmin.f32 %v3994_v62, 0.0 }
 0x1b2   :  { %v3437_v42 = vpop.eup %3436  ;;  %v3068_v61 = vadd.f32 -1.0, %v3435_v38  ;;  %v4026_v25 = vsel %vm951_vm13, %v3920_v24, %v3070_v52  ;;  %vm956_vm14 = vcmp.gt.f32.partialorder %v3944_v58, 0.0  ;;  %v1102_v20 = vmul.f32 1.442695, %v1025_v53 }
 0x1b3   :  { %v3439_v46 = vpop.eup %3438  ;;  %v3983_v51 = vpop.f32.mrb[12].mxu1  ;;  %v3073_v3 = vadd.f32 -1.0, %v3437_v42  ;;  %3458 = vpow2.f32 %v1112_v6  ;;  %vm959_vm15 = vcmp.gt.f32.partialorder %v3946_v59, 0.0  ;;  %vm957_vm5 = vcmp.gt.f32.partialorder %v3951_v5, 0.0 }
 0x1b4   :  { %v3441_v48 = vpop.eup %3440  ;;  %v3988_v56 = vpop.f32.mrb[12].mxu0  ;;  %v3071_v4 = vadd.f32 -1.0, %v3439_v46  ;;  %v4032_v23 = vsel %vm949_vm12, %v3923_v28, %v3068_v61  ;;  %v1108_v32 = vmul.f32 1.442695, %v1028_v21  ;;  %v1031_v24 = vmin.f32 %v3997_v63, 0.0 }
 0x1b5   :  { %v3990_v57 = vpop.f32.mrb[13].mxu1  ;;  %v3443_v60 = vpop.eup %3442  ;;  %v3074_v18 = vadd.f32 -1.0, %v3441_v48  ;;  %v4040_v35 = vsel %vm954_vm11, %v3925_v29, %v3073_v3  ;;  %vm962_vm12 = vcmp.gt.f32.partialorder %v3953_v8, 0.0  ;;  %v1029_v28 = vmin.f32 %v4004_v11, 0.0 }
 0x1b6   :  { %v3999_v0 = vpop.f32.mrb[13].mxu0  ;;  %v4001_v1 = vpop.f32.mrb[14].mxu1  ;;  %v3072_v26 = vadd.f32 -1.0, %v3443_v60  ;;  %v4045_v38 = vsel %vm952_vm9, %v3931_v40, %v3071_v4  ;;  %v4051_v39 = vadd.f32 %v3962_v27, %v3912_v17  ;;  %vm960_vm11 = vcmp.gt.f32.partialorder %v3955_v9, 0.0 }
 0x1b7   :  { %v3445_v2 = vpop.eup %3444  ;;  %v4006_v12 = vpop.f32.mrb[14].mxu0  ;;  %v4056_v46 = vsel %vm955_vm8, %v3935_v43, %v3074_v18  ;;  %vm963_vm13 = vcmp.gt.f32.partialorder %v3957_v10, 0.0  ;;  %3460 = vpow2.f32 %v1108_v32  ;;  %v1114_v29 = vmul.f32 1.442695, %v1031_v24 }
 0x1b8   :  { %v4008_v13 = vpop.f32.mrb[15].mxu1  ;;  %v4021_v22 = vpop.f32.mrb[15].mxu0  ;;  %v3077_v31 = vadd.f32 -1.0, %v3445_v2  ;;  %v4062_v40 = vadd.f32 %v3965_v33, %v3912_v17  ;;  %v4071_v43 = vsel %vm953_vm7, %v3937_v44, %v3072_v26  ;;  %3462 = vpow2.f32 %v1102_v20 }
 0x1b9   :  { %v3447_v15 = vpop.eup %3446  ;;  %v4064_v48 = vpop.permute.xlu0 %609  ;;  %vm966_vm8 = vcmp.gt.f32.partialorder %v3980_v47, 0.0  ;;  %v1110_v52 = vmul.f32 1.442695, %v1029_v28  ;;  %3464 = vpow2.f32 %v1114_v29  ;;  %v1034_v44 = vmin.f32 %v4051_v39, 0.0 }
 0x1ba   :  { %v3449_v30 = vpop.eup %3448  ;;  %v3075_v50 = vadd.f32 -1.0, %v3447_v15  ;;  %v4081_v60 = vsel %vm958_vm6, %v3942_v54, %v3077_v31  ;;  %v1032_v18 = vmin.f32 %v4062_v40, 0.0  ;;  %vm964_vm6 = vcmp.gt.f32.partialorder %v3994_v62, 0.0  ;;  %v615_v29 = vpop.permute.xlu1 %614 }
 0x1bb   :  { %v3451_v34 = vpop.eup %3450  ;;  %v4066_v27 = vpop.f32.mrb[16].mxu1  ;;  %v3078_v61 = vadd.f32 -1.0, %v3449_v30  ;;  %3466 = vpow2.f32 %v1110_v52  ;;  %v1120_v54 = vmul.f32 1.442695, %v1034_v44  ;;  %v4096_v20 = vadd.f32 %v3967_v36, %v3912_v17 }
 0x1bc   :  { %v3453_v42 = vpop.eup %3452  ;;  %v4074_v53 = vpop.f32.mrb[16].mxu0  ;;  %v3076_v4 = vadd.f32 -1.0, %v3451_v34  ;;  %v4100_v30 = vadd.f32 %v3969_v37, %v3912_v17  ;;  %v1116_v24 = vmul.f32 1.442695, %v1032_v18  ;;  %v4106_v34 = vadd.f32 %v3983_v51, %v4064_v48 }
 0x1bd   :  { %v3455_v49 = vpop.eup %3454  ;;  %v4076_v55 = vpop.f32.mrb[17].mxu1  ;;  %v3081_v6 = vadd.f32 -1.0, %v3453_v42  ;;  %v4110_v28 = vadd.f32 %v3988_v56, %v4064_v48  ;;  %v4115_v36 = vsel %vm956_vm14, %v3944_v58, %v3075_v50  ;;  %vm967_vm7 = vcmp.gt.f32.partialorder %v3997_v63, 0.0 }
 0x1be   :  { %v3457_v33 = vpop.eup %3456  ;;  %v4084_v2 = vpop.f32.mrb[17].mxu0  ;;  %v3079_v26 = vadd.f32 -1.0, %v3455_v49  ;;  %3468 = vpow2.f32 %v1120_v54  ;;  %v1035_v17 = vmin.f32 %v4096_v20, 0.0  ;;  %v4121_v37 = vadd.f32 %v3990_v57, %v4064_v48 }
 0x1bf   :  { %v4086_v3 = vpop.f32.mrb[18].mxu1  ;;  %v4089_v21 = vpop.f32.mrb[18].mxu0  ;;  %v3082_v32 = vadd.f32 -1.0, %v3457_v33  ;;  %v4126_v56 = vsel %vm959_vm15, %v3946_v59, %v3078_v61  ;;  %v4131_v58 = vsel %vm957_vm5, %v3951_v5, %v3076_v4  ;;  %vm965_vm9 = vcmp.gt.f32.partialorder %v4004_v11, 0.0 }
 0x1c0   :  { %v4091_v15 = vpop.f32.mrb[19].mxu1  ;;  %v4102_v31 = vpop.f32.mrb[19].mxu0  ;;  %3470 = vpow2.f32 %v1116_v24  ;;  %v1033_v42 = vmin.f32 %v4100_v30, 0.0  ;;  %v4138_v57 = vsel %vm962_vm12, %v3953_v8, %v3081_v6  ;;  %v1122_v50 = vmul.f32 1.442695, %v1035_v17 }
 0x1c1   :  { %v3459_v51 = vpop.eup %3458  ;;  %v1038_v59 = vmin.f32 %v4106_v34, 0.0  ;;  %v4146_v5 = vsel %vm960_vm11, %v3955_v9, %v3079_v26  ;;  %v4151_v33 = vsel %vm963_vm13, %v3957_v10, %v3082_v32  ;;  %v1036_v8 = vmin.f32 %v4110_v28, 0.0 }
 0x1c2   :  { %v3085_v49 = vadd.f32 -1.0, %v3459_v51  ;;  %v1118_v61 = vmul.f32 1.442695, %v1033_v42  ;;  %v3461_v6 = vpop.eup %3460  ;;  %vm970_vm5 = vcmp.gt.f32.partialorder %v4051_v39, 0.0  ;;  %3472 = vpow2.f32 %v1122_v50 }
 0x1c3   :  { %v4141_v52 = vpop.f32.mrb[20].mxu1  ;;  %v1128_v9 = vmul.f32 1.442695, %v1038_v59  ;;  %v1039_v26 = vmin.f32 %v4121_v37, 0.0  ;;  %v3463_v32 = vpop.eup %3462  ;;  %v3083_v17 = vadd.f32 -1.0, %v3461_v6  ;;  %vm968_vm14 = vcmp.gt.f32.partialorder %v4062_v40, 0.0 }
 0x1c4   :  { %v4154_v44 = vpop.f32.mrb[20].mxu0  ;;  %v4156_v4 = vpop.f32.mrb[21].mxu1  ;;  %v1286_v18 = vsel %vm966_vm8, %v3980_v47, %v3085_v49  ;;  %3474 = vpow2.f32 %v1118_v61  ;;  %v1124_v51 = vmul.f32 1.442695, %v1036_v8  ;;  %v4177_v59 = vadd.f32 %v3999_v0, %v4064_v48 }
 0x1c5   :  { %v4163_v10 = vpop.f32.mrb[21].mxu0  ;;  %v4165_v54 = vpop.f32.mrb[22].mxu1  ;;  %v4168_v24 = vadd.f32 %v1286_v18, %v4013_v14  ;;  %3476 = vpow2.f32 %v1128_v9  ;;  %v1130_v50 = vmul.f32 1.442695, %v1039_v26  ;;  %v4180_v7 = vadd.f32 %v4001_v1, %v615_v29 }
 0x1c6   :  { %v4171_v47 = vpop.f32.mrb[22].mxu0  ;;  %v4173_v42 = vpop.f32.mrb[23].mxu1  ;;  %v1284_v61 = vsel %vm964_vm6, %v3994_v62, %v3083_v17  ;;  %3478 = vpow2.f32 %v1124_v51  ;;  %v4188_v18 = vadd.f32 %v4006_v12, %v615_v29  ;;  %vm971_vm15 = vcmp.gt.f32.partialorder %v4096_v20, 0.0 }
 0x1c7   :  { %v3465_v49 = vpop.eup %3464  ;;  %v4182_v14 = vpop.f32.mrb[23].mxu0  ;;  %v4191_v9 = vadd.f32 %v1284_v61, %v4018_v16  ;;  %3480 = vpow2.f32 %v1130_v50  ;;  %vm969_vm12 = vcmp.gt.f32.partialorder %v4100_v30, 0.0  ;;  %v1037_v62 = vmin.f32 %v4177_v59, 0.0 }
 0x1c8   :  { %5664 = vst [vmem:[#allocation5_spill] sm:$0xff] %v4182_v14  ;;  %v3467_v6 = vpop.eup %3466  ;;  %v3086_v8 = vadd.f32 -1.0, %v3465_v49  ;;  %v1042_v48 = vmin.f32 %v4180_v7, 0.0  ;;  %v4200_v12 = vadd.f32 -1.0, %v3463_v32  ;;  %v1040_v51 = vmin.f32 %v4188_v18, 0.0 }
 0x1c9   :  { %v3084_v0 = vadd.f32 -1.0, %v3467_v6  ;;  %v3469_v26 = vpop.eup %3468  ;;  %v1126_v61 = vmul.f32 1.442695, %v1037_v62  ;;  %vm961_vm11 = vcmp.gt.f32.partialorder %v3975_v45, 0.0  ;;  %v4218_v14 = vadd.f32 %v4008_v13, %v615_v29 }
 0x1ca   :  { %v1287_v1 = vsel %vm967_vm7, %v3997_v63, %v3086_v8  ;;  %v3471_v63 = vpop.eup %3470  ;;  %v3089_v6 = vadd.f32 -1.0, %v3469_v26  ;;  %v1136_v8 = vmul.f32 1.442695, %v1042_v48  ;;  %vm974_vm13 = vcmp.gt.f32.partialorder %v4106_v34, 0.0 }
 0x1cb   :  { %v4203_v16 = vadd.f32 %v1287_v1, %v4026_v25  ;;  %v1285_v17 = vsel %vm965_vm9, %v4004_v11, %v3084_v0  ;;  %v4209_v49 = vpop.f32.mrb[24].mxu1  ;;  %v3087_v25 = vadd.f32 -1.0, %v3471_v63  ;;  %v1132_v1 = vmul.f32 1.442695, %v1040_v51 }
 0x1cc   :  { %5665 = vst [vmem:[#allocation6_spill] sm:$0xff] %v4209_v49  ;;  %v4212_v50 = vadd.f32 %v1285_v17, %v4032_v23  ;;  %v4214_v32 = vpop.f32.mrb[24].mxu0  ;;  %v4221_v11 = vadd.f32 %v4021_v22, %v615_v29  ;;  %v4223_v0 = vpop.f32.mrb[25].mxu1  ;;  %v1290_v23 = vsel %vm970_vm5, %v4051_v39, %v3089_v6  ;;  %3482 = vpow2.f32 %v1126_v61 }
 0x1cd   :  { %v4225_v49 = vpop.f32.mrb[25].mxu0  ;;  %v4233_v62 = vadd.f32 %v4066_v27, %v3914_v19  ;;  %v4235_v13 = vpop.f32.mrb[26].mxu1  ;;  %v4240_v29 = vadd.f32 %v1290_v23, %v4040_v35  ;;  %v1288_v26 = vsel %vm968_vm14, %v4062_v40, %v3087_v25  ;;  %vm972_vm8 = vcmp.gt.f32.partialorder %v4110_v28, 0.0 }
 0x1ce   :  { %5666 = vst [vmem:[#allocation7_spill] sm:$0xff] %v4235_v13  ;;  %v4237_v48 = vpop.f32.mrb[26].mxu0  ;;  %v3473_v22 = vpop.eup %3472  ;;  %3484 = vpow2.f32 %v1136_v8  ;;  %v4251_v51 = vadd.f32 %v1288_v26, %v4045_v38  ;;  %v1043_v35 = vmin.f32 %v4218_v14, 0.0  ;;  %vm975_vm6 = vcmp.gt.f32.partialorder %v4121_v37, 0.0 }
 0x1cf   :  { %5667 = vst [vmem:[#allocation8_spill] sm:$0xff] %v4237_v48  ;;  %v4246_v39 = vpop.f32.mrb[27].mxu1  ;;  %v4248_v17 = vpop.f32.mrb[27].mxu0  ;;  %v3090_v63 = vadd.f32 -1.0, %v3473_v22  ;;  %3486 = vpow2.f32 %v1132_v1  ;;  %v1041_v40 = vmin.f32 %v4221_v11, 0.0  ;;  %v4258_v8 = vadd.f32 %v4074_v53, %v3914_v19 }
 0x1d0   :  { %5668 = vst [vmem:[#allocation9_spill] sm:$0xff] %v4246_v39  ;;  %5669 = vst [vmem:[#allocation10_spill] sm:$0xff] %v4248_v17  ;;  %v3475_v27 = vpop.eup %3474  ;;  %v1138_v22 = vmul.f32 1.442695, %v1043_v35  ;;  %v1046_v1 = vmin.f32 %v4233_v62, 0.0  ;;  %vm973_vm7 = vcmp.gt.f32.partialorder %v4177_v59, 0.0 }
 0x1d1   :  { %v3477_v6 = vpop.eup %3476  ;;  %v3088_v61 = vadd.f32 -1.0, %v3475_v27  ;;  %v1291_v38 = vsel %vm971_vm15, %v4096_v20, %v3090_v63  ;;  %v1134_v53 = vmul.f32 1.442695, %v1041_v40  ;;  %vm978_vm9 = vcmp.gt.f32.partialorder %v4180_v7, 0.0 }
 0x1d2   :  { %v3479_v25 = vpop.eup %3478  ;;  %v3093_v23 = vadd.f32 -1.0, %v3477_v6  ;;  %v4265_v27 = vadd.f32 %v1291_v38, %v4056_v46  ;;  %3488 = vpow2.f32 %v1138_v22  ;;  %vm976_vm5 = vcmp.gt.f32.partialorder %v4188_v18, 0.0 }
 0x1d3   :  { %v3481_v26 = vpop.eup %3480  ;;  %v1289_v17 = vsel %vm969_vm12, %v4100_v30, %v3088_v61  ;;  %v3091_v39 = vadd.f32 -1.0, %v3479_v25  ;;  %v4270_v48 = vpop.f32.mrb[28].mxu1  ;;  %3490 = vpow2.f32 %v1134_v53  ;;  %vm979_vm14 = vcmp.gt.f32.partialorder %v4218_v14, 0.0 }
 0x1d4   :  { %v4273_v13 = vadd.f32 %v1289_v17, %v4071_v43  ;;  %v1294_v20 = vsel %vm974_vm13, %v4106_v34, %v3093_v23  ;;  %v3094_v63 = vadd.f32 -1.0, %v3481_v26  ;;  %v4278_v35 = vpop.f32.mrb[28].mxu0  ;;  %v4280_v46 = vpop.f32.mrb[29].mxu1  ;;  %v1144_v43 = vmul.f32 1.442695, %v1046_v1 }
 0x1d5   :  { %v4283_v6 = vadd.f32 %v1294_v20, %v4081_v60  ;;  %v1292_v30 = vsel %vm972_vm8, %v4110_v28, %v3091_v39  ;;  %v4288_v17 = vpop.f32.mrb[29].mxu0  ;;  %v4290_v61 = vpop.f32.mrb[30].mxu1  ;;  %v4296_v34 = vsel %vm961_vm11, %v3975_v45, %v4200_v12  ;;  %v1044_v28 = vmin.f32 %v4258_v8, 0.0 }
 0x1d6   :  { %v4299_v40 = vadd.f32 %v1292_v30, %v4115_v36  ;;  %v1295_v60 = vsel %vm975_vm6, %v4121_v37, %v3094_v63  ;;  %v4305_v39 = vpop.f32.mrb[30].mxu0  ;;  %v4307_v25 = vpop.f32.mrb[31].mxu1  ;;  %3492 = vpow2.f32 %v1144_v43  ;;  %v4314_v45 = vadd.f32 %v4076_v55, %v3914_v19 }
 0x1d7   :  { %v4310_v38 = vadd.f32 %v1295_v60, %v4126_v56  ;;  %v4318_v36 = vadd.f32 %v4084_v2, %v3914_v19  ;;  %v4320_v12 = vpop.f32.mrb[31].mxu0  ;;  %v3483_v37 = vpop.eup %3482  ;;  %v1140_v23 = vmul.f32 1.442695, %v1044_v28  ;;  %v4326_v56 = vadd.f32 %v4086_v3, %v3933_v41 }
 0x1d8   :  { %v3485_v22 = vpop.eup %3484  ;;  %v3092_v1 = vadd.f32 -1.0, %v3483_v37  ;;  %v4328_v55 = vpop.permute.xlu0 %639  ;;  %v1047_v19 = vmin.f32 %v4314_v45, 0.0  ;;  %v4334_v2 = vadd.f32 %v4089_v21, %v3933_v41  ;;  %v4339_v3 = vadd.f32 %v4091_v15, %v3933_v41 }
 0x1d9   :  { %v3487_v26 = vpop.eup %3486  ;;  %v3097_v53 = vadd.f32 -1.0, %v3485_v22  ;;  %3494 = vpow2.f32 %v1140_v23  ;;  %v1045_v20 = vmin.f32 %v4318_v36, 0.0  ;;  %v1050_v60 = vmin.f32 %v4326_v56, 0.0 }
 0x1da   :  { %v1293_v63 = vsel %vm973_vm7, %v4177_v59, %v3092_v1  ;;  %v3095_v30 = vadd.f32 -1.0, %v3487_v26  ;;  %v1146_v43 = vmul.f32 1.442695, %v1047_v19  ;;  %vm977_vm15 = vcmp.gt.f32.partialorder %v4221_v11, 0.0  ;;  %v4361_v19 = vpop.permute.xlu1 %644 }
 0x1db   :  { %v4344_v28 = vadd.f32 %v1293_v63, %v4131_v58  ;;  %v1298_v21 = vsel %vm978_vm9, %v4180_v7, %v3097_v53  ;;  %v1142_v37 = vmul.f32 1.442695, %v1045_v20  ;;  %v1152_v59 = vmul.f32 1.442695, %v1050_v60 }
 0x1dc   :  { %v4351_v23 = vadd.f32 %v1298_v21, %v4138_v57  ;;  %v1296_v15 = vsel %vm976_vm5, %v4188_v18, %v3095_v30  ;;  %3496 = vpow2.f32 %v1146_v43  ;;  %v3489_v22 = vpop.eup %3488  ;;  %v1048_v7 = vmin.f32 %v4334_v2, 0.0  ;;  %v630_v26 = vpop.permute.xlu0 %629 }
 0x1dd   :  { %v4357_v58 = vadd.f32 %v1296_v15, %v4146_v5  ;;  %3498 = vpow2.f32 %v1142_v37  ;;  %v3491_v1 = vpop.eup %3490  ;;  %v3098_v57 = vadd.f32 -1.0, %v3489_v22  ;;  %v1051_v53 = vmin.f32 %v4339_v3, 0.0 }
 0x1de   :  { %3500 = vpow2.f32 %v1152_v59  ;;  %v4366_v18 = vadd.f32 %v4102_v31, %v3933_v41  ;;  %v3096_v20 = vadd.f32 -1.0, %v3491_v1  ;;  %v1148_v5 = vmul.f32 1.442695, %v1048_v7  ;;  %v635_v7 = vpop.permute.xlu1 %634 }
 0x1df   :  { %v4369_v63 = vadd.f32 %v4141_v52, %v630_v26  ;;  %v4372_v30 = vadd.f32 %v4154_v44, %v630_v26  ;;  %v1299_v60 = vsel %vm979_vm14, %v4218_v14, %v3098_v57  ;;  %vm982_vm12 = vcmp.gt.f32.partialorder %v4233_v62, 0.0 }
 0x1e0   :  { %v3493_v43 = vpop.eup %3492  ;;  %v1154_v21 = vmul.f32 1.442695, %v1051_v53  ;;  %v1049_v37 = vmin.f32 %v4366_v18, 0.0  ;;  %v4380_v41 = vadd.f32 %v1299_v60, %v4151_v33  ;;  %v1297_v31 = vsel %vm977_vm15, %v4221_v11, %v3096_v20 }
 0x1e1   :  { %v3101_v52 = vadd.f32 -1.0, %v3493_v43  ;;  %3502 = vpow2.f32 %v1148_v5  ;;  %v4386_v44 = vadd.f32 %v1297_v31, %v4296_v34  ;;  %vm980_vm11 = vcmp.gt.f32.partialorder %v4258_v8, 0.0 }
 0x1e2   :  { %3504 = vpow2.f32 %v1154_v21  ;;  %v1150_v14 = vmul.f32 1.442695, %v1049_v37  ;;  %vm983_vm13 = vcmp.gt.f32.partialorder %v4314_v45, 0.0  ;;  %v1054_v33 = vmin.f32 %v4369_v63, 0.0 }
 0x1e3   :  { %v3495_v15 = vpop.eup %3494  ;;  %v1302_v59 = vsel %vm982_vm12, %v4233_v62, %v3101_v52  ;;  %v1052_v22 = vmin.f32 %v4372_v30, 0.0  ;;  %v4397_v34 = vadd.f32 %v4156_v4, %v630_v26  ;;  %v4400_v20 = vadd.f32 %v4163_v10, %v630_v26 }
 0x1e4   :  { %v4394_v11 = vadd.f32 %v4168_v24, %v1302_v59  ;;  %v3099_v1 = vadd.f32 -1.0, %v3495_v15  ;;  %3506 = vpow2.f32 %v1150_v14  ;;  %v1160_v57 = vmul.f32 1.442695, %v1054_v33 }
 0x1e5   :  { %v1156_v53 = vmul.f32 1.442695, %v1052_v22  ;;  %v4403_v62 = vadd.f32 %v4165_v54, %v635_v7  ;;  %vm981_vm8 = vcmp.gt.f32.partialorder %v4318_v36, 0.0  ;;  %vm986_vm6 = vcmp.gt.f32.partialorder %v4326_v56, 0.0 }
 0x1e6   :  { %v3497_v5 = vpop.eup %3496  ;;  %v1300_v43 = vsel %vm980_vm11, %v4258_v8, %v3099_v1  ;;  %v1055_v4 = vmin.f32 %v4397_v34, 0.0  ;;  %3508 = vpow2.f32 %v1160_v57  ;;  %v4415_v54 = vadd.f32 %v4171_v47, %v635_v7 }
 0x1e7   :  { %v3499_v24 = vpop.eup %3498  ;;  %v4412_v60 = vadd.f32 %v4191_v9, %v1300_v43  ;;  %v3102_v10 = vadd.f32 -1.0, %v3497_v5  ;;  %3510 = vpow2.f32 %v1156_v53  ;;  %v1053_v8 = vmin.f32 %v4400_v20, 0.0  ;;  %v5670_v5 = vld [vmem:[#allocation5_spill] sm:$0xff] }
 0x1e8   :  { %v3501_v26 = vpop.eup %3500  ;;  %v3100_v21 = vadd.f32 -1.0, %v3499_v24  ;;  %v1162_v37 = vmul.f32 1.442695, %v1055_v4  ;;  %vm984_vm7 = vcmp.gt.f32.partialorder %v4334_v2, 0.0  ;;  %v1058_v9 = vmin.f32 %v4403_v62, 0.0  ;;  %v5671_v24 = vld [vmem:[#allocation6_spill] sm:$0xff] }
 0x1e9   :  { %v1303_v31 = vsel %vm983_vm13, %v4314_v45, %v3102_v10  ;;  %v3105_v52 = vadd.f32 -1.0, %v3501_v26  ;;  %v1158_v15 = vmul.f32 1.442695, %v1053_v8  ;;  %vm987_vm9 = vcmp.gt.f32.partialorder %v4339_v3, 0.0 }
 0x1ea   :  { %v4424_v14 = vadd.f32 %v4203_v16, %v1303_v31  ;;  %v1301_v47 = vsel %vm981_vm8, %v4318_v36, %v3100_v21  ;;  %3512 = vpow2.f32 %v1162_v37  ;;  %v1168_v22 = vmul.f32 1.442695, %v1058_v9 }
 0x1eb   :  { %v3503_v59 = vpop.eup %3502  ;;  %v4430_v33 = vadd.f32 %v4212_v50, %v1301_v47  ;;  %v1306_v45 = vsel %vm986_vm6, %v4326_v56, %v3105_v52  ;;  %3514 = vpow2.f32 %v1158_v15  ;;  %v1056_v36 = vmin.f32 %v4415_v54, 0.0 }
 0x1ec   :  { %v3505_v1 = vpop.eup %3504  ;;  %v4437_v16 = vadd.f32 %v4240_v29, %v1306_v45  ;;  %v3103_v57 = vadd.f32 -1.0, %v3503_v59  ;;  %3516 = vpow2.f32 %v1168_v22  ;;  %v4441_v50 = vadd.f32 %v4173_v42, %v635_v7 }
 0x1ed   :  { %v3106_v53 = vadd.f32 -1.0, %v3505_v1  ;;  %v4444_v43 = vadd.f32 %v5670_v5, %v635_v7  ;;  %vm985_vm5 = vcmp.gt.f32.partialorder %v4366_v18, 0.0  ;;  %v1164_v29 = vmul.f32 1.442695, %v1056_v36 }
 0x1ee   :  { %v3507_v56 = vpop.eup %3506  ;;  %v1304_v4 = vsel %vm984_vm7, %v4334_v2, %v3103_v57  ;;  %v4452_v10 = vadd.f32 %v5671_v24, %v4328_v55  ;;  %v4462_v21 = vadd.f32 %v4214_v32, %v4328_v55  ;;  %vm990_vm14 = vcmp.gt.f32.partialorder %v4369_v63, 0.0 }
 0x1ef   :  { %v4455_v26 = vadd.f32 %v4251_v51, %v1304_v4  ;;  %v1307_v42 = vsel %vm987_vm9, %v4339_v3, %v3106_v53  ;;  %v3104_v7 = vadd.f32 -1.0, %v3507_v56  ;;  %3518 = vpow2.f32 %v1164_v29 }
 0x1f0   :  { %v4465_v2 = vadd.f32 %v4265_v27, %v1307_v42  ;;  %v1059_v37 = vmin.f32 %v4441_v50, 0.0  ;;  %v3509_v8 = vpop.eup %3508  ;;  %vm988_vm15 = vcmp.gt.f32.partialorder %v4372_v30, 0.0  ;;  %v1057_v3 = vmin.f32 %v4444_v43, 0.0  ;;  %v5672_v42 = vld [vmem:[#allocation7_spill] sm:$0xff] }
 0x1f1   :  { %v1305_v51 = vsel %vm985_vm5, %v4366_v18, %v3104_v7  ;;  %v1062_v31 = vmin.f32 %v4452_v10, 0.0  ;;  %v3511_v52 = vpop.eup %3510  ;;  %v3109_v27 = vadd.f32 -1.0, %v3509_v8  ;;  %vm991_vm12 = vcmp.gt.f32.partialorder %v4397_v34, 0.0 }
 0x1f2   :  { %v4474_v32 = vadd.f32 %v4273_v13, %v1305_v51  ;;  %v1170_v9 = vmul.f32 1.442695, %v1059_v37  ;;  %v3107_v47 = vadd.f32 -1.0, %v3511_v52  ;;  %v1166_v15 = vmul.f32 1.442695, %v1057_v3 }
 0x1f3   :  { %v1176_v59 = vmul.f32 1.442695, %v1062_v31  ;;  %v1060_v45 = vmin.f32 %v4462_v21, 0.0  ;;  %v1310_v22 = vsel %vm990_vm14, %v4369_v63, %v3109_v27  ;;  %v4483_v1 = vadd.f32 %v4223_v0, %v4328_v55  ;;  %v5674_v31 = vld [vmem:[#allocation9_spill] sm:$0xff] }
 0x1f4   :  { %v3513_v18 = vpop.eup %3512  ;;  %3520 = vpow2.f32 %v1170_v9  ;;  %v4487_v13 = vadd.f32 %v4225_v49, %v4328_v55  ;;  %v4490_v57 = vadd.f32 %v4283_v6, %v1310_v22  ;;  %v1308_v36 = vsel %vm988_vm15, %v4372_v30, %v3107_v47  ;;  %v650_v47 = vpop.permute.xlu0 %649 }
 0x1f5   :  { %v3110_v53 = vadd.f32 -1.0, %v3513_v18  ;;  %3522 = vpow2.f32 %v1166_v15  ;;  %v3515_v5 = vpop.eup %3514  ;;  %v4496_v63 = vadd.f32 %v4299_v40, %v1308_v36  ;;  %vm989_vm11 = vcmp.gt.f32.partialorder %v4400_v20, 0.0 }
 0x1f6   :  { %3524 = vpow2.f32 %v1176_v59  ;;  %v1172_v0 = vmul.f32 1.442695, %v1060_v45  ;;  %v3517_v56 = vpop.eup %3516  ;;  %v3108_v6 = vadd.f32 -1.0, %v3515_v5  ;;  %vm994_vm13 = vcmp.gt.f32.partialorder %v4403_v62, 0.0  ;;  %v5675_v59 = vld [vmem:[#allocation10_spill] sm:$0xff] }
 0x1f7   :  { %v1311_v49 = vsel %vm991_vm12, %v4397_v34, %v3110_v53  ;;  %v1063_v55 = vmin.f32 %v4483_v1, 0.0  ;;  %v3113_v4 = vadd.f32 -1.0, %v3517_v56  ;;  %v1061_v40 = vmin.f32 %v4487_v13, 0.0  ;;  %v5673_v34 = vld [vmem:[#allocation8_spill] sm:$0xff] }
 0x1f8   :  { %v4505_v30 = vadd.f32 %v4310_v38, %v1311_v49  ;;  %3526 = vpow2.f32 %v1172_v0  ;;  %v1309_v29 = vsel %vm989_vm11, %v4400_v20, %v3108_v6  ;;  %v4511_v7 = vadd.f32 %v5672_v42, %v4361_v19 }
 0x1f9   :  { %v1178_v24 = vmul.f32 1.442695, %v1063_v55  ;;  %v4515_v37 = vadd.f32 %v5673_v34, %v4361_v19  ;;  %v3519_v8 = vpop.eup %3518  ;;  %v4518_v51 = vadd.f32 %v4344_v28, %v1309_v29  ;;  %v1314_v38 = vsel %vm994_vm13, %v4403_v62, %v3113_v4 }
 0x1fa   :  { %v1174_v3 = vmul.f32 1.442695, %v1061_v40  ;;  %v4523_v52 = vadd.f32 %v5674_v31, %v4361_v19  ;;  %v4526_v20 = vadd.f32 %v4351_v23, %v1314_v38  ;;  %v3111_v27 = vadd.f32 -1.0, %v3519_v8 }
 0x1fb   :  { %3528 = vpow2.f32 %v1178_v24  ;;  %vm992_vm8 = vcmp.gt.f32.partialorder %v4415_v54, 0.0  ;;  %v1066_v9 = vmin.f32 %v4511_v7, 0.0  ;;  %v1064_v28 = vmin.f32 %v4515_v37, 0.0 }
 0x1fc   :  { %3530 = vpow2.f32 %v1174_v3  ;;  %v1312_v62 = vsel %vm992_vm8, %v4415_v54, %v3111_v27  ;;  %vm995_vm6 = vcmp.gt.f32.partialorder %v4441_v50, 0.0  ;;  %v1067_v15 = vmin.f32 %v4523_v52, 0.0 }
 0x1fd   :  { %v4536_v23 = vadd.f32 %v5675_v59, %v4361_v19  ;;  %v4539_v18 = vadd.f32 %v4357_v58, %v1312_v62  ;;  %v1184_v22 = vmul.f32 1.442695, %v1066_v9  ;;  %v1180_v36 = vmul.f32 1.442695, %v1064_v28 }
 0x1fe   :  { %v3521_v45 = vpop.eup %3520  ;;  %v4542_v53 = vadd.f32 %v4270_v48, %v650_v47  ;;  %vm993_vm7 = vcmp.gt.f32.partialorder %v4444_v43, 0.0  ;;  %v1186_v54 = vmul.f32 1.442695, %v1067_v15  ;;  %vm998_vm9 = vcmp.gt.f32.partialorder %v4452_v10, 0.0 }
 0x1ff   :  { %v3523_v5 = vpop.eup %3522  ;;  %v3114_v0 = vadd.f32 -1.0, %v3521_v45  ;;  %v1065_v56 = vmin.f32 %v4536_v23, 0.0  ;;  %3532 = vpow2.f32 %v1184_v22  ;;  %vm996_vm5 = vcmp.gt.f32.partialorder %v4462_v21, 0.0 }
 0x200   :  { %v3525_v49 = vpop.eup %3524  ;;  %v3112_v6 = vadd.f32 -1.0, %v3523_v5  ;;  %v1070_v58 = vmin.f32 %v4542_v53, 0.0  ;;  %3534 = vpow2.f32 %v1180_v36  ;;  %vm999_vm14 = vcmp.gt.f32.partialorder %v4483_v1, 0.0 }
 0x201   :  { %v1315_v19 = vsel %vm995_vm6, %v4441_v50, %v3114_v0  ;;  %v1182_v48 = vmul.f32 1.442695, %v1065_v56  ;;  %3536 = vpow2.f32 %v1186_v54  ;;  %v3117_v42 = vadd.f32 -1.0, %v3525_v49  ;;  %v655_v50 = vpop.permute.xlu1 %654 }
 0x202   :  { %v3527_v55 = vpop.eup %3526  ;;  %v4553_v4 = vadd.f32 %v4380_v41, %v1315_v19  ;;  %v1313_v40 = vsel %vm993_vm7, %v4444_v43, %v3112_v6  ;;  %v1192_v29 = vmul.f32 1.442695, %v1070_v58  ;;  %vm997_vm15 = vcmp.gt.f32.partialorder %v4487_v13, 0.0 }
 0x203   :  { %v4557_v24 = vadd.f32 %v4386_v44, %v1313_v40  ;;  %3538 = vpow2.f32 %v1182_v48  ;;  %v4562_v34 = vadd.f32 %v4278_v35, %v650_v47  ;;  %v4565_v41 = vadd.f32 %v4280_v46, %v650_v47 }
 0x204   :  { %3540 = vpow2.f32 %v1192_v29  ;;  %v4568_v43 = vadd.f32 %v4288_v17, %v650_v47  ;;  %v3115_v44 = vadd.f32 -1.0, %v3527_v55  ;;  %vm1002_vm12 = vcmp.gt.f32.partialorder %v4511_v7, 0.0 }
 0x205   :  { %v3529_v8 = vpop.eup %3528  ;;  %vm1000_vm11 = vcmp.gt.f32.partialorder %v4515_v37, 0.0  ;;  %v4573_v38 = vadd.f32 %v4290_v61, %v655_v50  ;;  %vm1003_vm13 = vcmp.gt.f32.partialorder %v4523_v52, 0.0  ;;  %v1068_v35 = vmin.f32 %v4562_v34, 0.0 }
 0x206   :  { %v3531_v3 = vpop.eup %3530  ;;  %v3118_v31 = vadd.f32 -1.0, %v3529_v8  ;;  %v4578_v46 = vadd.f32 %v4305_v39, %v655_v50  ;;  %vm1001_vm8 = vcmp.gt.f32.partialorder %v4536_v23, 0.0  ;;  %v1071_v17 = vmin.f32 %v4565_v41, 0.0 }
 0x207   :  { %v1069_v27 = vmin.f32 %v4568_v43, 0.0  ;;  %v4584_v9 = vadd.f32 %v4307_v25, %v655_v50  ;;  %v1318_v61 = vsel %vm998_vm9, %v4452_v10, %v3117_v42  ;;  %vm1006_vm6 = vcmp.gt.f32.partialorder %v4542_v53, 0.0 }
 0x208   :  { %v1188_v28 = vmul.f32 1.442695, %v1068_v35  ;;  %v1074_v47 = vmin.f32 %v4573_v38, 0.0  ;;  %v1316_v39 = vsel %vm996_vm5, %v4462_v21, %v3115_v44  ;;  %v3116_v62 = vadd.f32 -1.0, %v3531_v3 }
 0x209   :  { %v1194_v15 = vmul.f32 1.442695, %v1071_v17  ;;  %v1190_v59 = vmul.f32 1.442695, %v1069_v27  ;;  %v3533_v45 = vpop.eup %3532  ;;  %v1319_v25 = vsel %vm999_vm14, %v4483_v1, %v3118_v31  ;;  %v1072_v10 = vmin.f32 %v4578_v46, 0.0 }
 0x20a   :  { %3542 = vpow2.f32 %v1188_v28  ;;  %v1200_v22 = vmul.f32 1.442695, %v1074_v47  ;;  %v3535_v36 = vpop.eup %3534  ;;  %v3121_v5 = vadd.f32 -1.0, %v3533_v45  ;;  %v1075_v0 = vmin.f32 %v4584_v9, 0.0 }
 0x20b   :  { %3544 = vpow2.f32 %v1194_v15  ;;  %v4600_v54 = vadd.f32 %v4320_v12, %v655_v50  ;;  %v3537_v21 = vpop.eup %3536  ;;  %v3119_v56 = vadd.f32 -1.0, %v3535_v36  ;;  %v1196_v49 = vmul.f32 1.442695, %v1072_v10 }
 0x20c   :  { %3546 = vpow2.f32 %v1190_v59  ;;  %v1364_v6 = vadd.f32 %v4412_v60, %v1316_v39  ;;  %v1317_v1 = vsel %vm997_vm15, %v4487_v13, %v3116_v62  ;;  %v3122_v19 = vadd.f32 -1.0, %v3537_v21 }
 0x20d   :  { %v3539_v58 = vpop.eup %3538  ;;  %3548 = vpow2.f32 %v1200_v22  ;;  %v1202_v48 = vmul.f32 1.442695, %v1075_v0  ;;  %v1322_v12 = vsel %vm1002_vm12, %v4511_v7, %v3121_v5  ;;  %v1320_v40 = vsel %vm1000_vm11, %v4515_v37, %v3119_v56 }
 0x20e   :  { %v3541_v55 = vpop.eup %3540  ;;  %v3120_v29 = vadd.f32 -1.0, %v3539_v58  ;;  %3550 = vpow2.f32 %v1196_v49  ;;  %v1323_v60 = vsel %vm1003_vm13, %v4523_v52, %v3122_v19  ;;  %v1073_v13 = vmin.f32 %v4600_v54, 0.0 }
 0x20f   :  { %v3125_v42 = vadd.f32 -1.0, %v3541_v55  ;;  %3552 = vpow2.f32 %v1202_v48  ;;  %v1368_v7 = vadd.f32 %v4455_v26, %v1320_v40  ;;  %v1365_v8 = vadd.f32 %v4430_v33, %v1317_v1 }
 0x210   :  { %v1321_v50 = vsel %vm1001_vm8, %v4536_v23, %v3120_v29  ;;  %v1366_v37 = vadd.f32 %v4394_v11, %v1318_v61  ;;  %v1198_v3 = vmul.f32 1.442695, %v1073_v13  ;;  %v1370_v31 = vadd.f32 %v4437_v16, %v1322_v12 }
 0x211   :  { %v1326_v44 = vsel %vm1006_vm6, %v4542_v53, %v3125_v42  ;;  %v1369_v52 = vadd.f32 %v4474_v32, %v1321_v50  ;;  %v1390_v35 = vpack.c.bf16 %v1368_v7, %v1364_v6  ;;  %v1367_v17 = vadd.f32 %v4424_v14, %v1319_v25 }
 0x212   :  { %v1371_v23 = vadd.f32 %v4465_v2, %v1323_v60  ;;  %v1374_v26 = vadd.f32 %v4490_v57, %v1326_v44  ;;  %3554 = vpow2.f32 %v1198_v3  ;;  %v1419_v27 = vpack.c.bf16 %v1370_v31, %v1366_v37 }
 0x213   :  { %v1391_v33 = vpack.c.bf16 %v1369_v52, %v1365_v8  ;;  %1398 = vrot.lane.b32.xlu0 %v1390_v35, %s3603_s1  ;;  %vm1004_vm7 = vcmp.gt.f32.partialorder %v4562_v34, 0.0  ;;  %vm1007_vm9 = vcmp.gt.f32.partialorder %v4565_v41, 0.0  ;;  %vm1005_vm5 = vcmp.gt.f32.partialorder %v4568_v43, 0.0 }
 0x214   :  { %v3543_v11 = vpop.eup %3542  ;;  %v1420_v53 = vpack.c.bf16 %v1371_v23, %v1367_v17  ;;  %vm1010_vm14 = vcmp.gt.f32.partialorder %v4573_v38, 0.0  ;;  %vm1008_vm15 = vcmp.gt.f32.partialorder %v4578_v46, 0.0  ;;  %vm1011_vm12 = vcmp.gt.f32.partialorder %v4584_v9, 0.0 }
 0x215   :  { %v3545_v61 = vpop.eup %3544  ;;  %v3123_v28 = vadd.f32 -1.0, %v3543_v11  ;;  %1400 = vrot.lane.b32.xlu1 %v1391_v33, %s3603_s1  ;;  %vm1009_vm11 = vcmp.gt.f32.partialorder %v4600_v54, 0.0  ;;  %vm1413_vm13 = vcmask 1047608   ;;  %vm1406_vm8 = vcmask 56320  }
 0x216   :  { %v3547_v16 = vpop.eup %3546  ;;  %v3126_v14 = vadd.f32 -1.0, %v3545_v61  ;;  %vm1415_vm6 = vcmask 515072  }
 0x217   :  { %v3549_v32 = vpop.eup %3548  ;;  %v1324_v2 = vsel %vm1004_vm7, %v4562_v34, %v3123_v28  ;;  %v3124_v57 = vadd.f32 -1.0, %v3547_v16  ;;  %1427 = vrot.lane.b32.xlu0 %v1419_v27, %s3603_s1 }
 0x218   :  { %v3551_v47 = vpop.eup %3550  ;;  %v1327_v39 = vsel %vm1007_vm9, %v4565_v41, %v3126_v14  ;;  %v3129_v62 = vadd.f32 -1.0, %v3549_v32  ;;  %v1372_v15 = vadd.f32 %v4496_v63, %v1324_v2  ;;  %vm5697_vm9 = vcmask 990208  }
 0x219   :  { %v3553_v59 = vpop.eup %3552  ;;  %v1325_v45 = vsel %vm1005_vm5, %v4568_v43, %v3124_v57  ;;  %v3127_v25 = vadd.f32 -1.0, %v3551_v47  ;;  %1429 = vrot.lane.b32.xlu1 %v1420_v53, %s3603_s1  ;;  %v1375_v34 = vadd.f32 %v4505_v30, %v1327_v39  ;;  %v5678_v39 = vmov 0  }
 0x21a   :  { %v1330_v22 = vsel %vm1010_vm14, %v4573_v38, %v3129_v62  ;;  %v3130_v41 = vadd.f32 -1.0, %v3553_v59  ;;  %v1373_v10 = vadd.f32 %v4518_v51, %v1325_v45  ;;  %vm5699_vm14 = vmmov %vm5697_vm9 }
 0x21b   :  { %v1328_v36 = vsel %vm1008_vm15, %v4578_v46, %v3127_v25  ;;  %v1378_v63 = vadd.f32 %v4526_v20, %v1330_v22 }
 0x21c   :  { %v1331_v43 = vsel %vm1011_vm12, %v4584_v9, %v3130_v41  ;;  %v1376_v5 = vadd.f32 %v4539_v18, %v1328_v36  ;;  %v3555_v0 = vpop.eup %3554  ;;  %v4659_v18 = vpop.permute.xlu0 %3346  ;;  %vm5701_vm12 = vmmov %vm5697_vm9 }
 0x21d   :  { %v1421_v21 = vpack.c.bf16 %v1378_v63, %v1374_v26  ;;  %v1379_v30 = vadd.f32 %v4553_v4, %v1331_v43  ;;  %v3128_v38 = vadd.f32 -1.0, %v3555_v0  ;;  %v4661_v4 = vpop.permute.xlu1 %3341 }
 0x21e   :  { %v1392_v56 = vpack.c.bf16 %v1376_v5, %v1372_v15  ;;  %v3343_v5 = vunpack.i.l.bf16 %v4661_v4 }
 0x21f   :  { %v1422_v49 = vpack.c.bf16 %v1379_v30, %v1375_v34  ;;  %v1329_v51 = vsel %vm1009_vm11, %v4600_v54, %v3128_v38  ;;  %vm5702_vm11 = vmmov %vm5697_vm9 }
 0x220   :  { %1402 = vrot.lane.b32.xlu0 %v1392_v56, %s3603_s1  ;;  %v1377_v46 = vadd.f32 %v4557_v24, %v1329_v51  ;;  %v4663_v9 = vpop.permute.xlu0 %3356  ;;  %v3418_v51 = vld [vmem:[%s5641_s2 + $0x4] ss:$16 sps:$4 sm:$0xff]  }
 0x221   :  { %v4665_v6 = vpop.permute.xlu1 %3351  ;;  %2600 = vmatprep.mubr.bf16.mxu0 %v3418_v51  ;;  %2706 = vmatprep.mubr.bf16.mxu1 %v3418_v51 }
 0x222   :  { %v1393_v20 = vpack.c.bf16 %v1377_v46, %v1373_v10 }
 0x224   :  { %1431 = vrot.lane.b32.xlu0 %v1421_v21, %s3603_s1  ;;  %1404 = vrot.lane.b32.xlu1 %v1393_v20, %s3603_s1  ;;  %v4667_v54 = vpop.permute.xlu0 %3366 }
 0x225   :  { %v4669_v58 = vpop.permute.xlu1 %3361 }
 0x228   :  { %1433 = vrot.lane.b32.xlu1 %v1422_v49, %s3603_s1  ;;  %v4671_v24 = vpop.permute.xlu0 %3376 }
 0x229   :  { %v4673_v1 = vpop.permute.xlu1 %3371 }
 0x22c   :  { %v4675_v19 = vpop.permute.xlu0 %3386 }
 0x22d   :  { %5676 = vst [vmem:[#allocation5_spill] sm:$0xff] %v4675_v19  ;;  %v4677_v48 = vpop.permute.xlu1 %3381 }
 0x22e   :  { %5677 = vst [vmem:[#allocation6_spill] sm:$0xff] %v4677_v48 }
 0x285   :  { %v1399_v55 = vpop.permute.xlu0 %1398 }
 0x286   :  { %1414 = vst.msk [vmem:[#allocation3] sm:$0xff] %vm1413_vm13, %v1399_v55 }
 0x287   :  { %v1401_v12 = vpop.permute.xlu1 %1400 }
 0x288   :  { %v1407_v40 = vsel %vm1406_vm8, %v1399_v55, %v1401_v12 }
 0x289   :  { %1416 = vst.msk [vmem:[#allocation3 + $0x8] sm:$0xff] %vm1415_vm6, %v1407_v40  ;;  %v1428_v29 = vpop.permute.xlu0 %1427 }
 0x28a   :  { %1441 = vst.msk [vmem:[#allocation3 + $0x10] sm:$0xff] %vm1413_vm13, %v1428_v29 }
 0x28b   :  { %v1430_v60 = vpop.permute.xlu1 %1429 }
 0x28c   :  { %v1435_v42 = vsel %vm1406_vm8, %v1428_v29, %v1430_v60 }
 0x28d   :  { %1442 = vst.msk [vmem:[#allocation3 + $0x18] sm:$0xff] %vm1415_vm6, %v1435_v42  ;;  %v4685_v13 = vld [vmem:[#allocation3] sm:$0xff] }
 0x28e   :  { %1481 = vrot.lane.b32.xlu0 %v4685_v13, %s3589_s27 }
 0x290   :  { %v4689_v50 = vld [vmem:[#allocation3 + $0x8] sm:$0xff] }
 0x291   :  { %2568 = vmatprep.subr.bf16.mxu0 %v4689_v50  ;;  %v4693_v8 = vld [vmem:[#allocation3 + $0x10] sm:$0xff] }
 0x292   :  { %v1403_v7 = vpop.permute.xlu0 %1402  ;;  %2569 = vmatpush1.bf16.msra.mxu0 %v4685_v13  ;;  %1550 = vrot.lane.b32.xlu0 %v4693_v8, %s3590_s8 }
 0x293   :  { %1417 = vst.msk [vmem:[#allocation3 + $0x28] sm:$0xff] %vm1413_vm13, %v1403_v7  ;;  %1485 = vrot.lane.b32.xlu1 %v4693_v8, %s3589_s27 }
 0x294   :  { %v4700_v37 = vld [vmem:[#allocation3 + $0x18] sm:$0xff] }
 0x295   :  { %2674 = vmatprep.subr.bf16.mxu1 %v4700_v37 }
 0x296   :  { %v1432_v44 = vpop.permute.xlu0 %1431  ;;  %2675 = vmatpush1.bf16.msra.mxu1 %v4693_v8  ;;  %v1405_v3 = vpop.permute.xlu1 %1404  ;;  %1611 = vrot.lane.b32.xlu0 %v4685_v13, %s3591_s9 }
 0x297   :  { %1443 = vst.msk [vmem:[#allocation3 + $0x38] sm:$0xff] %vm1413_vm13, %v1432_v44  ;;  %1546 = vrot.lane.b32.xlu1 %v4685_v13, %s3590_s8  ;;  %v1408_v52 = vsel %vm1406_vm8, %v1403_v7, %v1405_v3  ;;  %vm5703_vm13 = vmmov %vm5697_vm9 }
 0x298   :  { %1418 = vst.msk [vmem:[#allocation3 + $0x30] sm:$0xff] %vm1415_vm6, %v1408_v52 }
 0x29a   :  { %v1434_v31 = vpop.permute.xlu1 %1433  ;;  %1680 = vrot.lane.b32.xlu0 %v4693_v8, %s3592_s0  ;;  %v4724_v23 = vld [vmem:[#allocation3 + $0x28] sm:$0xff] }
 0x29b   :  { %1615 = vrot.lane.b32.xlu1 %v4693_v8, %s3591_s9  ;;  %v1436_v35 = vsel %vm1406_vm8, %v1432_v44, %v1434_v31  ;;  %vm5704_vm8 = vmmov %vm5697_vm9 }
 0x29c   :  { %1444 = vst.msk [vmem:[#allocation3 + $0x40] sm:$0xff] %vm1415_vm6, %v1436_v35  ;;  %vm5705_vm6 = vcmask 982016  }
 0x29e   :  { %1741 = vrot.lane.b32.xlu0 %v4685_v13, %s3593_s10  ;;  %v4734_v33 = vld [vmem:[#allocation3 + $0x38] sm:$0xff] }
 0x29f   :  { %1676 = vrot.lane.b32.xlu1 %v4685_v13, %s3592_s0  ;;  %v4721_v17 = vld [vmem:[#allocation3 + $0x30] sm:$0xff] }
 0x2a0   :  { %2570 = vmatprep.subr.bf16.mxu0 %v4721_v17 }
 0x2a1   :  { %2571 = vmatpush1.bf16.msra.mxu0 %v4724_v23 }
 0x2a2   :  { %1810 = vrot.lane.b32.xlu0 %v4693_v8, %s3594_s11 }
 0x2a3   :  { %1745 = vrot.lane.b32.xlu1 %v4693_v8, %s3593_s10  ;;  %v4731_v26 = vld [vmem:[#allocation3 + $0x40] sm:$0xff] }
 0x2a4   :  { %2676 = vmatprep.subr.bf16.mxu1 %v4731_v26 }
 0x2a5   :  { %2677 = vmatpush1.bf16.msra.mxu1 %v4734_v33 }
 0x2a6   :  { %1871 = vrot.lane.b32.xlu0 %v4685_v13, %s3595_s12 }
 0x2a7   :  { %1806 = vrot.lane.b32.xlu1 %v4685_v13, %s3594_s11 }
 0x2aa   :  { %1940 = vrot.lane.b32.xlu0 %v4693_v8, %s3596_s13 }
 0x2ab   :  { %1875 = vrot.lane.b32.xlu1 %v4693_v8, %s3595_s12 }
 0x2ae   :  { %2001 = vrot.lane.b32.xlu0 %v4685_v13, %s3597_s14 }
 0x2af   :  { %1936 = vrot.lane.b32.xlu1 %v4685_v13, %s3596_s13 }
 0x2b2   :  { %2070 = vrot.lane.b32.xlu0 %v4693_v8, %s3598_s15 }
 0x2b3   :  { %2005 = vrot.lane.b32.xlu1 %v4693_v8, %s3597_s14 }
 0x2b6   :  { %1483 = vrot.lane.b32.xlu0 %v4689_v50, %s3589_s27 }
 0x2b7   :  { %2066 = vrot.lane.b32.xlu1 %v4685_v13, %s3598_s15 }
 0x2ba   :  { %1487 = vrot.lane.b32.xlu0 %v4700_v37, %s3589_s27 }
 0x2bb   :  { %1548 = vrot.lane.b32.xlu1 %v4689_v50, %s3590_s8 }
 0x2be   :  { %1613 = vrot.lane.b32.xlu0 %v4689_v50, %s3591_s9 }
 0x2bf   :  { %1552 = vrot.lane.b32.xlu1 %v4700_v37, %s3590_s8 }
 0x2c2   :  { %1617 = vrot.lane.b32.xlu0 %v4700_v37, %s3591_s9 }
 0x2c3   :  { %1678 = vrot.lane.b32.xlu1 %v4689_v50, %s3592_s0 }
 0x2c6   :  { %1743 = vrot.lane.b32.xlu0 %v4689_v50, %s3593_s10 }
 0x2c7   :  { %1682 = vrot.lane.b32.xlu1 %v4700_v37, %s3592_s0 }
 0x2ca   :  { %1747 = vrot.lane.b32.xlu0 %v4700_v37, %s3593_s10 }
 0x2cb   :  { %1808 = vrot.lane.b32.xlu1 %v4689_v50, %s3594_s11 }
 0x2ce   :  { %1873 = vrot.lane.b32.xlu0 %v4689_v50, %s3595_s12 }
 0x2cf   :  { %1812 = vrot.lane.b32.xlu1 %v4700_v37, %s3594_s11 }
 0x2d2   :  { %1877 = vrot.lane.b32.xlu0 %v4700_v37, %s3595_s12 }
 0x2d3   :  { %1938 = vrot.lane.b32.xlu1 %v4689_v50, %s3596_s13 }
 0x2d6   :  { %2003 = vrot.lane.b32.xlu0 %v4689_v50, %s3597_s14 }
 0x2d7   :  { %1942 = vrot.lane.b32.xlu1 %v4700_v37, %s3596_s13 }
 0x2da   :  { %2007 = vrot.lane.b32.xlu0 %v4700_v37, %s3597_s14 }
 0x2db   :  { %2068 = vrot.lane.b32.xlu1 %v4689_v50, %s3598_s15 }
 0x2de   :  { %2133 = vrot.lane.b32.xlu0 %v4689_v50, %s3599_s16 }
 0x2df   :  { %2072 = vrot.lane.b32.xlu1 %v4700_v37, %s3598_s15 }
 0x2e2   :  { %1495 = vrot.lane.b32.xlu0 %v4734_v33, %s3589_s27 }
 0x2e3   :  { %1560 = vrot.lane.b32.xlu1 %v4734_v33, %s3590_s8 }
 0x2e6   :  { %1491 = vrot.lane.b32.xlu0 %v4724_v23, %s3589_s27 }
 0x2e7   :  { %1556 = vrot.lane.b32.xlu1 %v4724_v23, %s3590_s8 }
 0x2ea   :  { %1625 = vrot.lane.b32.xlu0 %v4734_v33, %s3591_s9 }
 0x2eb   :  { %1690 = vrot.lane.b32.xlu1 %v4734_v33, %s3592_s0 }
 0x2ee   :  { %1621 = vrot.lane.b32.xlu0 %v4724_v23, %s3591_s9 }
 0x2ef   :  { %1686 = vrot.lane.b32.xlu1 %v4724_v23, %s3592_s0 }
 0x2f2   :  { %1755 = vrot.lane.b32.xlu0 %v4734_v33, %s3593_s10 }
 0x2f3   :  { %1820 = vrot.lane.b32.xlu1 %v4734_v33, %s3594_s11 }
 0x2f6   :  { %1751 = vrot.lane.b32.xlu0 %v4724_v23, %s3593_s10 }
 0x2f7   :  { %1816 = vrot.lane.b32.xlu1 %v4724_v23, %s3594_s11 }
 0x2fa   :  { %1885 = vrot.lane.b32.xlu0 %v4734_v33, %s3595_s12 }
 0x2fb   :  { %1950 = vrot.lane.b32.xlu1 %v4734_v33, %s3596_s13 }
 0x2fe   :  { %1881 = vrot.lane.b32.xlu0 %v4724_v23, %s3595_s12 }
 0x2ff   :  { %1946 = vrot.lane.b32.xlu1 %v4724_v23, %s3596_s13 }
 0x300   :  { %v1482_v27 = vpop.permute.xlu0 %1481 }
 0x302   :  { %2015 = vrot.lane.b32.xlu0 %v4734_v33, %s3597_s14 }
 0x303   :  { %2080 = vrot.lane.b32.xlu1 %v4734_v33, %s3598_s15 }
 0x304   :  { %v4833_v53 = vpop.permute.xlu0 %1550 }
 0x305   :  { %v1486_v11 = vpop.permute.xlu1 %1485 }
 0x306   :  { %2011 = vrot.lane.b32.xlu0 %v4724_v23, %s3597_s14 }
 0x307   :  { %2076 = vrot.lane.b32.xlu1 %v4724_v23, %s3598_s15 }
 0x308   :  { %v4841_v28 = vpop.permute.xlu0 %1611 }
 0x309   :  { %v4839_v61 = vpop.permute.xlu1 %1546 }
 0x30a   :  { %2137 = vrot.lane.b32.xlu0 %v4700_v37, %s3599_s16 }
 0x30b   :  { %1493 = vrot.lane.b32.xlu1 %v4721_v17, %s3589_s27 }
 0x30c   :  { %v4849_v14 = vpop.permute.xlu0 %1680 }
 0x30d   :  { %v4847_v16 = vpop.permute.xlu1 %1615 }
 0x30e   :  { %1558 = vrot.lane.b32.xlu0 %v4721_v17, %s3590_s8 }
 0x30f   :  { %1497 = vrot.lane.b32.xlu1 %v4731_v26, %s3589_s27 }
 0x310   :  { %v4857_v2 = vpop.permute.xlu0 %1741 }
 0x311   :  { %v4855_v32 = vpop.permute.xlu1 %1676 }
 0x312   :  { %1562 = vrot.lane.b32.xlu0 %v4731_v26, %s3590_s8 }
 0x313   :  { %2135 = vrot.lane.b32.xlu1 %v4693_v8, %s3599_s16 }
 0x314   :  { %v4865_v47 = vpop.permute.xlu0 %1810 }
 0x315   :  { %v4863_v57 = vpop.permute.xlu1 %1745 }
 0x316   :  { %2131 = vrot.lane.b32.xlu0 %v4685_v13, %s3599_s16 }
 0x317   :  { %3391 = vrot.lane.b32.xlu1 %v5678_v39, %s3599_s16 }
 0x318   :  { %v4873_v15 = vpop.permute.xlu0 %1871 }
 0x319   :  { %v4871_v62 = vpop.permute.xlu1 %1806 }
 0x31a   :  { %2145 = vrot.lane.b32.xlu0 %v4734_v33, %s3599_s16 }
 0x31b   :  { %1623 = vrot.lane.b32.xlu1 %v4721_v17, %s3591_s9 }
 0x31c   :  { %v4881_v45 = vpop.permute.xlu0 %1940 }
 0x31d   :  { %v4879_v59 = vpop.permute.xlu1 %1875 }
 0x31e   :  { %1688 = vrot.lane.b32.xlu0 %v4721_v17, %s3592_s0 }
 0x31f   :  { %1627 = vrot.lane.b32.xlu1 %v4731_v26, %s3591_s9  ;;  %s3604_s9 = smov 114  }
 0x320   :  { %v4889_v34 = vpop.permute.xlu0 %2001 }
 0x321   :  { %v4887_v25 = vpop.permute.xlu1 %1936  ;;  %5679 = vst [vmem:[#allocation7_spill] sm:$0xff] %v4889_v34  ;;  %v2499_v34 = vld [vmem:[%s5640_s4] sm:$0xff] }
 0x322   :  { %1692 = vrot.lane.b32.xlu0 %v4731_v26, %s3592_s0 }
 0x323   :  { %2198 = vrot.lane.b32.xlu1 %v4689_v50, %s3600_s17 }
 0x324   :  { %v4897_v41 = vpop.permute.xlu0 %2070 }
 0x325   :  { %v4895_v22 = vpop.permute.xlu1 %2005  ;;  %5681 = vst [vmem:[#allocation9_spill] sm:$0xff] %v4897_v41 }
 0x326   :  { %5680 = vst [vmem:[#allocation8_spill] sm:$0xff] %v4895_v22  ;;  %2141 = vrot.lane.b32.xlu0 %v4724_v23, %s3599_s16  ;;  %v3344_v22 = vunpack.i.h.bf16 %v4661_v4 }
 0x327   :  { %2202 = vrot.lane.b32.xlu1 %v4700_v37, %s3600_s17 }
 0x328   :  { %v1484_v36 = vpop.permute.xlu0 %1483 }
 0x329   :  { %v4903_v10 = vpop.permute.xlu1 %2066  ;;  %v1503_v63 = vsel %vm52_vm0, %v1484_v36, %v1486_v11  ;;  %v1502_v43 = vsel %vm52_vm0, %v1482_v27, %v1484_v36 }
 0x32a   :  { %5682 = vst [vmem:[#allocation10_spill] sm:$0xff] %v4903_v10  ;;  %2200 = vrot.lane.b32.xlu0 %v4693_v8, %s3600_s17  ;;  %2572 = vmatprep.subr.bf16.mxu0 %v1503_v63 }
 0x32b   :  { %1753 = vrot.lane.b32.xlu1 %v4721_v17, %s3593_s10  ;;  %2573 = vmatpush1.bf16.msra.mxu0 %v1502_v43 }
 0x32c   :  { %v1488_v21 = vpop.permute.xlu0 %1487 }
 0x32d   :  { %v4912_v0 = vpop.permute.xlu1 %1548  ;;  %v1505_v30 = vsel %vm52_vm0, %v1488_v21, %v3343_v5  ;;  %v1504_v38 = vsel %vm52_vm0, %v1486_v11, %v1488_v21 }
 0x32e   :  { %1818 = vrot.lane.b32.xlu0 %v4721_v17, %s3594_s11  ;;  %2678 = vmatprep.subr.bf16.mxu1 %v1505_v30 }
 0x32f   :  { %1757 = vrot.lane.b32.xlu1 %v4731_v26, %s3593_s10  ;;  %2679 = vmatpush1.bf16.msra.mxu1 %v1504_v38 }
 0x330   :  { %v4922_v49 = vpop.permute.xlu0 %1613 }
 0x331   :  { %v4920_v56 = vpop.permute.xlu1 %1552 }
 0x332   :  { %1822 = vrot.lane.b32.xlu0 %v4731_v26, %s3594_s11 }
 0x333   :  { %2196 = vrot.lane.b32.xlu1 %v4685_v13, %s3600_s17 }
 0x334   :  { %v4933_v20 = vpop.permute.xlu0 %1617 }
 0x335   :  { %v4931_v46 = vpop.permute.xlu1 %1678 }
 0x336   :  { %3396 = vrot.lane.b32.xlu0 %v5678_v39, %s3600_s17 }
 0x337   :  { %2210 = vrot.lane.b32.xlu1 %v4734_v33, %s3600_s17 }
 0x338   :  { %v4941_v12 = vpop.permute.xlu0 %1743 }
 0x339   :  { %v4939_v55 = vpop.permute.xlu1 %1682 }
 0x33a   :  { %2263 = vrot.lane.b32.xlu0 %v4689_v50, %s3601_s18 }
 0x33b   :  { %1883 = vrot.lane.b32.xlu1 %v4721_v17, %s3595_s12 }
 0x33c   :  { %v4949_v29 = vpop.permute.xlu0 %1747 }
 0x33d   :  { %v4947_v40 = vpop.permute.xlu1 %1808 }
 0x33e   :  { %1948 = vrot.lane.b32.xlu0 %v4721_v17, %s3596_s13 }
 0x33f   :  { %1887 = vrot.lane.b32.xlu1 %v4731_v26, %s3595_s12 }
 0x340   :  { %v4957_v42 = vpop.permute.xlu0 %1873 }
 0x341   :  { %v4955_v60 = vpop.permute.xlu1 %1812 }
 0x342   :  { %1952 = vrot.lane.b32.xlu0 %v4731_v26, %s3596_s13 }
 0x343   :  { %2206 = vrot.lane.b32.xlu1 %v4724_v23, %s3600_s17 }
 0x344   :  { %v4965_v44 = vpop.permute.xlu0 %1877 }
 0x345   :  { %v4963_v7 = vpop.permute.xlu1 %1938 }
 0x346   :  { %2267 = vrot.lane.b32.xlu0 %v4700_v37, %s3601_s18 }
 0x347   :  { %2265 = vrot.lane.b32.xlu1 %v4693_v8, %s3601_s18 }
 0x348   :  { %v4973_v52 = vpop.permute.xlu0 %2003 }
 0x349   :  { %v4971_v3 = vpop.permute.xlu1 %1942  ;;  %5683 = vst [vmem:[#allocation11_spill] sm:$0xff] %v4973_v52 }
 0x34a   :  { %2261 = vrot.lane.b32.xlu0 %v4685_v13, %s3601_s18 }
 0x34b   :  { %2013 = vrot.lane.b32.xlu1 %v4721_v17, %s3597_s14 }
 0x34c   :  { %v4981_v35 = vpop.permute.xlu0 %2007 }
 0x34d   :  { %v4979_v31 = vpop.permute.xlu1 %2068  ;;  %5685 = vst [vmem:[#allocation13_spill] sm:$0xff] %v4981_v35 }
 0x34e   :  { %5684 = vst [vmem:[#allocation12_spill] sm:$0xff] %v4979_v31  ;;  %2078 = vrot.lane.b32.xlu0 %v4721_v17, %s3598_s15 }
 0x34f   :  { %2017 = vrot.lane.b32.xlu1 %v4731_v26, %s3597_s14 }
 0x350   :  { %v4989_v11 = vpop.permute.xlu0 %2133 }
 0x351   :  { %v4987_v27 = vpop.permute.xlu1 %2072 }
 0x352   :  { %5686 = vst [vmem:[#allocation14_spill] sm:$0xff] %v4987_v27  ;;  %2082 = vrot.lane.b32.xlu0 %v4731_v26, %s3598_s15 }
 0x353   :  { %3401 = vrot.lane.b32.xlu1 %v5678_v39, %s3601_s18 }
 0x354   :  { %v4997_v63 = vpop.permute.xlu0 %1495 }
 0x355   :  { %v4995_v36 = vpop.permute.xlu1 %1560 }
 0x356   :  { %2275 = vrot.lane.b32.xlu0 %v4734_v33, %s3601_s18 }
 0x357   :  { %2328 = vrot.lane.b32.xlu1 %v4689_v50, %s3604_s9 }
 0x358   :  { %v1492_v5 = vpop.permute.xlu0 %1491 }
 0x359   :  { %v5003_v43 = vpop.permute.xlu1 %1556 }
 0x35a   :  { %2271 = vrot.lane.b32.xlu0 %v4724_v23, %s3601_s18 }
 0x35b   :  { %2143 = vrot.lane.b32.xlu1 %v4721_v17, %s3599_s16 }
 0x35c   :  { %v5011_v21 = vpop.permute.xlu0 %1625 }
 0x35d   :  { %v5009_v39 = vpop.permute.xlu1 %1690 }
 0x35e   :  { %2208 = vrot.lane.b32.xlu0 %v4721_v17, %s3600_s17 }
 0x35f   :  { %2147 = vrot.lane.b32.xlu1 %v4731_v26, %s3599_s16 }
 0x360   :  { %v5019_v30 = vpop.permute.xlu0 %1621 }
 0x361   :  { %v5017_v50 = vpop.permute.xlu1 %1686 }
 0x362   :  { %2212 = vrot.lane.b32.xlu0 %v4731_v26, %s3600_s17 }
 0x363   :  { %2332 = vrot.lane.b32.xlu1 %v4700_v37, %s3604_s9  ;;  %v3588_v37 = vld [vmem:[#allocation3 + $0x20] sm:$0xff] }
 0x364   :  { %v5027_v51 = vpop.permute.xlu0 %1755 }
 0x365   :  { %v5025_v38 = vpop.permute.xlu1 %1820 }
 0x366   :  { %2330 = vrot.lane.b32.xlu0 %v4693_v8, %s3604_s9 }
 0x367   :  { %2326 = vrot.lane.b32.xlu1 %v4685_v13, %s3604_s9 }
 0x368   :  { %v5035_v10 = vpop.permute.xlu0 %1751 }
 0x369   :  { %v5033_v27 = vpop.permute.xlu1 %1816 }
 0x36a   :  { %2334 = vrot.lane.b32.xlu0 %v3588_v37, %s3604_s9 }
 0x36b   :  { %2273 = vrot.lane.b32.xlu1 %v4721_v17, %s3601_s18 }
 0x36c   :  { %v5042_v31 = vpop.permute.xlu0 %1885 }
 0x36d   :  { %v5040_v19 = vpop.permute.xlu1 %1950 }
 0x36e   :  { %2338 = vrot.lane.b32.xlu0 %v4721_v17, %s3604_s9  ;;  %v3605_v17 = vmov 1  }
 0x36f   :  { %2277 = vrot.lane.b32.xlu1 %v4731_v26, %s3601_s18  ;;  %3406 = vset.pattern.permute.xlu0 %v3605_v17 }
 0x370   :  { %v5050_v8 = vpop.permute.xlu0 %1881  ;;  %3405 = vset.pattern.permute.xlu1 %v3605_v17 }
 0x371   :  { %v5048_v13 = vpop.permute.xlu1 %1946 }
 0x372   :  { %2342 = vrot.lane.b32.xlu0 %v4731_v26, %s3604_s9  ;;  %v2500_v26 = vld [vmem:[%s5640_s4 + $0x8] sm:$0xff] }
 0x373   :  { %2340 = vrot.lane.b32.xlu1 %v4734_v33, %s3604_s9 }
 0x374   :  { %v5058_v35 = vpop.permute.xlu0 %2015 }
 0x375   :  { %v5056_v41 = vpop.permute.xlu1 %2080  ;;  %5688 = vst [vmem:[#allocation16_spill] sm:$0xff] %v5058_v35 }
 0x376   :  { %5687 = vst [vmem:[#allocation15_spill] sm:$0xff] %v5056_v41  ;;  %2336 = vrot.lane.b32.xlu0 %v4724_v23, %s3604_s9  ;;  %v2501_v23 = vld [vmem:[%s5640_s4 + $0x10] sm:$0xff] }
 0x377   :  { %2344 = vrot.lane.b32.xlu1 %v3588_v37, %s3604_s9 }
 0x378   :  { %v5071_v41 = vpop.permute.xlu0 %2011 }
 0x379   :  { %v5069_v33 = vpop.permute.xlu1 %2076  ;;  %5690 = vst [vmem:[#allocation18_spill] sm:$0xff] %v5071_v41  ;;  %v3348_v41 = vunpack.i.l.bf16 %v4659_v18 }
 0x37a   :  { %5689 = vst [vmem:[#allocation17_spill] sm:$0xff] %v5069_v33  ;;  %2510 = vperm.xlu0 %3406, %v2500_v26   ;;  %v2502_v26 = vld [vmem:[%s5640_s4 + $0x18] sm:$0xff] }
 0x37b   :  { %2505 = vperm.xlu1 %3405, %v2499_v34   ;;  %v1568_v34 = vsel %vm85_vm1, %v4912_v0, %v4833_v53 }
 0x37c   :  { %v2138_v48 = vpop.permute.xlu0 %2137 }
 0x37d   :  { %v1494_v35 = vpop.permute.xlu1 %1493 }
 0x37e   :  { %v1506_v52 = vsel %vm52_vm0, %v1492_v5, %v1494_v35  ;;  %v1507_v17 = vsel %vm52_vm0, %v1494_v35, %v4997_v63  ;;  %3407 = vset.pattern.permute.xlu0 %v3588_v37 }
 0x37f   :  { %2574 = vmatprep.subr.bf16.mxu0 %v1507_v17  ;;  %2515 = vperm.xlu1 %3405, %v2501_v23   ;;  %v1570_v23 = vsel %vm85_vm1, %v4920_v56, %v3348_v41  ;;  %v1569_v41 = vsel %vm85_vm1, %v4833_v53, %v4920_v56 }
 0x380   :  { %2575 = vmatpush1.bf16.msra.mxu0 %v1506_v52  ;;  %v1559_v5 = vpop.permute.xlu0 %1558  ;;  %v1567_v52 = vsel %vm85_vm1, %v4839_v61, %v4912_v0 }
 0x381   :  { %v1498_v33 = vpop.permute.xlu1 %1497  ;;  %2576 = vmatprep.subr.bf16.mxu0 %v1568_v34  ;;  %v1572_v37 = vsel %vm85_vm1, %v1559_v5, %v4995_v36  ;;  %v1571_v0 = vsel %vm85_vm1, %v5003_v43, %v1559_v5  ;;  %v1632_v5 = vsel %vm118_vm2, %v4841_v28, %v4922_v49  ;;  %v1634_v28 = vsel %vm118_vm2, %v4847_v16, %v4933_v20 }
 0x382   :  { %v1508_v35 = vsel %vm52_vm0, %v4997_v63, %v1498_v33  ;;  %v1509_v4 = vsel %vm52_vm0, %v1498_v33, %v3344_v22  ;;  %v3349_v22 = vunpack.i.h.bf16 %v4659_v18  ;;  %v1633_v18 = vsel %vm118_vm2, %v4922_v49, %v4847_v16 }
 0x383   :  { %2680 = vmatprep.subr.bf16.mxu1 %v1509_v4  ;;  %2520 = vperm.xlu1 %3405, %v2502_v26   ;;  %v3353_v4 = vunpack.i.l.bf16 %v4665_v6  ;;  %v3354_v49 = vunpack.i.h.bf16 %v4665_v6  ;;  %v1697_v6 = vsel %vm151_vm3, %v4855_v32, %v4931_v46  ;;  %vm5691_vm0 = vcmask 998400  }
 0x384   :  { %2577 = vmatpush1.bf16.msra.mxu0 %v1567_v52  ;;  %2681 = vmatpush1.bf16.msra.mxu1 %v1508_v35  ;;  %v1563_v63 = vpop.permute.xlu0 %1562  ;;  %vm5696_vm7 = vmmov %vm5691_vm0 }
 0x385   :  { %v2136_v17 = vpop.permute.xlu1 %2135  ;;  %2578 = vmatprep.subr.bf16.mxu0 %v1572_v37  ;;  %2682 = vmatprep.subr.bf16.mxu1 %v1570_v23  ;;  %v1574_v34 = vsel %vm85_vm1, %v1563_v63, %v3349_v22  ;;  %v1573_v56 = vsel %vm85_vm1, %v4995_v36, %v1563_v63  ;;  %v1635_v52 = vsel %vm118_vm2, %v4933_v20, %v3353_v4  ;;  %vm5692_vm1 = vmmov %vm5691_vm0 }
 0x386   :  { %v5099_v33 = vsel %vm382_vm10, %v2136_v17, %v2138_v48  ;;  %v5103_v61 = vsel %vm382_vm10, %v4989_v11, %v2136_v17  ;;  %vm5698_vm5 = vmmov %vm5691_vm0 }
 0x387   :  { %vm5700_vm15 = vmmov %vm5691_vm0 }
 0x388   :  { %2579 = vmatpush1.bf16.msra.mxu0 %v1571_v0  ;;  %2683 = vmatpush1.bf16.msra.mxu1 %v1569_v41  ;;  %v2132_v35 = vpop.permute.xlu0 %2131 }
 0x389   :  { %v5114_v26 = vpop.permute.xlu1 %3391  ;;  %2580 = vmatprep.subr.bf16.mxu0 %v1633_v18  ;;  %2684 = vmatprep.subr.bf16.mxu1 %v1574_v34  ;;  %v5120_v53 = vsel %vm382_vm10, %v2132_v35, %v4989_v11  ;;  %v3359_v34 = vunpack.i.h.bf16 %v4663_v9  ;;  %v1699_v35 = vsel %vm151_vm3, %v4849_v14, %v4939_v55 }
 0x38a   :  { %v3393_v43 = vunpack.i.l.bf16 %v5114_v26 }
 0x38c   :  { %2581 = vmatpush1.bf16.msra.mxu0 %v1632_v5  ;;  %2685 = vmatpush1.bf16.msra.mxu1 %v1573_v56  ;;  %v5130_v37 = vsel %vm382_vm10, %v2138_v48, %v3393_v43  ;;  %v5132_v17 = vpop.permute.xlu0 %2145  ;;  %v1698_v48 = vsel %vm151_vm3, %v4931_v46, %v4849_v14  ;;  %v1763_v46 = vsel %vm184_vm4, %v4941_v12, %v4863_v57  ;;  %v3363_v56 = vunpack.i.l.bf16 %v4669_v58 }
 0x38d   :  { %v1624_v23 = vpop.permute.xlu1 %1623  ;;  %2686 = vmatprep.subr.bf16.mxu1 %v1635_v52  ;;  %v1762_v14 = vsel %vm184_vm4, %v4857_v2, %v4941_v12  ;;  %v1764_v2 = vsel %vm184_vm4, %v4863_v57, %v4949_v29  ;;  %v3364_v12 = vunpack.i.h.bf16 %v4669_v58  ;;  %v1827_v58 = vsel %vm5692_vm1, %v4871_v62, %v4947_v40 }
 0x38e   :  { %v1636_v11 = vsel %vm118_vm2, %v5019_v30, %v1624_v23  ;;  %v1637_v36 = vsel %vm118_vm2, %v1624_v23, %v5011_v21  ;;  %v3358_v30 = vunpack.i.l.bf16 %v4663_v9 }
 0x38f   :  { %2582 = vmatprep.subr.bf16.mxu0 %v1637_v36 }
 0x390   :  { %2583 = vmatpush1.bf16.msra.mxu0 %v1636_v11  ;;  %2687 = vmatpush1.bf16.msra.mxu1 %v1634_v28  ;;  %v1689_v22 = vpop.permute.xlu0 %1688  ;;  %v1700_v20 = vsel %vm151_vm3, %v4939_v55, %v3358_v30  ;;  %v1893_v30 = vsel %vm5697_vm9, %v4957_v42, %v4879_v59 }
 0x391   :  { %v1628_v63 = vpop.permute.xlu1 %1627  ;;  %2584 = vmatprep.subr.bf16.mxu0 %v1698_v48  ;;  %v1702_v16 = vsel %vm151_vm3, %v1689_v22, %v5009_v39  ;;  %v1701_v32 = vsel %vm151_vm3, %v5017_v50, %v1689_v22  ;;  %v1765_v50 = vsel %vm184_vm4, %v4949_v29, %v3363_v56  ;;  %v3369_v22 = vunpack.i.h.bf16 %v4667_v54 }
 0x392   :  { %v1638_v0 = vsel %vm118_vm2, %v5011_v21, %v1628_v63  ;;  %v1639_v41 = vsel %vm118_vm2, %v1628_v63, %v3354_v49  ;;  %vm5693_vm2 = vmmov %vm5691_vm0 }
 0x393   :  { %2688 = vmatprep.subr.bf16.mxu1 %v1639_v41 }
 0x394   :  { %2585 = vmatpush1.bf16.msra.mxu0 %v1697_v6  ;;  %2689 = vmatpush1.bf16.msra.mxu1 %v1638_v0  ;;  %v1693_v21 = vpop.permute.xlu0 %1692  ;;  %v3373_v6 = vunpack.i.l.bf16 %v4673_v1 }
 0x395   :  { %v5156_v18 = vpop.permute.xlu1 %2198  ;;  %2586 = vmatprep.subr.bf16.mxu0 %v1702_v16  ;;  %2690 = vmatprep.subr.bf16.mxu1 %v1700_v20  ;;  %v1704_v4 = vsel %vm151_vm3, %v1693_v21, %v3359_v34  ;;  %v1703_v55 = vsel %vm151_vm3, %v5009_v39, %v1693_v21  ;;  %v1828_v39 = vsel %vm5691_vm0, %v4947_v40, %v4865_v47  ;;  %vm5694_vm3 = vmmov %vm5691_vm0 }
 0x398   :  { %2587 = vmatpush1.bf16.msra.mxu0 %v1701_v32  ;;  %2691 = vmatpush1.bf16.msra.mxu1 %v1699_v35  ;;  %v5170_v9 = vpop.permute.xlu0 %2141 }
 0x399   :  { %v5168_v43 = vpop.permute.xlu1 %2202  ;;  %2588 = vmatprep.subr.bf16.mxu0 %v1763_v46  ;;  %2692 = vmatprep.subr.bf16.mxu1 %v1704_v4  ;;  %v3378_v46 = vunpack.i.l.bf16 %v4671_v24 }
 0x39c   :  { %2589 = vmatpush1.bf16.msra.mxu0 %v1762_v14  ;;  %2693 = vmatpush1.bf16.msra.mxu1 %v1703_v55  ;;  %v5180_v52 = vpop.permute.xlu0 %2200 }
 0x39d   :  { %v1754_v5 = vpop.permute.xlu1 %1753  ;;  %2694 = vmatprep.subr.bf16.mxu1 %v1765_v50  ;;  %v3379_v50 = vunpack.i.h.bf16 %v4671_v24 }
 0x39e   :  { %v1766_v23 = vsel %vm184_vm4, %v5035_v10, %v1754_v5  ;;  %v1767_v11 = vsel %vm184_vm4, %v1754_v5, %v5027_v51  ;;  %v3368_v10 = vunpack.i.l.bf16 %v4667_v54  ;;  %v3421_v5 = vld [vmem:[%s5641_s2 + $0x20] ss:$16 sps:$4 sm:$0xff]  }
 0x39f   :  { %2590 = vmatprep.subr.bf16.mxu0 %v1767_v11  ;;  %v5714_v11 = vld [vmem:[#allocation11_spill] sm:$0xff] }
 0x3a0   :  { %2591 = vmatpush1.bf16.msra.mxu0 %v1766_v23  ;;  %2695 = vmatpush1.bf16.msra.mxu1 %v1764_v2  ;;  %v1819_v28 = vpop.permute.xlu0 %1818  ;;  %v1830_v29 = vsel %vm5694_vm3, %v4955_v60, %v3368_v10  ;;  %v5713_v23 = vld [vmem:[#allocation8_spill] sm:$0xff] }
 0x3a1   :  { %v1758_v36 = vpop.permute.xlu1 %1757  ;;  %2592 = vmatprep.subr.bf16.mxu0 %v1828_v39  ;;  %v1832_v57 = vsel %vm5693_vm2, %v1819_v28, %v5025_v38  ;;  %v1831_v40 = vsel %vm5696_vm7, %v5033_v27, %v1819_v28  ;;  %v1895_v27 = vsel %vm5701_vm12, %v4965_v44, %v3373_v6  ;;  %vm5708_vm2 = vmmov %vm5705_vm6 }
 0x3a2   :  { %v1768_v49 = vsel %vm184_vm4, %v5027_v51, %v1758_v36  ;;  %v1769_v48 = vsel %vm184_vm4, %v1758_v36, %v3364_v12  ;;  %vm5695_vm4 = vmmov %vm5691_vm0  ;;  %v1957_v4 = vsel %vm5708_vm2, %v4887_v25, %v4963_v7  ;;  %v5718_v36 = vld [vmem:[#allocation7_spill] sm:$0xff] }
 0x3a3   :  { %2696 = vmatprep.subr.bf16.mxu1 %v1769_v48  ;;  %v1829_v62 = vsel %vm5695_vm4, %v4865_v47, %v4955_v60  ;;  %v1892_v47 = vsel %vm5699_vm14, %v4873_v15, %v4957_v42  ;;  %v1894_v15 = vsel %vm5704_vm8, %v4879_v59, %v4965_v44  ;;  %v3416_v42 = vld [vmem:[%s5641_s2] ss:$16 sps:$4 sm:$0xff]   ;;  %vm5706_vm0 = vmmov %vm5704_vm8 }
 0x3a4   :  { %2593 = vmatpush1.bf16.msra.mxu0 %v1827_v58  ;;  %2697 = vmatpush1.bf16.msra.mxu1 %v1768_v49  ;;  %v1823_v51 = vpop.permute.xlu0 %1822  ;;  %vm5707_vm1 = vmmov %vm5706_vm0  ;;  %v5721_v49 = vld [vmem:[#allocation13_spill] sm:$0xff] }
 0x3a5   :  { %v5204_v63 = vpop.permute.xlu1 %2196  ;;  %2594 = vmatprep.subr.bf16.mxu0 %v1832_v57  ;;  %2698 = vmatprep.subr.bf16.mxu1 %v1830_v29  ;;  %v1834_v0 = vsel %vm5698_vm5, %v1823_v51, %v3369_v22  ;;  %v1833_v60 = vsel %vm5700_vm15, %v5025_v38, %v1823_v51  ;;  %v3374_v38 = vunpack.i.h.bf16 %v4673_v1  ;;  %v3419_v1 = vld [vmem:[%s5641_s2 + $0x24] ss:$16 sps:$4 sm:$0xff]   ;;  %vm5709_vm3 = vmmov %vm5708_vm2  ;;  %vm5715_vm5 = vcmask 973824   ;;  %v5723_v29 = vld [vmem:[#allocation18_spill] sm:$0xff] }
 0x3a6   :  { %vm5710_vm4 = vmmov %vm5708_vm2  ;;  %v2023_v2 = vsel %vm5715_vm5, %v5714_v11, %v5713_v23  ;;  %vm2561_vm15 = vcmask 785408   ;;  %v5725_v22 = vld [vmem:[#allocation16_spill] sm:$0xff] }
 0x3a7   :  { %vm5711_vm7 = vmmov %vm5708_vm2 }
 0x3a8   :  { %2595 = vmatpush1.bf16.msra.mxu0 %v1831_v40  ;;  %2699 = vmatpush1.bf16.msra.mxu1 %v1829_v62  ;;  %v5218_v54 = vpop.permute.xlu0 %3396  ;;  %v1959_v25 = vsel %vm5711_vm7, %v4881_v45, %v4971_v3  ;;  %vm5712_vm9 = vmmov %vm5708_vm2 }
 0x3a9   :  { %v5216_v41 = vpop.permute.xlu1 %2210  ;;  %2596 = vmatprep.subr.bf16.mxu0 %v1893_v30  ;;  %2700 = vmatprep.subr.bf16.mxu1 %v1834_v0  ;;  %vm5716_vm14 = vmmov %vm5708_vm2  ;;  %v5728_v30 = vld [vmem:[#allocation9_spill] sm:$0xff]  ;;  %v5729_v0 = vld [vmem:[#allocation12_spill] sm:$0xff] }
 0x3aa   :  { %vm5719_vm12 = vmmov %vm5715_vm5 }
 0x3ab   :  { %v2022_v28 = vsel %vm5719_vm12, %v5718_v36, %v5714_v11  ;;  %vm5724_vm8 = vmmov %vm5715_vm5 }
 0x3ac   :  { %2597 = vmatpush1.bf16.msra.mxu0 %v1892_v47  ;;  %2701 = vmatpush1.bf16.msra.mxu1 %v1833_v60  ;;  %v5228_v20 = vpop.permute.xlu0 %2263 }
 0x3ad   :  { %v1884_v16 = vpop.permute.xlu1 %1883  ;;  %2702 = vmatprep.subr.bf16.mxu1 %v1895_v27  ;;  %v5731_v27 = vld [vmem:[#allocation5_spill] sm:$0xff] }
 0x3ae   :  { %v1896_v21 = vsel %vm5702_vm11, %v5050_v8, %v1884_v16  ;;  %v1897_v34 = vsel %vm5703_vm13, %v1884_v16, %v5042_v31  ;;  %v1958_v8 = vsel %vm5705_vm6, %v4963_v7, %v4881_v45  ;;  %vm5720_vm11 = vmmov %vm5708_vm2  ;;  %v3388_v16 = vunpack.i.l.bf16 %v5731_v27 }
 0x3af   :  { %2598 = vmatprep.subr.bf16.mxu0 %v1897_v34  ;;  %vm5722_vm13 = vmmov %vm5715_vm5 }
 0x3b0   :  { %2599 = vmatpush1.bf16.msra.mxu0 %v1896_v21  ;;  %2703 = vmatpush1.bf16.msra.mxu1 %v1894_v15  ;;  %v1949_v32 = vpop.permute.xlu0 %1948  ;;  %vm5726_vm6 = vmmov %vm5715_vm5  ;;  %v5734_v15 = vld [vmem:[#allocation10_spill] sm:$0xff] }
 0x3b1   :  { %v1888_v35 = vpop.permute.xlu1 %1887  ;;  %2621 = vmatprep.subr.bf16.mxu0 %v1958_v8  ;;  %v1962_v56 = vsel %vm5709_vm3, %v1949_v32, %v5040_v19  ;;  %v1961_v7 = vsel %vm5712_vm9, %v5048_v13, %v1949_v32  ;;  %v5717_v13 = vld [vmem:[#allocation6_spill] sm:$0xff] }
 0x3b2   :  { %v1898_v59 = vsel %vm5706_vm0, %v5042_v31, %v1888_v35  ;;  %v1899_v44 = vsel %vm5707_vm1, %v1888_v35, %v3374_v38  ;;  %v1960_v31 = vsel %vm5710_vm4, %v4971_v3, %v3378_v46  ;;  %v3424_v3 = vld [vmem:[%s5641_s2 + $0xc] ss:$16 sps:$4 sm:$0xff]   ;;  %v3383_v39 = vunpack.i.l.bf16 %v5717_v13  ;;  %vm5727_vm0 = vmmov %vm5715_vm5  ;;  %v5736_v38 = vld [vmem:[#allocation15_spill] sm:$0xff] }
 0x3b3   :  { %2704 = vmatprep.subr.bf16.mxu1 %v1899_v44  ;;  %2601 = vmatmul.mubr.bf16.vlgmr.msra.gmra.mrb[32].mxu0 %v3416_v42  ;;  %v3384_v40 = vunpack.i.h.bf16 %v5717_v13  ;;  %vm5730_vm1 = vcmask 965632   ;;  %vm5732_vm2 = vmmov %vm5727_vm0  ;;  %v5738_v35 = vld [vmem:[#allocation14_spill] sm:$0xff]  ;;  %v3389_v44 = vunpack.i.h.bf16 %v5731_v27 }
 0x3b4   :  { %2622 = vmatpush1.bf16.msra.mxu0 %v1957_v4  ;;  %2705 = vmatpush1.bf16.msra.mxu1 %v1898_v59  ;;  %v1953_v55 = vpop.permute.xlu0 %1952  ;;  %v2025_v48 = vsel %vm5722_vm13, %v5721_v49, %v3383_v39  ;;  %v2088_v6 = vsel %vm5730_vm1, %v5729_v0, %v5728_v30  ;;  %vm5733_vm3 = vmmov %vm5727_vm0  ;;  %v5741_v4 = vld [vmem:[#allocation17_spill] sm:$0xff]  ;;  %vm5745_vm13 = vcmask 949248  }
 0x3b5   :  { %v5258_v14 = vpop.permute.xlu1 %2206  ;;  %2623 = vmatprep.subr.bf16.mxu0 %v1962_v56  ;;  %2727 = vmatprep.subr.bf16.mxu1 %v1960_v31  ;;  %v1964_v24 = vsel %vm5716_vm14, %v1953_v55, %v3379_v50  ;;  %v1963_v10 = vsel %vm5720_vm11, %v5040_v19, %v1953_v55  ;;  %v2024_v19 = vsel %vm5727_vm0, %v5713_v23, %v5721_v49  ;;  %vm5735_vm4 = vmmov %vm5730_vm1 }
 0x3b6   :  { %2610 = vmatprep.mubr.bf16.mxu0 %v3419_v1  ;;  %vm5737_vm7 = vmmov %vm5730_vm1 }
 0x3b7   :  { %2707 = vmatmul.mubr.bf16.vlgmr.msra.gmra.mrb[32].mxu1 %v3416_v42  ;;  %v2087_v42 = vsel %vm5735_vm4, %v5734_v15, %v5729_v0  ;;  %vm5739_vm9 = vmmov %vm5730_vm1  ;;  %v3422_v15 = vld [vmem:[%s5641_s2 + $0x8] ss:$16 sps:$4 sm:$0xff]  }
 0x3b8   :  { %2624 = vmatpush1.bf16.msra.mxu0 %v1961_v7  ;;  %2728 = vmatpush1.bf16.msra.mxu1 %v1959_v25  ;;  %v5275_v45 = vpop.permute.xlu0 %2267  ;;  %v2090_v32 = vsel %vm5739_vm9, %v5738_v35, %v3388_v16  ;;  %vm5740_vm5 = vmmov %vm5730_vm1 }
 0x3b9   :  { %v5273_v12 = vpop.permute.xlu1 %2265  ;;  %2625 = vmatprep.subr.bf16.mxu0 %v2023_v2  ;;  %2729 = vmatprep.subr.bf16.mxu1 %v1964_v24  ;;  %vm5742_vm14 = vmmov %vm5730_vm1  ;;  %v3398_v2 = vunpack.i.l.bf16 %v5218_v54 }
 0x3ba   :  { %2716 = vmatprep.mubr.bf16.mxu1 %v3419_v1  ;;  %v2089_v1 = vsel %vm5740_vm5, %v5728_v30, %v5738_v35  ;;  %vm5743_vm12 = vmmov %vm5730_vm1  ;;  %vm2346_vm5 = vcmask 932864  }
 0x3bb   :  { %2611 = vmatmul.mubr.bf16.gmra.mrb[36].mxu0 %v3421_v5  ;;  %vm5744_vm11 = vmmov %vm5730_vm1 }
 0x3bc   :  { %2626 = vmatpush1.bf16.msra.mxu0 %v2022_v28  ;;  %2730 = vmatpush1.bf16.msra.mxu1 %v1963_v10  ;;  %v5288_v57 = vpop.permute.xlu0 %2261 }
 0x3bd   :  { %v2014_v58 = vpop.permute.xlu1 %2013  ;;  %2731 = vmatprep.subr.bf16.mxu1 %v2025_v48  ;;  %3139 = vmatprep.mubr.msk.bf16.mxu0 %vm2561_vm15, %v3424_v3 }
 0x3be   :  { %v2026_v51 = vsel %vm5724_vm8, %v5723_v29, %v2014_v58  ;;  %v2027_v62 = vsel %vm5726_vm6, %v2014_v58, %v5725_v22  ;;  %vm5746_vm8 = vmmov %vm5745_vm13 }
 0x3bf   :  { %2627 = vmatprep.subr.bf16.mxu0 %v2027_v62  ;;  %2717 = vmatmul.mubr.bf16.gmra.mrb[36].mxu1 %v3421_v5  ;;  %vm5747_vm6 = vmmov %vm5746_vm8 }
 0x3c0   :  { %2628 = vmatpush1.bf16.msra.mxu0 %v2026_v51  ;;  %2732 = vmatpush1.bf16.msra.mxu1 %v2024_v19  ;;  %v2079_v60 = vpop.permute.xlu0 %2078  ;;  %vm5748_vm0 = vmmov %vm5747_vm6 }
 0x3c1   :  { %v2018_v47 = vpop.permute.xlu1 %2017  ;;  %2629 = vmatprep.subr.bf16.mxu0 %v2088_v6  ;;  %3141 = vmatprep.mubr.msk.bf16.mxu1 %vm2561_vm15, %v3424_v3  ;;  %v2092_v8 = vsel %vm5737_vm7, %v2079_v60, %v5736_v38  ;;  %v2091_v56 = vsel %vm5742_vm14, %v5741_v4, %v2079_v60  ;;  %v2220_v13 = vsel %vm5748_vm0, %v5168_v43, %v3398_v2  ;;  %vm5750_vm1 = vmmov %vm5748_vm0 }
 0x3c2   :  { %v2028_v21 = vsel %vm5732_vm2, %v5725_v22, %v2018_v47  ;;  %v2029_v34 = vsel %vm5733_vm3, %v2018_v47, %v3384_v40  ;;  %vm5751_vm2 = vcmask 941056   ;;  %vm5752_vm3 = vmmov %vm5748_vm0 }
 0x3c3   :  { %2733 = vmatprep.subr.bf16.mxu1 %v2029_v34  ;;  %v2283_v10 = vsel %vm5751_vm2, %v5228_v20, %v5273_v12  ;;  %vm5753_vm4 = vmmov %vm5751_vm2 }
 0x3c4   :  { %2630 = vmatpush1.bf16.msra.mxu0 %v2087_v42  ;;  %2734 = vmatpush1.bf16.msra.mxu1 %v2028_v21  ;;  %v2083_v59 = vpop.permute.xlu0 %2082  ;;  %vm5754_vm7 = vmmov %vm5748_vm0 }
 0x3c5   :  { %v5314_v46 = vpop.permute.xlu1 %3401  ;;  %2631 = vmatprep.subr.bf16.mxu0 %v2092_v8  ;;  %2735 = vmatprep.subr.bf16.mxu1 %v2090_v32  ;;  %v2094_v31 = vsel %vm5743_vm12, %v2083_v59, %v3389_v44  ;;  %v2093_v25 = vsel %vm5744_vm11, %v5736_v38, %v2083_v59  ;;  %vm5755_vm9 = vmmov %vm5751_vm2  ;;  %v3425_v38 = vld [vmem:[%s5641_s2 + $0x2c] ss:$16 sps:$4 sm:$0xff]   ;;  %v3427_v8 = vld [vmem:[%s5641_s2 + $0x28] ss:$16 sps:$4 sm:$0xff]  }
 0x3c6   :  { %vm5756_vm14 = vmmov %vm5751_vm2 }
 0x3c7   :  { %vm5757_vm12 = vmmov %vm5751_vm2 }
 0x3c8   :  { %2632 = vmatpush1.bf16.msra.mxu0 %v2091_v56  ;;  %2736 = vmatpush1.bf16.msra.mxu1 %v2089_v1  ;;  %v5326_v50 = vpop.permute.xlu0 %2275  ;;  %vm5758_vm11 = vmmov %vm5751_vm2 }
 0x3c9   :  { %v5323_v55 = vpop.permute.xlu1 %2328  ;;  %2633 = vmatprep.subr.bf16.mxu0 %v5103_v61  ;;  %2737 = vmatprep.subr.bf16.mxu1 %v2094_v31  ;;  %v3394_v61 = vunpack.i.h.bf16 %v5114_v26  ;;  %v2217_v26 = vsel %vm5746_vm8, %v5204_v63, %v5156_v18  ;;  %v3403_v63 = vunpack.i.l.bf16 %v5314_v46  ;;  %vm5760_vm8 = vmmov %vm5751_vm2 }
 0x3cc   :  { %2634 = vmatpush1.bf16.msra.mxu0 %v5120_v53  ;;  %2738 = vmatpush1.bf16.msra.mxu1 %v2093_v25  ;;  %v2272_v5 = vpop.permute.xlu0 %2271  ;;  %v2218_v53 = vsel %vm5745_vm13, %v5156_v18, %v5180_v52  ;;  %vm5759_vm13 = vmmov %vm5751_vm2 }
 0x3cd   :  { %v2144_v7 = vpop.permute.xlu1 %2143  ;;  %2739 = vmatprep.subr.bf16.mxu1 %v5130_v37 }
 0x3ce   :  { %v2156_v23 = vsel %vm382_vm10, %v5170_v9, %v2144_v7  ;;  %v2157_v11 = vsel %vm382_vm10, %v2144_v7, %v5132_v17 }
 0x3cf   :  { %2635 = vmatprep.subr.bf16.mxu0 %v2157_v11 }
 0x3d0   :  { %2636 = vmatpush1.bf16.msra.mxu0 %v2156_v23  ;;  %2740 = vmatpush1.bf16.msra.mxu1 %v5099_v33  ;;  %v2209_v24 = vpop.permute.xlu0 %2208 }
 0x3d1   :  { %v2148_v37 = vpop.permute.xlu1 %2147  ;;  %2637 = vmatprep.subr.bf16.mxu0 %v2218_v53  ;;  %v2222_v33 = vsel %vm5747_vm6, %v2209_v24, %v5216_v41  ;;  %v2221_v18 = vsel %vm5750_vm1, %v5258_v14, %v2209_v24  ;;  %v2285_v14 = vsel %vm5755_vm9, %v5275_v45, %v3403_v63 }
 0x3d2   :  { %v2158_v9 = vsel %vm382_vm10, %v5132_v17, %v2148_v37  ;;  %v2159_v3 = vsel %vm382_vm10, %v2148_v37, %v3394_v61  ;;  %v3399_v17 = vunpack.i.h.bf16 %v5218_v54  ;;  %vm5749_vm10 = vmmov %vm5748_vm0 }
 0x3d3   :  { %2741 = vmatprep.subr.bf16.mxu1 %v2159_v3  ;;  %v2219_v28 = vsel %vm5749_vm10, %v5180_v52, %v5168_v43  ;;  %v2282_v43 = vsel %vm5753_vm4, %v5288_v57, %v5228_v20  ;;  %v2284_v20 = vsel %vm5758_vm11, %v5273_v12, %v5275_v45 }
 0x3d4   :  { %2638 = vmatpush1.bf16.msra.mxu0 %v2217_v26  ;;  %2742 = vmatpush1.bf16.msra.mxu1 %v2158_v9  ;;  %v2213_v36 = vpop.permute.xlu0 %2212 }
 0x3d5   :  { %v2333_v39 = vpop.permute.xlu1 %2332  ;;  %2639 = vmatprep.subr.bf16.mxu0 %v2222_v33  ;;  %2743 = vmatprep.subr.bf16.mxu1 %v2220_v13  ;;  %v2224_v49 = vsel %vm5752_vm3, %v2213_v36, %v3399_v17  ;;  %v2223_v52 = vsel %vm5754_vm7, %v5216_v41, %v2213_v36  ;;  %v3404_v41 = vunpack.i.h.bf16 %v5314_v46 }
 0x3d8   :  { %2640 = vmatpush1.bf16.msra.mxu0 %v2221_v18  ;;  %2744 = vmatpush1.bf16.msra.mxu1 %v2219_v28  ;;  %v2331_v54 = vpop.permute.xlu0 %2330 }
 0x3d9   :  { %v2327_v48 = vpop.permute.xlu1 %2326  ;;  %2641 = vmatprep.subr.bf16.mxu0 %v2283_v10  ;;  %2745 = vmatprep.subr.bf16.mxu1 %v2224_v49  ;;  %v2348_v57 = vsel %vm2346_vm5, %v5323_v55, %v2331_v54  ;;  %v2349_v60 = vsel %vm2346_vm5, %v2331_v54, %v2333_v39 }
 0x3da   :  { %v2347_v0 = vsel %vm2346_vm5, %v2327_v48, %v5323_v55 }
 0x3dc   :  { %2642 = vmatpush1.bf16.msra.mxu0 %v2282_v43  ;;  %2746 = vmatpush1.bf16.msra.mxu1 %v2223_v52  ;;  %v2335_v29 = vpop.permute.xlu0 %2334 }
 0x3dd   :  { %v2274_v58 = vpop.permute.xlu1 %2273  ;;  %2747 = vmatprep.subr.bf16.mxu1 %v2285_v14  ;;  %v2350_v12 = vsel %vm2346_vm5, %v2333_v39, %v2335_v29 }
 0x3de   :  { %v2286_v51 = vsel %vm5756_vm14, %v2272_v5, %v2274_v58  ;;  %v2287_v22 = vsel %vm5757_vm12, %v2274_v58, %v5326_v50 }
 0x3df   :  { %2643 = vmatprep.subr.bf16.mxu0 %v2287_v22 }
 0x3e0   :  { %2644 = vmatpush1.bf16.msra.mxu0 %v2286_v51  ;;  %2748 = vmatpush1.bf16.msra.mxu1 %v2284_v20  ;;  %v2339_v19 = vpop.permute.xlu0 %2338 }
 0x3e1   :  { %v2278_v62 = vpop.permute.xlu1 %2277  ;;  %2645 = vmatprep.subr.bf16.mxu0 %v2348_v57 }
 0x3e2   :  { %v2288_v40 = vsel %vm5759_vm13, %v5326_v50, %v2278_v62  ;;  %v2289_v30 = vsel %vm5760_vm8, %v2278_v62, %v3404_v41  ;;  %vm3012_vm8 = vcmask 1040384  }
 0x3e3   :  { %2749 = vmatprep.subr.bf16.mxu1 %v2289_v30 }
 0x3e4   :  { %2646 = vmatpush1.bf16.msra.mxu0 %v2347_v0  ;;  %2750 = vmatpush1.bf16.msra.mxu1 %v2288_v40  ;;  %v2343_v6 = vpop.permute.xlu0 %2342 }
 0x3e5   :  { %v2341_v45 = vpop.permute.xlu1 %2340  ;;  %2751 = vmatprep.subr.bf16.mxu1 %v2350_v12 }
 0x3e6   :  { %v2352_v47 = vsel %vm2346_vm5, %v2339_v19, %v2341_v45  ;;  %v2353_v42 = vsel %vm2346_vm5, %v2341_v45, %v2343_v6 }
 0x3e7   :  { %2647 = vmatprep.subr.bf16.mxu0 %v2352_v47 }
 0x3e8   :  { %2752 = vmatpush1.bf16.msra.mxu1 %v2349_v60  ;;  %v2337_v16 = vpop.permute.xlu0 %2336 }
 0x3e9   :  { %v2345_v27 = vpop.permute.xlu1 %2344  ;;  %v2351_v21 = vsel %vm2346_vm5, %v2337_v16, %v2339_v19 }
 0x3ea   :  { %v2354_v34 = vsel %vm2346_vm5, %v2343_v6, %v2345_v27  ;;  %2648 = vmatpush1.bf16.msra.mxu0 %v2351_v21 }
 0x3eb   :  { %2753 = vmatprep.subr.bf16.mxu1 %v2354_v34  ;;  %v2876_v34 = vld [vmem:[%s5642_s3] sm:$0xff] }
 0x3ec   :  { %2754 = vmatpush1.bf16.msra.mxu1 %v2353_v42 }
 0x3ed   :  { %2654 = vmatmul.mubr.bf16.vlgmr.msra.gmra.mrb[32].mxu0 %v3422_v15 }
 0x3ee   :  { %3140 = vmatprep.mubr.msk.bf16.mxu0 %vm2561_vm15, %v3425_v38 }
 0x3ef   :  { %2760 = vmatmul.mubr.bf16.vlgmr.msra.gmra.mrb[32].mxu1 %v3422_v15 }
 0x3f0   :  { %3142 = vmatprep.mubr.msk.bf16.mxu1 %vm2561_vm15, %v3425_v38 }
 0x3f5   :  { %2664 = vmatmul.mubr.bf16.gmra.mrb[36].mxu0 %v3427_v8 }
 0x3f7   :  { %2770 = vmatmul.mubr.bf16.gmra.mrb[36].mxu1 %v3427_v8  ;;  %v2944_v8 = vld [vmem:[%s5642_s3 + $0x80] sm:$0xff] }
 0x3f9   :  { %v2511_v46 = vpop.permute.xlu0 %2510 }
 0x3fa   :  { %v2506_v35 = vpop.permute.xlu1 %2505 }
 0x3fe   :  { %v2516_v33 = vpop.permute.xlu1 %2515 }
 0x402   :  { %v5437_v19 = vpop.permute.xlu1 %2520 }
 0x4c0   :  { %v2655_v32 = vpop.f32.mrb[32].mxu0 }
 0x4c1   :  { %v5401_v59 = vadd.f32 %v2655_v32, %v2506_v35  ;;  %v2657_v44 = vpop.f32.mrb[33].mxu0 }
 0x4c2   :  { %v2761_v1 = vpop.f32.mrb[32].mxu1  ;;  %v5403_v4 = vadd.f32 %v2657_v44, %v2506_v35  ;;  %v2659_v31 = vpop.f32.mrb[34].mxu0 }
 0x4c3   :  { %v5405_v56 = vadd.f32 %v2761_v1, %v2506_v35  ;;  %v2763_v55 = vpop.f32.mrb[33].mxu1  ;;  %v2796_v50 = vmin.f32 %v5401_v59, 0.0  ;;  %v5408_v25 = vadd.f32 %v2659_v31, %v2511_v46  ;;  %v2661_v5 = vpop.f32.mrb[35].mxu0  ;;  %vm2780_vm15 = vcmp.gt.f32.partialorder %v5401_v59, 0.0  ;;  %v2945_v31 = vld [vmem:[%s5642_s3 + $0x88] sm:$0xff] }
 0x4c4   :  { %v5410_v7 = vadd.f32 %v2763_v55, %v2506_v35  ;;  %v2765_v23 = vpop.f32.mrb[34].mxu1  ;;  %v2797_v11 = vmin.f32 %v5403_v4, 0.0  ;;  %v5416_v26 = vadd.f32 %v2661_v5, %v2511_v46  ;;  %vm2781_vm6 = vcmp.gt.f32.partialorder %v5403_v4, 0.0  ;;  %v2877_v35 = vld [vmem:[%s5642_s3 + $0x8] sm:$0xff] }
 0x4c5   :  { %v2798_v61 = vmin.f32 %v5405_v56, 0.0  ;;  %v2767_v2 = vpop.f32.mrb[35].mxu1  ;;  %v2812_v53 = vmul.f32 1.442695, %v2796_v50  ;;  %v2800_v37 = vmin.f32 %v5408_v25, 0.0  ;;  %v5418_v39 = vadd.f32 %v2765_v23, %v2511_v46 }
 0x4c6   :  { %v2814_v24 = vmul.f32 1.442695, %v2797_v11  ;;  %v2799_v3 = vmin.f32 %v5410_v7, 0.0  ;;  %v5420_v36 = vadd.f32 %v2767_v2, %v2511_v46  ;;  %v2801_v28 = vmin.f32 %v5416_v26, 0.0  ;;  %v2946_v2 = vld [vmem:[%s5642_s3 + $0x90] sm:$0xff] }
 0x4c7   :  { %v2816_v9 = vmul.f32 1.442695, %v2798_v61  ;;  %3556 = vpow2.f32 %v2812_v53  ;;  %v2820_v13 = vmul.f32 1.442695, %v2800_v37  ;;  %v2802_v63 = vmin.f32 %v5418_v39, 0.0  ;;  %v2878_v61 = vld [vmem:[%s5642_s3 + $0x10] sm:$0xff] }
 0x4c8   :  { %3558 = vpow2.f32 %v2814_v24  ;;  %v2818_v17 = vmul.f32 1.442695, %v2799_v3  ;;  %v2665_v18 = vpop.f32.mrb[36].mxu0  ;;  %v2822_v48 = vmul.f32 1.442695, %v2801_v28  ;;  %v2803_v54 = vmin.f32 %v5420_v36, 0.0 }
 0x4c9   :  { %3560 = vpow2.f32 %v2816_v9  ;;  %v2667_v10 = vpop.f32.mrb[37].mxu0  ;;  %v5425_v43 = vadd.f32 %v2665_v18, %v2516_v33  ;;  %v2824_v58 = vmul.f32 1.442695, %v2802_v63  ;;  %vm2782_vm0 = vcmp.gt.f32.partialorder %v5405_v56, 0.0  ;;  %v2880_v3 = vld [vmem:[%s5642_s3 + $0x20] sm:$0xff] }
 0x4ca   :  { %v2771_v49 = vpop.f32.mrb[36].mxu1  ;;  %3562 = vpow2.f32 %v2820_v13  ;;  %v2669_v52 = vpop.f32.mrb[38].mxu0  ;;  %v5427_v29 = vadd.f32 %v2667_v10, %v2516_v33  ;;  %v2826_v41 = vmul.f32 1.442695, %v2803_v54  ;;  %vm2784_vm10 = vcmp.gt.f32.partialorder %v5408_v25, 0.0 }
 0x4cb   :  { %v2773_v14 = vpop.f32.mrb[37].mxu1  ;;  %3564 = vpow2.f32 %v2818_v17  ;;  %v5429_v51 = vadd.f32 %v2771_v49, %v2516_v33  ;;  %v2671_v22 = vpop.f32.mrb[39].mxu0  ;;  %v2804_v57 = vmin.f32 %v5425_v43, 0.0  ;;  %v5443_v12 = vadd.f32 %v2669_v52, %v5437_v19  ;;  %v2947_v49 = vld [vmem:[%s5642_s3 + $0x98] sm:$0xff] }
 0x4cc   :  { %v2775_v20 = vpop.f32.mrb[38].mxu1  ;;  %3566 = vpow2.f32 %v2822_v48  ;;  %v2805_v40 = vmin.f32 %v5427_v29, 0.0  ;;  %v5445_v6 = vadd.f32 %v2773_v14, %v2516_v33  ;;  %v5448_v47 = vadd.f32 %v2671_v22, %v5437_v19  ;;  %v2948_v33 = vld [vmem:[%s5642_s3 + $0xa0] sm:$0xff]  ;;  %v2949_v22 = vld [vmem:[%s5642_s3 + $0xa8] sm:$0xff] }
 0x4cd   :  { %v5433_v62 = vpop.f32.mrb[39].mxu1  ;;  %3568 = vpow2.f32 %v2824_v58  ;;  %v2828_v30 = vmul.f32 1.442695, %v2804_v57  ;;  %v2806_v0 = vmin.f32 %v5429_v51, 0.0  ;;  %v5451_v60 = vadd.f32 %v2775_v20, %v5437_v19 }
 0x4ce   :  { %3570 = vpow2.f32 %v2826_v41  ;;  %v2830_v45 = vmul.f32 1.442695, %v2805_v40  ;;  %vm2783_vm1 = vcmp.gt.f32.partialorder %v5410_v7, 0.0  ;;  %v2808_v16 = vmin.f32 %v5443_v12, 0.0 }
 0x4cf   :  { %3572 = vpow2.f32 %v2828_v30  ;;  %v2832_v27 = vmul.f32 1.442695, %v2806_v0  ;;  %vm2785_vm2 = vcmp.gt.f32.partialorder %v5416_v26, 0.0  ;;  %vm2786_vm3 = vcmp.gt.f32.partialorder %v5418_v39, 0.0  ;;  %v2950_v0 = vld [vmem:[%s5642_s3 + $0xb0] sm:$0xff] }
 0x4d0   :  { %3574 = vpow2.f32 %v2830_v45  ;;  %v2807_v15 = vmin.f32 %v5445_v6, 0.0  ;;  %v2836_v32 = vmul.f32 1.442695, %v2808_v16  ;;  %v2809_v46 = vmin.f32 %v5448_v47, 0.0 }
 0x4d1   :  { %v3557_v21 = vpop.eup %3556  ;;  %3576 = vpow2.f32 %v2832_v27  ;;  %vm2787_vm4 = vcmp.gt.f32.partialorder %v5420_v36, 0.0  ;;  %v2810_v50 = vmin.f32 %v5451_v60, 0.0  ;;  %vm2788_vm7 = vcmp.gt.f32.partialorder %v5425_v43, 0.0 }
 0x4d2   :  { %v3559_v42 = vpop.eup %3558  ;;  %v3143_v38 = vadd.f32 -1.0, %v3557_v21  ;;  %v5472_v55 = vmul.f32 1.442695, %v2807_v15  ;;  %3578 = vpow2.f32 %v2836_v32  ;;  %v5485_v53 = vmul.f32 1.442695, %v2809_v46  ;;  %v2883_v21 = vld [vmem:[%s5642_s3 + $0x38] sm:$0xff] }
 0x4d3   :  { %v3561_v44 = vpop.eup %3560  ;;  %v3144_v1 = vadd.f32 -1.0, %v3559_v42  ;;  %vm2789_vm9 = vcmp.gt.f32.partialorder %v5427_v29, 0.0  ;;  %vm2790_vm5 = vcmp.gt.f32.partialorder %v5429_v51, 0.0  ;;  %vm2792_vm14 = vcmp.gt.f32.partialorder %v5443_v12, 0.0 }
 0x4d4   :  { %v3563_v5 = vpop.eup %3562  ;;  %v2860_v23 = vsel %vm2780_vm15, %v5401_v59, %v3143_v38  ;;  %v3145_v11 = vadd.f32 -1.0, %v3561_v44  ;;  %3580 = vpow2.f32 %v5472_v55  ;;  %vm2791_vm12 = vcmp.gt.f32.partialorder %v5445_v6, 0.0 }
 0x4d5   :  { %v3565_v37 = vpop.eup %3564  ;;  %v2892_v24 = vmul.f32 %v2876_v34, %v2860_v23  ;;  %v2960_v9 = vmul.f32 %v2944_v8, %v2860_v23  ;;  %v2861_v59 = vsel %vm2781_vm6, %v5403_v4, %v3144_v1  ;;  %v3147_v13 = vadd.f32 -1.0, %v3563_v5  ;;  %v2879_v4 = vld [vmem:[%s5642_s3 + $0x18] sm:$0xff]  ;;  %v2952_v5 = vld [vmem:[%s5642_s3 + $0xc0] sm:$0xff] }
 0x4d6   :  { %v3567_v17 = vpop.eup %3566  ;;  %v2893_v28 = vmul.f32 %v2877_v35, %v2861_v59  ;;  %v2961_v18 = vmul.f32 %v2945_v31, %v2861_v59  ;;  %v2862_v63 = vsel %vm2782_vm0, %v5405_v56, %v3145_v11  ;;  %v3146_v10 = vadd.f32 -1.0, %v3565_v37  ;;  %v2881_v56 = vld [vmem:[%s5642_s3 + $0x28] sm:$0xff]  ;;  %v2951_v34 = vld [vmem:[%s5642_s3 + $0xb8] sm:$0xff]  ;;  %v2884_v31 = vld [vmem:[%s5642_s3 + $0x40] sm:$0xff] }
 0x4d7   :  { %v3569_v48 = vpop.eup %3568  ;;  %v2894_v54 = vmul.f32 %v2878_v61, %v2862_v63  ;;  %v2962_v52 = vmul.f32 %v2946_v2, %v2862_v63  ;;  %v2864_v14 = vsel %vm2784_vm10, %v5408_v25, %v3147_v13  ;;  %v3148_v58 = vadd.f32 -1.0, %v3567_v17  ;;  %v2882_v25 = vld [vmem:[%s5642_s3 + $0x30] sm:$0xff] }
 0x4d8   :  { %v3571_v20 = vpop.eup %3570  ;;  %v2896_v41 = vmul.f32 %v2880_v3, %v2864_v14  ;;  %v2964_v57 = vmul.f32 %v2948_v33, %v2864_v14  ;;  %v2863_v40 = vsel %vm2783_vm1, %v5410_v7, %v3146_v10  ;;  %v3149_v30 = vadd.f32 -1.0, %v3569_v48  ;;  %v2953_v10 = vld [vmem:[%s5642_s3 + $0xc8] sm:$0xff]  ;;  %v2956_v14 = vld [vmem:[%s5642_s3 + $0xe0] sm:$0xff] }
 0x4d9   :  { %v2895_v45 = vmul.f32 %v2879_v4, %v2863_v40  ;;  %v2963_v27 = vmul.f32 %v2947_v49, %v2863_v40  ;;  %v2865_v7 = vsel %vm2785_vm2, %v5416_v26, %v3148_v58  ;;  %v3150_v16 = vadd.f32 -1.0, %v3571_v20  ;;  %v3573_v15 = vpop.eup %3572 }
 0x4da   :  { %v2897_v42 = vmul.f32 %v2881_v56, %v2865_v7  ;;  %v2965_v38 = vmul.f32 %v2949_v22, %v2865_v7  ;;  %v2866_v8 = vsel %vm2786_vm3, %v5418_v39, %v3149_v30  ;;  %v2908_v35 = vadd.f32 %v2896_v41, %v2892_v24  ;;  %v3575_v32 = vpop.eup %3574 }
 0x4db   :  { %v2898_v46 = vmul.f32 %v2882_v25, %v2866_v8  ;;  %v2966_v26 = vmul.f32 %v2950_v0, %v2866_v8  ;;  %v2867_v44 = vsel %vm2787_vm4, %v5420_v36, %v3150_v16  ;;  %v3151_v1 = vadd.f32 -1.0, %v3573_v15  ;;  %v3577_v23 = vpop.eup %3576  ;;  %v2955_v8 = vld [vmem:[%s5642_s3 + $0xd8] sm:$0xff] }
 0x4dc   :  { %v2917_v11 = vadd.f32 %v2897_v42, %v2893_v28  ;;  %v2985_v39 = vadd.f32 %v2965_v38, %v2961_v18  ;;  %v2899_v61 = vmul.f32 %v2883_v21, %v2867_v44  ;;  %v2967_v2 = vmul.f32 %v2951_v34, %v2867_v44  ;;  %v3579_v3 = vpop.eup %3578  ;;  %v2885_v28 = vld [vmem:[%s5642_s3 + $0x48] sm:$0xff]  ;;  %v2887_v38 = vld [vmem:[%s5642_s3 + $0x58] sm:$0xff] }
 0x4dd   :  { %v2926_v37 = vadd.f32 %v2898_v46, %v2894_v54  ;;  %v2994_v24 = vadd.f32 %v2966_v26, %v2962_v52  ;;  %v2868_v36 = vsel %vm2788_vm7, %v5425_v43, %v3151_v1  ;;  %v2976_v59 = vadd.f32 %v2964_v57, %v2960_v9  ;;  %v2886_v43 = vld [vmem:[%s5642_s3 + $0x50] sm:$0xff]  ;;  %v2888_v52 = vld [vmem:[%s5642_s3 + $0x60] sm:$0xff]  ;;  %v2889_v44 = vld [vmem:[%s5642_s3 + $0x68] sm:$0xff] }
 0x4de   :  { %v5550_v33 = vadd.f32 %v2899_v61, %v2895_v45  ;;  %v5552_v13 = vadd.f32 %v2967_v2, %v2963_v27  ;;  %v2900_v17 = vmul.f32 %v2884_v31, %v2868_v36  ;;  %v2968_v63 = vmul.f32 %v2952_v5, %v2868_v36  ;;  %v2954_v9 = vld [vmem:[%s5642_s3 + $0xd0] sm:$0xff]  ;;  %v2957_v1 = vld [vmem:[%s5642_s3 + $0xe8] sm:$0xff] }
 0x4df   :  { %v3152_v18 = vadd.f32 -1.0, %v3575_v32  ;;  %v3153_v4 = vadd.f32 -1.0, %v3577_v23  ;;  %v3155_v49 = vadd.f32 -1.0, %v3579_v3  ;;  %3582 = vpow2.f32 %v5485_v53  ;;  %v2890_v2 = vld [vmem:[%s5642_s3 + $0x70] sm:$0xff] }
 0x4e0   :  { %v2909_v48 = vadd.f32 %v2908_v35, %v2900_v17  ;;  %v2977_v54 = vadd.f32 %v2976_v59, %v2968_v63  ;;  %v2840_v58 = vmul.f32 1.442695, %v2810_v50  ;;  %v5587_v20 = vadd.f32 %v5433_v62, %v5437_v19  ;;  %v3581_v62 = vpop.eup %3580 }
 0x4e1   :  { %v2869_v56 = vsel %vm2789_vm9, %v5427_v29, %v3152_v18  ;;  %v2870_v55 = vsel %vm2790_vm5, %v5429_v51, %v3153_v4  ;;  %v2872_v22 = vsel %vm2792_vm14, %v5443_v12, %v3155_v49  ;;  %v3154_v42 = vadd.f32 -1.0, %v3581_v62 }
 0x4e2   :  { %v2901_v53 = vmul.f32 %v2885_v28, %v2869_v56  ;;  %v2969_v41 = vmul.f32 %v2953_v10, %v2869_v56  ;;  %v2902_v57 = vmul.f32 %v2886_v43, %v2870_v55  ;;  %v2970_v50 = vmul.f32 %v2954_v9, %v2870_v55 }
 0x4e3   :  { %v2904_v40 = vmul.f32 %v2888_v52, %v2872_v22  ;;  %v2972_v30 = vmul.f32 %v2956_v14, %v2872_v22  ;;  %3584 = vpow2.f32 %v2840_v58  ;;  %v2811_v7 = vmin.f32 %v5587_v20, 0.0  ;;  %v2891_v22 = vld [vmem:[%s5642_s3 + $0x78] sm:$0xff] }
 0x4e4   :  { %v2918_v29 = vadd.f32 %v2917_v11, %v2901_v53  ;;  %v2986_v25 = vadd.f32 %v2985_v39, %v2969_v41  ;;  %v2927_v0 = vadd.f32 %v2926_v37, %v2902_v57  ;;  %v2995_v45 = vadd.f32 %v2994_v24, %v2970_v50  ;;  %v2958_v37 = vld [vmem:[%s5642_s3 + $0xf0] sm:$0xff]  ;;  %v2959_v53 = vld [vmem:[%s5642_s3 + $0xf8] sm:$0xff] }
 0x4e5   :  { %v2910_v51 = vadd.f32 %v2909_v48, %v2904_v40  ;;  %v2978_v27 = vadd.f32 %v2977_v54, %v2972_v30  ;;  %v2842_v21 = vmul.f32 1.442695, %v2811_v7  ;;  %v2871_v26 = vsel %vm2791_vm12, %v5445_v6, %v3154_v42 }
 0x4e6   :  { %vm2793_vm11 = vcmp.gt.f32.partialorder %v5448_v47, 0.0  ;;  %v2903_v11 = vmul.f32 %v2887_v38, %v2871_v26  ;;  %v2971_v39 = vmul.f32 %v2955_v8, %v2871_v26  ;;  %vm2794_vm13 = vcmp.gt.f32.partialorder %v5451_v60, 0.0 }
 0x4e7   :  { %v2911_v12 = vrot.slane %v2910_v51, 4  ;;  %v2979_v16 = vrot.slane %v2978_v27, 4  ;;  %3586 = vpow2.f32 %v2842_v21  ;;  %vm2795_vm15 = vcmp.gt.f32.partialorder %v5587_v20, 0.0 }
 0x4e8   :  { %v2936_v24 = vadd.f32 %v5550_v33, %v2903_v11  ;;  %v3004_v36 = vadd.f32 %v5552_v13, %v2971_v39  ;;  %vm3017_vm6 = vcmask 1041408   ;;  %vm3028_vm0 = vcmask 7168  }
 0x4e9   :  { %v2912_v19 = vadd.f32 %v2911_v12, %v2910_v51  ;;  %v2980_v34 = vadd.f32 %v2979_v16, %v2978_v27  ;;  %v3583_v15 = vpop.eup %3582  ;;  %vm3037_vm10 = vcmask 9216  }
 0x4ea   :  { %v3156_v46 = vadd.f32 -1.0, %v3583_v15 }
 0x4eb   :  { %v2913_v35 = vrot.slane %v2912_v19, 2  ;;  %v2981_v32 = vrot.slane %v2980_v34, 2 }
 0x4ec   :  { %v2873_v61 = vsel %vm2793_vm11, %v5448_v47, %v3156_v46 }
 0x4ed   :  { %v3585_v31 = vpop.eup %3584  ;;  %v2914_v5 = vadd.f32 %v2913_v35, %v2912_v19  ;;  %v2982_v23 = vadd.f32 %v2981_v32, %v2980_v34  ;;  %v2905_v59 = vmul.f32 %v2889_v44, %v2873_v61  ;;  %v2973_v3 = vmul.f32 %v2957_v1, %v2873_v61 }
 0x4ee   :  { %v3157_v6 = vadd.f32 -1.0, %v3585_v31 }
 0x4ef   :  { %v2915_v47 = vrot.slane %v2914_v5, 1  ;;  %v2983_v63 = vrot.slane %v2982_v23, 1  ;;  %v2919_v28 = vadd.f32 %v2918_v29, %v2905_v59  ;;  %v2987_v18 = vadd.f32 %v2986_v25, %v2973_v3 }
 0x4f0   :  { %v2874_v17 = vsel %vm2794_vm13, %v5451_v60, %v3157_v6 }
 0x4f1   :  { %v2906_v10 = vmul.f32 %v2890_v2, %v2874_v17  ;;  %v2974_v4 = vmul.f32 %v2958_v37, %v2874_v17  ;;  %v2916_v43 = vadd.f32 %v2915_v47, %v2914_v5  ;;  %v2984_v9 = vadd.f32 %v2983_v63, %v2982_v23  ;;  %v3587_v49 = vpop.eup %3586  ;;  %v3030_v63 = vld [vmem:[%s5643_s5] sm:$0x3] }
 0x4f2   :  { %v2920_v48 = vrot.slane %v2919_v28, 4  ;;  %v2988_v54 = vrot.slane %v2987_v18, 4  ;;  %v3158_v13 = vadd.f32 -1.0, %v3587_v49 }
 0x4f3   :  { %v2928_v52 = vadd.f32 %v2927_v0, %v2906_v10  ;;  %v2996_v33 = vadd.f32 %v2995_v45, %v2974_v4  ;;  %v3013_v14 = vsel %vm3012_vm8, %v2916_v43, %v2984_v9 }
 0x4f4   :  { %v2921_v60 = vadd.f32 %v2920_v48, %v2919_v28  ;;  %v2989_v58 = vadd.f32 %v2988_v54, %v2987_v18  ;;  %v2875_v41 = vsel %vm2795_vm15, %v5587_v20, %v3158_v13  ;;  %v3018_v46 = vsel %vm3017_vm6, %v3013_v14, 0.0 }
 0x4f5   :  { %v2929_v56 = vrot.slane %v2928_v52, 4  ;;  %v2997_v55 = vrot.slane %v2996_v33, 4  ;;  %v2907_v29 = vmul.f32 %v2891_v22, %v2875_v41  ;;  %v2975_v25 = vmul.f32 %v2959_v53, %v2875_v41 }
 0x4f6   :  { %v2922_v57 = vrot.slane %v2921_v60, 2  ;;  %v2990_v50 = vrot.slane %v2989_v58, 2 }
 0x4f7   :  { %v2930_v40 = vadd.f32 %v2929_v56, %v2928_v52  ;;  %v2998_v30 = vadd.f32 %v2997_v55, %v2996_v33  ;;  %v2937_v7 = vadd.f32 %v2936_v24, %v2907_v29  ;;  %v3005_v12 = vadd.f32 %v3004_v36, %v2975_v25 }
 0x4f8   :  { %v2923_v0 = vadd.f32 %v2922_v57, %v2921_v60  ;;  %v2991_v45 = vadd.f32 %v2990_v50, %v2989_v58 }
 0x4f9   :  { %v2931_v51 = vrot.slane %v2930_v40, 2  ;;  %v2999_v27 = vrot.slane %v2998_v30, 2  ;;  %v2938_v34 = vrot.slane %v2937_v7, 4  ;;  %v3006_v15 = vrot.slane %v3005_v12, 4 }
 0x4fa   :  { %v2924_v62 = vrot.slane %v2923_v0, 1  ;;  %v2992_v19 = vrot.slane %v2991_v45, 1 }
 0x4fb   :  { %v2932_v16 = vadd.f32 %v2931_v51, %v2930_v40  ;;  %v3000_v21 = vadd.f32 %v2999_v27, %v2998_v30  ;;  %v2939_v35 = vadd.f32 %v2938_v34, %v2937_v7  ;;  %v3007_v32 = vadd.f32 %v3006_v15, %v3005_v12 }
 0x4fc   :  { %v2925_v20 = vadd.f32 %v2924_v62, %v2923_v0  ;;  %v2993_v42 = vadd.f32 %v2992_v19, %v2991_v45 }
 0x4fd   :  { %v2933_v38 = vrot.slane %v2932_v16, 1  ;;  %v3001_v8 = vrot.slane %v3000_v21, 1  ;;  %v2940_v31 = vrot.slane %v2939_v35, 2  ;;  %v3008_v5 = vrot.slane %v3007_v32, 2 }
 0x4fe   :  { %v3014_v26 = vsel %vm3012_vm8, %v2925_v20, %v2993_v42 }
 0x4ff   :  { %v2934_v44 = vadd.f32 %v2933_v38, %v2932_v16  ;;  %v3002_v1 = vadd.f32 %v3001_v8, %v3000_v21  ;;  %v3019_v23 = vsel %vm3017_vm6, %v3014_v26, 0.0  ;;  %v2941_v61 = vadd.f32 %v2940_v31, %v2939_v35 }
 0x500   :  { %v3020_v11 = vadd.f32 %v3019_v23, %v3018_v46  ;;  %v3009_v6 = vadd.f32 %v3008_v5, %v3007_v32 }
 0x501   :  { %v3015_v39 = vsel %vm3012_vm8, %v2934_v44, %v3002_v1  ;;  %v2942_v2 = vrot.slane %v2941_v61, 1 }
 0x502   :  { %3021 = vadd.xlane.f32.xlu0 %v3020_v11  ;;  %v3010_v37 = vrot.slane %v3009_v6, 1  ;;  %v3023_v59 = vsel %vm3017_vm6, %v3015_v39, 0.0 }
 0x503   :  { %v2943_v24 = vadd.f32 %v2942_v2, %v2941_v61 }
 0x504   :  { %v3011_v36 = vadd.f32 %v3010_v37, %v3009_v6 }
 0x506   :  { %v3016_v3 = vsel %vm3012_vm8, %v2943_v24, %v3011_v36 }
 0x507   :  { %v3024_v17 = vsel %vm3017_vm6, %v3016_v3, 0.0 }
 0x508   :  { %v3025_v47 = vadd.f32 %v3024_v17, %v3023_v59 }
 0x50a   :  { %3026 = vadd.xlane.f32.xlu1 %v3025_v47 }
 0x518   :  { %3033 = vperm.xlu0 %3407, %v3030_v63  }
 0x58f   :  { %v3022_v28 = vpop.xlane.xlu0 %3021 }
 0x597   :  { %v3034_v18 = vpop.permute.xlu0 %3033  ;;  %v3027_v10 = vpop.xlane.xlu1 %3026 }
 0x598   :  { %v3029_v4 = vsel %vm3028_vm0, %v3022_v28, %v3027_v10 }
 0x599   :  { %v3036_v43 = vadd.f32 %v3034_v18, %v3029_v4 }
 0x59b   :  { %3038 = vst.msk [vmem:[%s5644_s6] sm:$0x3] %vm3037_vm10, %v3036_v43 }

</bundles_post_ra>
